<compile_context>
chip_gen: v5e
topology: v5e:2x2
jax: 0.10.0
libtpu: 0.0.40
codegen_flags: <defaults>
</compile_context>

<pallas_src>
import jax
import jax.numpy as jnp
from jax import lax
from jax.experimental import pallas as pl
from jax.experimental.pallas import tpu as pltpu

_VMEM_LIMIT = 32 * 1024 * 1024   # <= half of v7x's 64 MiB physical; legal on v5e/v6e too
_MAX_ROWS = 512                  # row tile cap (keeps blocks << VMEM on every generation)


def _round_up(x, m):
    return -(-x // m) * m


def _pick_row_tile(rows, max_rows=_MAX_ROWS):
    """Row tile: multiple of 16 (bf16-sublane friendly) or the full extent, capped at
    max_rows, and split into >=2 blocks when possible (v7x has 2 TensorCores)."""
    if rows > max_rows:
        return max_rows
    half = _round_up(-(-rows // 2), 16)
    return half if half < rows else rows


# ----------------------------------------------------------------------------
# Pallas kernels
# ----------------------------------------------------------------------------
def _conv_relu_pool_kernel(p_ref, w_ref, b_ref, o_ref):
    """Fused conv-as-GEMM + bias + ReLU + 2x2/stride-2 max-pool for a block of rows.

    p_ref : (4, tile, Kp)  im2col patches; leading axis = 2x2 pool membership,
                           rows = flattened (n, h_p, w_p) pooled output pixels.
    w_ref : (Kp, Op)       weights, rows in (ki, kj, cin) order; K and O zero-padded.
    b_ref : (1, Op)        f32 bias (zero in padded output channels).
    o_ref : (tile, Op)     pooled activation, bf16, lane-dense (Op multiple of 128).
    """
    four, tile, kp = p_ref.shape
    op = o_ref.shape[-1]
    # One long MXU push instead of four short ones; reshapes only touch the sublane
    # axis (tile is a multiple of 8), so no relayout.
    lhs = p_ref[...].reshape(four * tile, kp)
    acc = jnp.dot(lhs, w_ref[...], preferred_element_type=jnp.float32)
    acc = acc.reshape(four, tile, op)
    m = jnp.max(acc, axis=0)                      # elementwise max over pool members
    # relu(max_k(acc_k) + bias) == max_k(relu(acc_k + bias)); epilogue stays in f32.
    o_ref[...] = jnp.maximum(m + b_ref[...], 0.0).astype(o_ref.dtype)


def _fc_head_kernel(x_ref, w1_ref, b1_ref, w2_ref, b2_ref, o_ref):
    """Fused fc1 + ReLU + fc2 + log_softmax.  bf16 MXU operands, f32 epilogue."""
    h = jnp.dot(x_ref[...], w1_ref[...], preferred_element_type=jnp.float32)
    h = jnp.maximum(h + b1_ref[...], 0.0)
    z = jnp.dot(h.astype(w2_ref.dtype), w2_ref[...], preferred_element_type=jnp.float32)
    z = z + b2_ref[...]
    z = z - jnp.max(z, axis=-1, keepdims=True)
    lse = jnp.log(jnp.sum(jnp.exp(z), axis=-1, keepdims=True))
    o_ref[...] = (z - lse).astype(o_ref.dtype)


# ----------------------------------------------------------------------------
# Wrappers (JAX glue + pallas_call)
# ----------------------------------------------------------------------------
def _im2col_pool_members(x_nhwc, kh, kw, k_pad_to):
    """im2col (VALID, stride 1), grouped by 2x2-pool membership, row-flattened.

    Returns a (4, N*Hp*Wp, Kp) bf16 array (members (0,0),(0,1),(1,0),(1,1)), with
    column order (ki, kj, cin) and the reduction dim zero-padded to k_pad_to.
    """
    # TODO(synk): this im2col is XLA glue; a fully in-kernel im2col would cut the
    # HBM patch traffic (~10-20x the raw image bytes) further.
    N, H, W, C = x_nhwc.shape
    Ho, Wo = H - kh + 1, W - kw + 1
    Hp, Wp = Ho // 2, Wo // 2
    K = kh * kw * C
    cols = [x_nhwc[:, i:i + Ho, j:j + Wo, :] for i in range(kh) for j in range(kw)]
    p = jnp.stack(cols, axis=3)                          # (N, Ho, Wo, kh*kw, C)
    p = p.reshape(N, Hp, 2, Wp, 2, K)                    # split pool, merge (k, c)
    p = jnp.transpose(p, (2, 4, 0, 1, 3, 5))             # (2, 2, N, Hp, Wp, K)
    p = p.reshape(4, N * Hp * Wp, K)
    if k_pad_to != K:
        p = jnp.pad(p, ((0, 0), (0, 0), (0, k_pad_to - K)))
    return p.astype(jnp.bfloat16), (Hp, Wp)


def conv_relu_pool(x_nhwc, w_mat, bias, *, kh=5, kw=5):
    """VALID conv (stride 1) + bias + ReLU + 2x2/2 max-pool, fused in one kernel.

    Grid is over row tiles of the flattened (batch, pooled pixels) axis; weights stay
    resident (constant index_map).  Output channels are padded/lane-dense (Op = 128k).
    """
    N, _, _, C = x_nhwc.shape
    Kp, Op = w_mat.shape
    assert Kp >= kh * kw * C
    patches, (Hp, Wp) = _im2col_pool_members(x_nhwc, kh, kw, Kp)
    R = N * Hp * Wp
    tile = _pick_row_tile(R)

    flops = 2 * (4 * R) * Kp * Op
    bytes_accessed = 4 * R * Kp * 2 + Kp * Op * 2 + Op * 4 + R * Op * 2

    out = pl.pallas_call(
        _conv_relu_pool_kernel,
        out_shape=jax.ShapeDtypeStruct((R, Op), jnp.bfloat16),
        grid=(pl.cdiv(R, tile),),
        in_specs=[pl.BlockSpec((4, tile, Kp), lambda i: (0, i, 0)),
                  pl.BlockSpec((Kp, Op), lambda i: (0, 0)),
                  pl.BlockSpec((1, Op), lambda i: (0, 0))],
        out_specs=pl.BlockSpec((tile, Op), lambda i: (i, 0)),
        compiler_params=pltpu.CompilerParams(
            dimension_semantics=("parallel",),
            vmem_limit_bytes=_VMEM_LIMIT),
        cost_estimate=pl.CostEstimate(flops=flops, transcendentals=0,
                                      bytes_accessed=bytes_accessed),
    )(patches, w_mat, bias)
    return out.reshape(N, Hp, Wp, Op)


def fc_head(x, w1, b1, w2, b2, *, block_rows=_MAX_ROWS):
    """Fused fc1 + ReLU + fc2 + log_softmax, gridded over batch-row blocks."""
    M, K1 = x.shape
    H = w1.shape[1]
    C = w2.shape[1]
    tm = _pick_row_tile(M, block_rows)
    flops = 2 * M * (K1 * H + H * C)
    bytes_accessed = M * K1 * 2 + K1 * H * 2 + H * 4 + H * C * 2 + C * 4 + M * C * 4

    return pl.pallas_call(
        _fc_head_kernel,
        out_shape=jax.ShapeDtypeStruct((M, C), jnp.float32),
        grid=(pl.cdiv(M, tm),),
        in_specs=[pl.BlockSpec((tm, K1), lambda i: (i, 0)),
                  pl.BlockSpec((K1, H), lambda i: (0, 0)),
                  pl.BlockSpec((1, H), lambda i: (0, 0)),
                  pl.BlockSpec((H, C), lambda i: (0, 0)),
                  pl.BlockSpec((1, C), lambda i: (0, 0))],
        out_specs=pl.BlockSpec((tm, C), lambda i: (i, 0)),
        compiler_params=pltpu.CompilerParams(
            dimension_semantics=("parallel",),
            vmem_limit_bytes=_VMEM_LIMIT),
        cost_estimate=pl.CostEstimate(flops=flops, transcendentals=M * (C + 1),
                                      bytes_accessed=bytes_accessed),
    )(x, w1, b1, w2, b2)


# ----------------------------------------------------------------------------
# Parameters (PyTorch layout) + one-time re-layout for the kernels
# ----------------------------------------------------------------------------
def init_params(key):
    """Deterministic init with PyTorch parameter shapes (uniform +/- 1/sqrt(fan_in))."""
    ks = jax.random.split(key, 8)

    def u(k, shape, fan_in):
        bound = 1.0 / jnp.sqrt(jnp.float32(fan_in))
        return jax.random.uniform(k, shape, jnp.float32, -bound, bound)

    w1 = u(ks[0], (20, 1, 5, 5), 1 * 5 * 5)
    b1 = u(ks[1], (20,), 1 * 5 * 5)
    w2 = u(ks[2], (50, 20, 5, 5), 20 * 5 * 5)
    b2 = u(ks[3], (50,), 20 * 5 * 5)
    fw1 = u(ks[4], (500, 800), 800)
    fb1 = u(ks[5], (500,), 800)
    fw2 = u(ks[6], (10, 500), 500)
    fb2 = u(ks[7], (10,), 500)
    return (w1, b1, w2, b2, fw1, fb1, fw2, fb2)


def prepare_params(params, k_pad=32, lane_pad=128):
    """One-time (outside the hot path) re-layout of PyTorch-style parameters.

    * Conv weights -> (Kp, Op) GEMM form, K padded to k_pad, O zero-padded to 128
      lanes (padded channels therefore produce exactly-zero activations).
    * fc1 consumes conv2's *padded* NHWC activation directly: its rows are laid out
      in (h, w, c_pad) order with zero rows for padded channels; the hidden dim is
      zero-padded 500 -> 512 (fb1/fw2 padded consistently), a numerical no-op.
    """
    w1, b1, w2, b2, fw1, fb1, fw2, fb2 = params

    def conv_w(w):
        O, C, kh, kw = w.shape
        m = jnp.transpose(w, (2, 3, 1, 0)).reshape(kh * kw * C, O)   # rows = (ki,kj,c)
        Kp = _round_up(kh * kw * C, k_pad)
        Op = _round_up(O, lane_pad)
        m = jnp.pad(m, ((0, Kp - m.shape[0]), (0, Op - O)))
        return m.astype(jnp.bfloat16)

    def conv_b(b):
        Op = _round_up(b.shape[0], lane_pad)
        return jnp.pad(b, (0, Op - b.shape[0])).reshape(1, -1).astype(jnp.float32)

    # fc1: PyTorch flattens NCHW (c, h, w); our conv2 activation is NHWC with channels
    # padded to `Cp` lanes, flattened as (h, w, c_pad).  Permute + pad once here.
    Hd = fw1.shape[0]                                    # 500
    Cc = w2.shape[0]                                     # 50 conv2 output channels
    side = int(round((fw1.shape[1] // Cc) ** 0.5))       # 4
    Cp = _round_up(Cc, lane_pad)                         # 128
    Hp = _round_up(Hd, lane_pad)                         # 512
    fw1_r = fw1.reshape(Hd, Cc, side, side)              # (hidden, c, h, w)
    fw1_r = jnp.transpose(fw1_r, (2, 3, 1, 0))           # (h, w, c, hidden)
    fw1_r = jnp.pad(fw1_r, ((0, 0), (0, 0), (0, Cp - Cc), (0, Hp - Hd)))
    fw1_p = fw1_r.reshape(side * side * Cp, Hp).astype(jnp.bfloat16)   # (2048, 512)

    return dict(
        w1=conv_w(w1), b1=conv_b(b1),
        w2=conv_w(w2), b2=conv_b(b2),
        fw1=fw1_p,
        fb1=jnp.pad(fb1, (0, Hp - Hd)).reshape(1, -1).astype(jnp.float32),
        fw2=jnp.pad(fw2.T, ((0, Hp - Hd), (0, 0))).astype(jnp.bfloat16),
        fb2=fb2.reshape(1, -1).astype(jnp.float32),
    )


# ----------------------------------------------------------------------------
# Forward pass (matches PyTorch Net.forward semantics)
# ----------------------------------------------------------------------------
def net_forward(x_nchw, p, *, conv1_channels=20):
    x = jnp.transpose(x_nchw, (0, 2, 3, 1)).astype(jnp.bfloat16)   # NCHW -> NHWC, bf16
    x = conv_relu_pool(x, p["w1"], p["b1"])               # (N, 12, 12, 128) [20 real]
    x = conv_relu_pool(x[..., :conv1_channels],           # drop zero-padded channels
                       p["w2"], p["b2"])                  # (N, 4, 4, 128)  [50 real]
    x = x.reshape(x.shape[0], -1)                         # (N, 2048) padded NHWC flatten
    return fc_head(x, p["fw1"], p["fb1"], p["fw2"], p["fb2"])      # (N, 10) f32


def reference_forward(x_nchw, params):
    """Pure-XLA reference with the same bf16-operand / f32-accumulate policy."""
    w1, b1, w2, b2, fw1, fb1, fw2, fb2 = params

    def conv(x, w, b):
        y = lax.conv_general_dilated(
            x, w.astype(jnp.bfloat16), window_strides=(1, 1), padding="VALID",
            dimension_numbers=("NCHW", "OIHW", "NCHW"),
            preferred_element_type=jnp.float32)
        return jnp.maximum(y + b.reshape(1, -1, 1, 1), 0.0)

    def pool(x):
        return lax.reduce_window(x, -jnp.inf, lax.max,
                                 (1, 1, 2, 2), (1, 1, 2, 2), "VALID")

    h = pool(conv(x_nchw.astype(jnp.bfloat16), w1, b1)).astype(jnp.bfloat16)
    h = pool(conv(h, w2, b2)).astype(jnp.bfloat16)
    h = h.reshape(h.shape[0], -1)                                   # NCHW flatten
    h = jnp.maximum(
        jnp.dot(h, fw1.T.astype(jnp.bfloat16),
                preferred_element_type=jnp.float32) + fb1, 0.0)
    z = jnp.dot(h.astype(jnp.bfloat16), fw2.T.astype(jnp.bfloat16),
                preferred_element_type=jnp.float32) + fb2
    return jax.nn.log_softmax(z, axis=-1)


if __name__ == "__main__":
    key = jax.random.PRNGKey(0)
    k_x, k_p = jax.random.split(key)
    # fc1 (4*4*50 inputs) fixes the spatial size to 28x28, single channel.
    x = jax.random.normal(k_x, (2, 1, 28, 28), jnp.float32)
    params = init_params(k_p)
    prepped = prepare_params(params)

    out = jax.block_until_ready(jax.jit(net_forward)(x, prepped))
    ref = jax.block_until_ready(jax.jit(reference_forward)(x, params))

    assert out.shape == (2, 10)
    # log_softmax rows should sum to ~1 in prob space.
    assert bool(jnp.all(jnp.abs(jnp.sum(jnp.exp(out), axis=1) - 1.0) < 1e-4))
    # Matches the XLA reference (same bf16/f32 policy) up to accumulation-order noise.
    assert bool(jnp.max(jnp.abs(out - ref)) < 3e-2)
    print("KERNEL_OK")
</pallas_src>

<mosaic_0001>
module attributes {stable_mosaic.version = 11 : i64} {
  func.func @_conv_relu_pool_kernel(%arg0: i32, %arg1: memref<4x144x32xbf16, #tpu.memory_space<vmem>>, %arg2: memref<32x128xbf16, #tpu.memory_space<vmem>>, %arg3: memref<1x128xf32, #tpu.memory_space<vmem>>, %arg4: memref<144x128xbf16, #tpu.memory_space<vmem>>) attributes {dimension_semantics = [#tpu.dimension_semantics<parallel>], iteration_bounds = array<i64: 2>, scalar_prefetch = 0 : i64, scratch_operands = 0 : i64, tpu.core_type = #tpu.core_type<tc>, window_params = [{transform_indices = @transform_0, window_bounds = array<i64: 4, 144, 32>}, {pipeline_mode = #tpu.pipeline_mode<synchronous>, transform_indices = @transform_1, window_bounds = array<i64: 32, 128>}, {pipeline_mode = #tpu.pipeline_mode<synchronous>, transform_indices = @transform_2, window_bounds = array<i64: 1, 128>}, {transform_indices = @transform_3, window_bounds = array<i64: 144, 128>}]} {
    %c0 = arith.constant 0 : index
    %c0_0 = arith.constant 0 : index
    %c0_1 = arith.constant 0 : index
    %0 = vector.load %arg1[%c0, %c0_0, %c0_1] : memref<4x144x32xbf16, #tpu.memory_space<vmem>>, vector<4x144x32xbf16>
    %1 = vector.shape_cast %0 : vector<4x144x32xbf16> to vector<576x32xbf16>
    %c0_2 = arith.constant 0 : index
    %c0_3 = arith.constant 0 : index
    %2 = vector.load %arg2[%c0_2, %c0_3] : memref<32x128xbf16, #tpu.memory_space<vmem>>, vector<32x128xbf16>
    %cst = arith.constant dense<0.000000e+00> : vector<576x128xf32>
    %3 = tpu.matmul %1, %2, %cst {dimension_numbers = #tpu.dot_dimension_numbers<[1], [0], [0], [1], [0, 0, 1, 1], [], []>} : vector<576x32xbf16>, vector<32x128xbf16>, vector<576x128xf32> -> vector<576x128xf32>
    %4 = vector.shape_cast %3 : vector<576x128xf32> to vector<4x144x128xf32>
    %cst_4 = arith.constant dense<0xFF800000> : vector<144x128xf32>
    %5 = vector.multi_reduction <maximumf>, %4, %cst_4 [0] : vector<4x144x128xf32> to vector<144x128xf32>
    %c0_5 = arith.constant 0 : index
    %c0_6 = arith.constant 0 : index
    %6 = vector.load %arg3[%c0_5, %c0_6] : memref<1x128xf32, #tpu.memory_space<vmem>>, vector<1x128xf32>
    %7 = vector.broadcast %6 : vector<1x128xf32> to vector<144x128xf32>
    %8 = arith.addf %5, %7 : vector<144x128xf32>
    %cst_7 = arith.constant 0.000000e+00 : f32
    %9 = vector.broadcast %cst_7 : f32 to vector<144x128xf32>
    %10 = arith.maximumf %8, %9 : vector<144x128xf32>
    %11 = arith.truncf %10 : vector<144x128xf32> to vector<144x128xbf16>
    %c0_8 = arith.constant 0 : index
    %c0_9 = arith.constant 0 : index
    %12 = vector.load %arg4[%c0_8, %c0_9] : memref<144x128xbf16, #tpu.memory_space<vmem>>, vector<144x128xbf16>
    tpu.vector_store %arg4[%c0_8, %c0_9], %11 {strides = array<i32>} : memref<144x128xbf16, #tpu.memory_space<vmem>>, vector<144x128xbf16>,
    return
  }
  func.func @transform_0(%arg0: i32) -> (i32, i32, i32) {
    %c0_i32 = arith.constant 0 : i32
    %c0_i32_0 = arith.constant 0 : i32
    %c0_i32_1 = arith.constant 0 : i32
    return %c0_i32, %arg0, %c0_i32_0 : i32, i32, i32
  }
  func.func @transform_1(%arg0: i32) -> (i32, i32) {
    %c0_i32 = arith.constant 0 : i32
    %c0_i32_0 = arith.constant 0 : i32
    %c0_i32_1 = arith.constant 0 : i32
    return %c0_i32, %c0_i32_0 : i32, i32
  }
  func.func @transform_2(%arg0: i32) -> (i32, i32) {
    %c0_i32 = arith.constant 0 : i32
    %c0_i32_0 = arith.constant 0 : i32
    %c0_i32_1 = arith.constant 0 : i32
    return %c0_i32, %c0_i32_0 : i32, i32
  }
  func.func @transform_3(%arg0: i32) -> (i32, i32) {
    %c0_i32 = arith.constant 0 : i32
    %c0_i32_0 = arith.constant 0 : i32
    return %arg0, %c0_i32 : i32, i32
  }
}

module attributes {stable_mosaic.version = 11 : i64} {
  func.func @_conv_relu_pool_kernel(%arg0: i32, %arg1: memref<4x16x512xbf16, #tpu.memory_space<vmem>>, %arg2: memref<512x128xbf16, #tpu.memory_space<vmem>>, %arg3: memref<1x128xf32, #tpu.memory_space<vmem>>, %arg4: memref<16x128xbf16, #tpu.memory_space<vmem>>) attributes {dimension_semantics = [#tpu.dimension_semantics<parallel>], iteration_bounds = array<i64: 2>, scalar_prefetch = 0 : i64, scratch_operands = 0 : i64, tpu.core_type = #tpu.core_type<tc>, window_params = [{transform_indices = @transform_0, window_bounds = array<i64: 4, 16, 512>}, {pipeline_mode = #tpu.pipeline_mode<synchronous>, transform_indices = @transform_1, window_bounds = array<i64: 512, 128>}, {pipeline_mode = #tpu.pipeline_mode<synchronous>, transform_indices = @transform_2, window_bounds = array<i64: 1, 128>}, {transform_indices = @transform_3, window_bounds = array<i64: 16, 128>}]} {
    %c0 = arith.constant 0 : index
    %c0_0 = arith.constant 0 : index
    %c0_1 = arith.constant 0 : index
    %0 = vector.load %arg1[%c0, %c0_0, %c0_1] : memref<4x16x512xbf16, #tpu.memory_space<vmem>>, vector<4x16x512xbf16>
    %1 = vector.shape_cast %0 : vector<4x16x512xbf16> to vector<64x512xbf16>
    %c0_2 = arith.constant 0 : index
    %c0_3 = arith.constant 0 : index
    %2 = vector.load %arg2[%c0_2, %c0_3] : memref<512x128xbf16, #tpu.memory_space<vmem>>, vector<512x128xbf16>
    %cst = arith.constant dense<0.000000e+00> : vector<64x128xf32>
    %3 = tpu.matmul %1, %2, %cst {dimension_numbers = #tpu.dot_dimension_numbers<[1], [0], [0], [1], [0, 0, 1, 1], [], []>} : vector<64x512xbf16>, vector<512x128xbf16>, vector<64x128xf32> -> vector<64x128xf32>
    %4 = vector.shape_cast %3 : vector<64x128xf32> to vector<4x16x128xf32>
    %cst_4 = arith.constant dense<0xFF800000> : vector<16x128xf32>
    %5 = vector.multi_reduction <maximumf>, %4, %cst_4 [0] : vector<4x16x128xf32> to vector<16x128xf32>
    %c0_5 = arith.constant 0 : index
    %c0_6 = arith.constant 0 : index
    %6 = vector.load %arg3[%c0_5, %c0_6] : memref<1x128xf32, #tpu.memory_space<vmem>>, vector<1x128xf32>
    %7 = vector.broadcast %6 : vector<1x128xf32> to vector<16x128xf32>
    %8 = arith.addf %5, %7 : vector<16x128xf32>
    %cst_7 = arith.constant 0.000000e+00 : f32
    %9 = vector.broadcast %cst_7 : f32 to vector<16x128xf32>
    %10 = arith.maximumf %8, %9 : vector<16x128xf32>
    %11 = arith.truncf %10 : vector<16x128xf32> to vector<16x128xbf16>
    %c0_8 = arith.constant 0 : index
    %c0_9 = arith.constant 0 : index
    %12 = vector.load %arg4[%c0_8, %c0_9] : memref<16x128xbf16, #tpu.memory_space<vmem>>, vector<16x128xbf16>
    tpu.vector_store %arg4[%c0_8, %c0_9], %11 {strides = array<i32>} : memref<16x128xbf16, #tpu.memory_space<vmem>>, vector<16x128xbf16>,
    return
  }
  func.func @transform_0(%arg0: i32) -> (i32, i32, i32) {
    %c0_i32 = arith.constant 0 : i32
    %c0_i32_0 = arith.constant 0 : i32
    %c0_i32_1 = arith.constant 0 : i32
    return %c0_i32, %arg0, %c0_i32_0 : i32, i32, i32
  }
  func.func @transform_1(%arg0: i32) -> (i32, i32) {
    %c0_i32 = arith.constant 0 : i32
    %c0_i32_0 = arith.constant 0 : i32
    %c0_i32_1 = arith.constant 0 : i32
    return %c0_i32, %c0_i32_0 : i32, i32
  }
  func.func @transform_2(%arg0: i32) -> (i32, i32) {
    %c0_i32 = arith.constant 0 : i32
    %c0_i32_0 = arith.constant 0 : i32
    %c0_i32_1 = arith.constant 0 : i32
    return %c0_i32, %c0_i32_0 : i32, i32
  }
  func.func @transform_3(%arg0: i32) -> (i32, i32) {
    %c0_i32 = arith.constant 0 : i32
    %c0_i32_0 = arith.constant 0 : i32
    return %arg0, %c0_i32 : i32, i32
  }
}

module attributes {stable_mosaic.version = 11 : i64} {
  func.func @_fc_head_kernel(%arg0: i32, %arg1: memref<2x2048xbf16, #tpu.memory_space<vmem>>, %arg2: memref<2048x512xbf16, #tpu.memory_space<vmem>>, %arg3: memref<1x512xf32, #tpu.memory_space<vmem>>, %arg4: memref<512x10xbf16, #tpu.memory_space<vmem>>, %arg5: memref<1x10xf32, #tpu.memory_space<vmem>>, %arg6: memref<2x10xf32, #tpu.memory_space<vmem>>) attributes {dimension_semantics = [#tpu.dimension_semantics<parallel>], iteration_bounds = array<i64: 1>, scalar_prefetch = 0 : i64, scratch_operands = 0 : i64, tpu.core_type = #tpu.core_type<tc>, window_params = [{transform_indices = @transform_0, window_bounds = array<i64: 2, 2048>}, {pipeline_mode = #tpu.pipeline_mode<synchronous>, transform_indices = @transform_1, window_bounds = array<i64: 2048, 512>}, {pipeline_mode = #tpu.pipeline_mode<synchronous>, transform_indices = @transform_2, window_bounds = array<i64: 1, 512>}, {pipeline_mode = #tpu.pipeline_mode<synchronous>, transform_indices = @transform_3, window_bounds = array<i64: 512, 10>}, {pipeline_mode = #tpu.pipeline_mode<synchronous>, transform_indices = @transform_4, window_bounds = array<i64: 1, 10>}, {transform_indices = @transform_5, window_bounds = array<i64: 2, 10>}]} {
    %c0 = arith.constant 0 : index
    %c0_0 = arith.constant 0 : index
    %0 = vector.load %arg1[%c0, %c0_0] : memref<2x2048xbf16, #tpu.memory_space<vmem>>, vector<2x2048xbf16>
    %c0_1 = arith.constant 0 : index
    %c0_2 = arith.constant 0 : index
    %1 = vector.load %arg2[%c0_1, %c0_2] : memref<2048x512xbf16, #tpu.memory_space<vmem>>, vector<2048x512xbf16>
    %cst = arith.constant dense<0.000000e+00> : vector<2x512xf32>
    %2 = tpu.matmul %0, %1, %cst {dimension_numbers = #tpu.dot_dimension_numbers<[1], [0], [0], [1], [0, 0, 1, 1], [], []>} : vector<2x2048xbf16>, vector<2048x512xbf16>, vector<2x512xf32> -> vector<2x512xf32>
    %c0_3 = arith.constant 0 : index
    %c0_4 = arith.constant 0 : index
    %3 = vector.load %arg3[%c0_3, %c0_4] : memref<1x512xf32, #tpu.memory_space<vmem>>, vector<1x512xf32>
    %4 = vector.broadcast %3 : vector<1x512xf32> to vector<2x512xf32>
    %5 = arith.addf %2, %4 : vector<2x512xf32>
    %cst_5 = arith.constant 0.000000e+00 : f32
    %6 = vector.broadcast %cst_5 : f32 to vector<2x512xf32>
    %7 = arith.maximumf %5, %6 : vector<2x512xf32>
    %8 = arith.truncf %7 : vector<2x512xf32> to vector<2x512xbf16>
    %c0_6 = arith.constant 0 : index
    %c0_7 = arith.constant 0 : index
    %9 = vector.load %arg4[%c0_6, %c0_7] : memref<512x10xbf16, #tpu.memory_space<vmem>>, vector<512x10xbf16>
    %cst_8 = arith.constant dense<0.000000e+00> : vector<2x10xf32>
    %10 = tpu.matmul %8, %9, %cst_8 {dimension_numbers = #tpu.dot_dimension_numbers<[1], [0], [0], [1], [0, 0, 1, 1], [], []>} : vector<2x512xbf16>, vector<512x10xbf16>, vector<2x10xf32> -> vector<2x10xf32>
    %c0_9 = arith.constant 0 : index
    %c0_10 = arith.constant 0 : index
    %11 = vector.load %arg5[%c0_9, %c0_10] : memref<1x10xf32, #tpu.memory_space<vmem>>, vector<1x10xf32>
    %12 = vector.broadcast %11 : vector<1x10xf32> to vector<2x10xf32>
    %13 = arith.addf %10, %12 : vector<2x10xf32>
    %cst_11 = arith.constant dense<0xFF800000> : vector<2xf32>
    %14 = vector.multi_reduction <maximumf>, %13, %cst_11 [1] : vector<2x10xf32> to vector<2xf32>
    %15 = vector.shape_cast %14 : vector<2xf32> to vector<2x1xf32>
    %16 = vector.broadcast %15 : vector<2x1xf32> to vector<2x10xf32>
    %17 = arith.subf %13, %16 : vector<2x10xf32>
    %18 = math.exp %17 : vector<2x10xf32>
    %cst_12 = arith.constant dense<0.000000e+00> : vector<2xf32>
    %19 = vector.multi_reduction <add>, %18, %cst_12 [1] : vector<2x10xf32> to vector<2xf32>
    %20 = vector.shape_cast %19 : vector<2xf32> to vector<2x1xf32>
    %21 = math.log %20 : vector<2x1xf32>
    %22 = vector.broadcast %21 : vector<2x1xf32> to vector<2x10xf32>
    %23 = arith.subf %17, %22 : vector<2x10xf32>
    %c0_13 = arith.constant 0 : index
    %c0_14 = arith.constant 0 : index
    %24 = vector.load %arg6[%c0_13, %c0_14] : memref<2x10xf32, #tpu.memory_space<vmem>>, vector<2x10xf32>
    tpu.vector_store %arg6[%c0_13, %c0_14], %23 {strides = array<i32>} : memref<2x10xf32, #tpu.memory_space<vmem>>, vector<2x10xf32>,
    return
  }
  func.func @transform_0(%arg0: i32) -> (i32, i32) {
    %c0_i32 = arith.constant 0 : i32
    %c0_i32_0 = arith.constant 0 : i32
    return %arg0, %c0_i32 : i32, i32
  }
  func.func @transform_1(%arg0: i32) -> (i32, i32) {
    %c0_i32 = arith.constant 0 : i32
    %c0_i32_0 = arith.constant 0 : i32
    %c0_i32_1 = arith.constant 0 : i32
    return %c0_i32, %c0_i32_0 : i32, i32
  }
  func.func @transform_2(%arg0: i32) -> (i32, i32) {
    %c0_i32 = arith.constant 0 : i32
    %c0_i32_0 = arith.constant 0 : i32
    %c0_i32_1 = arith.constant 0 : i32
    return %c0_i32, %c0_i32_0 : i32, i32
  }
  func.func @transform_3(%arg0: i32) -> (i32, i32) {
    %c0_i32 = arith.constant 0 : i32
    %c0_i32_0 = arith.constant 0 : i32
    %c0_i32_1 = arith.constant 0 : i32
    return %c0_i32, %c0_i32_0 : i32, i32
  }
  func.func @transform_4(%arg0: i32) -> (i32, i32) {
    %c0_i32 = arith.constant 0 : i32
    %c0_i32_0 = arith.constant 0 : i32
    %c0_i32_1 = arith.constant 0 : i32
    return %c0_i32, %c0_i32_0 : i32, i32
  }
  func.func @transform_5(%arg0: i32) -> (i32, i32) {
    %c0_i32 = arith.constant 0 : i32
    %c0_i32_0 = arith.constant 0 : i32
    return %arg0, %c0_i32 : i32, i32
  }
}

</mosaic_0001>

<bundles_post_ra>
// kernel: net_forward.3
= control target key start
LH: loop header
LB: loop body
LE: loop exit
PB: predicated region body
PF: predicated region fallthrough
CT: control target
= control target key end

     0   :  { %s1626_s12 = smov 0   ;;  %s1628_s13 = smov 0   ;;  %s1868_s0 = inlined_call_operand.vmem [shape: bf16[4,288,32], index: 0, kind: input, shape index: {}]   ;;  %s1869_s1 = inlined_call_operand.vmem [shape: bf16[32,128], index: 1, kind: input, shape index: {}]   ;;  %s1870_s2 = inlined_call_operand.vmem [shape: f32[1,128], index: 2, kind: input, shape index: {}]   ;;  %s1871_s3 = inlined_call_operand.vmem [shape: bf16[288,128], index: 3, kind: output, shape index: {}]  }
   0x1   :  { %s1630_s14 = smov 0  }
   0x2 LB: > { %s1260_s15 = sadd.s32 4294967295, %s1604_s14   ;;  %s1643_s16 = sadd.s32 1, %s1604_s14   ;;  %s1604_s14 = sphi %s1630_s14, %s1874_s14   ;;  %s1600_s13 = sphi %s1628_s13, %s1873_s13   ;;  %s1596_s12 = sphi %s1626_s12, %s1872_s12  }
   0x3   : > { %s17_s17 = ssub.s32 %s1604_s14, %s1643_s16  ;;  %s20_s18 = sadd.s32 1, %s1600_s13 }
   0x4   : > { %p18_p0 = scmp.eq.s32.totalorder %s17_s17, 0  ;;  %p27_p1 = scmp.ne.s32.totalorder %s1600_s13, %s1596_s12 }
   0x5   : > { %p28_p2 = scmp.eq.s32.totalorder %s1604_s14, 0  ;;  %p1263_p4 = scmp.ge.s32.totalorder %s1604_s14, 2 }
   0x6   : > { %s1652_s19 = scalar_select %p18_p0, %s1600_s13, %s20_s18  }
   0x7   : > { %p29_p3 = por %p28_p2, %p27_p1  ;;  %127 = sbr.rel (%p1263_p4) target bundleno = 53 (0x35), region = 24 }
   0xc   : > { %130 = sbr.rel (!%p29_p3) target bundleno = 53 (0x35), region = 28  ;;  %s132_s20 = sand.u32 (%p29_p3), 1, %s1600_s13  }
   0xd   : > { %s1457_s21 = smul.u32 (%p29_p3), 72, %s1604_s14 }
   0xe   : > { %s1555_s22 = smul.u32 (%p29_p3), 288, %s132_s20 }
   0xf   : > { %s1660_s25 = scalar_lea.vmem (%p29_p3), %s1868_s0, %s1457_s21 }
  0x10   : > { %v154_v0 = vld [vmem:[%s1660_s25] sm:$0xff] (%p29_p3)   ;;  %v158_v1 = vld [vmem:[%s1660_s25 + $0x8] sm:$0xff] (%p29_p3)   ;;  %v162_v2 = vld [vmem:[%s1660_s25 + $0x10] sm:$0xff] (%p29_p3)   ;;  %s1665_s26 = scalar_lea.vmem (%p29_p3), [#allocation2], %s1555_s22 }
  0x11   : > { %155 = vst [vmem:[%s1665_s26] sm:$0xff] %v154_v0   ;;  %v166_v3 = vld [vmem:[%s1660_s25 + $0x18] sm:$0xff]   ;;  %v170_v4 = vld [vmem:[%s1660_s25 + $0x20] sm:$0xff]   ;;  %v174_v5 = vld [vmem:[%s1660_s25 + $0x28] sm:$0xff]  }
  0x12   : > { %159 = vst [vmem:[%s1665_s26 + $0x8] sm:$0xff] %v158_v1   ;;  %v178_v6 = vld [vmem:[%s1660_s25 + $0x30] sm:$0xff]   ;;  %v182_v7 = vld [vmem:[%s1660_s25 + $0x38] sm:$0xff]   ;;  %v186_v8 = vld [vmem:[%s1660_s25 + $0x40] sm:$0xff]  }
  0x13   : > { %163 = vst [vmem:[%s1665_s26 + $0x10] sm:$0xff] %v162_v2   ;;  %v190_v9 = vld [vmem:[%s1660_s25 + $0x90] sm:$0xff]   ;;  %v194_v10 = vld [vmem:[%s1660_s25 + $0x98] sm:$0xff]   ;;  %v198_v11 = vld [vmem:[%s1660_s25 + $0xa0] sm:$0xff]  }
  0x14   : > { %167 = vst [vmem:[%s1665_s26 + $0x18] sm:$0xff] %v166_v3   ;;  %v202_v12 = vld [vmem:[%s1660_s25 + $0xa8] sm:$0xff]   ;;  %v206_v13 = vld [vmem:[%s1660_s25 + $0xb0] sm:$0xff]   ;;  %v210_v14 = vld [vmem:[%s1660_s25 + $0xb8] sm:$0xff]  }
  0x15   : > { %171 = vst [vmem:[%s1665_s26 + $0x20] sm:$0xff] %v170_v4   ;;  %v214_v15 = vld [vmem:[%s1660_s25 + $0xc0] sm:$0xff]   ;;  %v218_v16 = vld [vmem:[%s1660_s25 + $0xc8] sm:$0xff]   ;;  %v222_v17 = vld [vmem:[%s1660_s25 + $0xd0] sm:$0xff]  }
  0x16   : > { %175 = vst [vmem:[%s1665_s26 + $0x28] sm:$0xff] %v174_v5   ;;  %v226_v18 = vld [vmem:[%s1660_s25 + $0x120] sm:$0xff]   ;;  %v230_v19 = vld [vmem:[%s1660_s25 + $0x128] sm:$0xff]   ;;  %v234_v20 = vld [vmem:[%s1660_s25 + $0x130] sm:$0xff]  }
  0x17   : > { %179 = vst [vmem:[%s1665_s26 + $0x30] sm:$0xff] %v178_v6   ;;  %v238_v21 = vld [vmem:[%s1660_s25 + $0x138] sm:$0xff]   ;;  %v242_v22 = vld [vmem:[%s1660_s25 + $0x140] sm:$0xff]   ;;  %v246_v23 = vld [vmem:[%s1660_s25 + $0x148] sm:$0xff]  }
  0x18   : > { %183 = vst [vmem:[%s1665_s26 + $0x38] sm:$0xff] %v182_v7   ;;  %v250_v24 = vld [vmem:[%s1660_s25 + $0x150] sm:$0xff]   ;;  %v254_v25 = vld [vmem:[%s1660_s25 + $0x158] sm:$0xff]   ;;  %v258_v26 = vld [vmem:[%s1660_s25 + $0x160] sm:$0xff]  }
  0x19   : > { %187 = vst [vmem:[%s1665_s26 + $0x40] sm:$0xff] %v186_v8   ;;  %v262_v27 = vld [vmem:[%s1660_s25 + $0x1b0] sm:$0xff]   ;;  %v266_v28 = vld [vmem:[%s1660_s25 + $0x1b8] sm:$0xff]   ;;  %v270_v29 = vld [vmem:[%s1660_s25 + $0x1c0] sm:$0xff]  }
  0x1a   : > { %191 = vst [vmem:[%s1665_s26 + $0x48] sm:$0xff] %v190_v9   ;;  %v274_v30 = vld [vmem:[%s1660_s25 + $0x1c8] sm:$0xff]   ;;  %v278_v31 = vld [vmem:[%s1660_s25 + $0x1d0] sm:$0xff]   ;;  %v282_v32 = vld [vmem:[%s1660_s25 + $0x1d8] sm:$0xff]  }
  0x1b   : > { %195 = vst [vmem:[%s1665_s26 + $0x50] sm:$0xff] %v194_v10   ;;  %v286_v33 = vld [vmem:[%s1660_s25 + $0x1e0] sm:$0xff]   ;;  %v290_v34 = vld [vmem:[%s1660_s25 + $0x1e8] sm:$0xff]   ;;  %v294_v35 = vld [vmem:[%s1660_s25 + $0x1f0] sm:$0xff]  }
  0x1c   : > { %199 = vst [vmem:[%s1665_s26 + $0x58] sm:$0xff] %v198_v11  }
  0x1d   : > { %203 = vst [vmem:[%s1665_s26 + $0x60] sm:$0xff] %v202_v12  }
  0x1e   : > { %207 = vst [vmem:[%s1665_s26 + $0x68] sm:$0xff] %v206_v13  }
  0x1f   : > { %211 = vst [vmem:[%s1665_s26 + $0x70] sm:$0xff] %v210_v14  }
  0x20   : > { %215 = vst [vmem:[%s1665_s26 + $0x78] sm:$0xff] %v214_v15  }
  0x21   : > { %219 = vst [vmem:[%s1665_s26 + $0x80] sm:$0xff] %v218_v16  }
  0x22   : > { %223 = vst [vmem:[%s1665_s26 + $0x88] sm:$0xff] %v222_v17  }
  0x23   : > { %227 = vst [vmem:[%s1665_s26 + $0x90] sm:$0xff] %v226_v18  }
  0x24   : > { %231 = vst [vmem:[%s1665_s26 + $0x98] sm:$0xff] %v230_v19  }
  0x25   : > { %235 = vst [vmem:[%s1665_s26 + $0xa0] sm:$0xff] %v234_v20  }
  0x26   : > { %239 = vst [vmem:[%s1665_s26 + $0xa8] sm:$0xff] %v238_v21  }
  0x27   : > { %243 = vst [vmem:[%s1665_s26 + $0xb0] sm:$0xff] %v242_v22  }
  0x28   : > { %247 = vst [vmem:[%s1665_s26 + $0xb8] sm:$0xff] %v246_v23  }
  0x29   : > { %251 = vst [vmem:[%s1665_s26 + $0xc0] sm:$0xff] %v250_v24  }
  0x2a   : > { %255 = vst [vmem:[%s1665_s26 + $0xc8] sm:$0xff] %v254_v25  }
  0x2b   : > { %259 = vst [vmem:[%s1665_s26 + $0xd0] sm:$0xff] %v258_v26  }
  0x2c   : > { %263 = vst [vmem:[%s1665_s26 + $0xd8] sm:$0xff] %v262_v27  }
  0x2d   : > { %267 = vst [vmem:[%s1665_s26 + $0xe0] sm:$0xff] %v266_v28  }
  0x2e   : > { %271 = vst [vmem:[%s1665_s26 + $0xe8] sm:$0xff] %v270_v29  }
  0x2f   : > { %275 = vst [vmem:[%s1665_s26 + $0xf0] sm:$0xff] %v274_v30  }
  0x30   : > { %279 = vst [vmem:[%s1665_s26 + $0xf8] sm:$0xff] %v278_v31  }
  0x31   : > { %283 = vst [vmem:[%s1665_s26 + $0x100] sm:$0xff] %v282_v32  }
  0x32   : > { %287 = vst [vmem:[%s1665_s26 + $0x108] sm:$0xff] %v286_v33  }
  0x33   : > { %291 = vst [vmem:[%s1665_s26 + $0x110] sm:$0xff] %v290_v34  }
  0x34   : > { %295 = vst [vmem:[%s1665_s26 + $0x118] sm:$0xff] %v294_v35  }
  0x35 PF: > { %p1265_p5 = scmp.ge.s32.totalorder %s1604_s14, 1  ;;  %p464_p6 = scmp.lt.s32.totalorder %s1604_s14, 3 }
  0x37   : > { %p465_p7 = pnand %p1265_p5, %p464_p6 }
  0x38   : > { %s471_s29 = sand.u32 (!%p465_p7), 1, %s1596_s12   ;;  %s495_s7 = smul.u32 (!%p465_p7), 18, %s1260_s15 }
  0x39   : > { %468 = sbr.rel (%p465_p7) target bundleno = 350 (0x15e), region = 69 }
  0x3a   : > { %s1556_s30 = smul.u32 (!%p465_p7), 288, %s471_s29  ;;  %p496_p8 = scmp.lt.s32.totalorder (!%p465_p7), %s495_s7, 35 }
  0x3c   : > { %s1745_s6 = scalar_lea.vmem (!%p465_p7), [#allocation2], %s1556_s30 }
  0x3e   : > { %v1495_v36 = vld [vmem:[%s1869_s1 + $0x8] sm:$0xff]  ;;  %v1494_v37 = vld [vmem:[%s1869_s1] sm:$0xff]  ;;  %vm770_vm0 = vcmask 261120   ;;  %v1476_v40 = vld [vmem:[%s1745_s6 + $0x90] sm:$0xff]  ;;  %s1876_s7 = smov (!%p496_p8, %s495_s7), 35 }
  0x3f   : > { %885 = vmatpush.bf16.msra.mxu0 %v1495_v36  ;;  %1549 = vmatpush.bf16.msra.mxu1 %v1495_v36  ;;  %v1458_v38 = vld [vmem:[%s1745_s6] sm:$0xff]  ;;  %v1467_v39 = vld [vmem:[%s1745_s6 + $0x48] sm:$0xff]  ;;  %v1485_v41 = vld [vmem:[%s1745_s6 + $0xd8] sm:$0xff]  ;;  %s1266_s10 = sshll.u32 %s1876_s7, 2 }
  0x40   : > { %1550 = vmatpush.bf16.msra.mxu2 %v1495_v36  ;;  %1551 = vmatpush.bf16.msra.mxu3 %v1495_v36  ;;  %v1459_v42 = vld [vmem:[%s1745_s6 + $0x8] sm:$0xff]  ;;  %v1468_v43 = vld [vmem:[%s1745_s6 + $0x50] sm:$0xff]  ;;  %v1477_v44 = vld [vmem:[%s1745_s6 + $0x98] sm:$0xff]  ;;  %s1831_s14 = scalar_lea.vmem %s1871_s3, %s1266_s10 }
  0x41   : > { %v1486_v45 = vld [vmem:[%s1745_s6 + $0xe0] sm:$0xff]  ;;  %v1460_v46 = vld [vmem:[%s1745_s6 + $0x10] sm:$0xff]  ;;  %v1469_v47 = vld [vmem:[%s1745_s6 + $0x58] sm:$0xff] }
  0x42   : > { %v1478_v48 = vld [vmem:[%s1745_s6 + $0xa0] sm:$0xff]  ;;  %v1487_v49 = vld [vmem:[%s1745_s6 + $0xe8] sm:$0xff]  ;;  %v1461_v50 = vld [vmem:[%s1745_s6 + $0x18] sm:$0xff] }
  0x43   : > { %886 = vmatpush.bf16.msra.mxu0 %v1494_v37  ;;  %1552 = vmatpush.bf16.msra.mxu1 %v1494_v37  ;;  %v1470_v51 = vld [vmem:[%s1745_s6 + $0x60] sm:$0xff]  ;;  %v1479_v52 = vld [vmem:[%s1745_s6 + $0xa8] sm:$0xff]  ;;  %v1488_v53 = vld [vmem:[%s1745_s6 + $0xf0] sm:$0xff] }
  0x44   : > { %1553 = vmatpush.bf16.msra.mxu2 %v1494_v37  ;;  %1554 = vmatpush.bf16.msra.mxu3 %v1494_v37  ;;  %v1462_v54 = vld [vmem:[%s1745_s6 + $0x20] sm:$0xff]  ;;  %v1471_v55 = vld [vmem:[%s1745_s6 + $0x68] sm:$0xff]  ;;  %v1480_v56 = vld [vmem:[%s1745_s6 + $0xb0] sm:$0xff] }
  0x45   : > { %v1489_v57 = vld [vmem:[%s1745_s6 + $0xf8] sm:$0xff]  ;;  %v1463_v58 = vld [vmem:[%s1745_s6 + $0x28] sm:$0xff]  ;;  %v1472_v59 = vld [vmem:[%s1745_s6 + $0x70] sm:$0xff] }
  0x46   : > { %1419 = vmatmul.msk.bf16.vlgmr.msra.gmra.mxu0 %vm770_vm0, %v1458_v38  ;;  %1428 = vmatmul.msk.bf16.vlgmr.msra.gmra.mxu1 %vm770_vm0, %v1467_v39  ;;  %v1481_v60 = vld [vmem:[%s1745_s6 + $0xb8] sm:$0xff]  ;;  %v1490_v61 = vld [vmem:[%s1745_s6 + $0x100] sm:$0xff]  ;;  %v1464_v62 = vld [vmem:[%s1745_s6 + $0x30] sm:$0xff] }
  0x47   : > { %1437 = vmatmul.msk.bf16.vlgmr.msra.gmra.mxu2 %vm770_vm0, %v1476_v40  ;;  %1446 = vmatmul.msk.bf16.vlgmr.msra.gmra.mxu3 %vm770_vm0, %v1485_v41  ;;  %v1473_v63 = vld [vmem:[%s1745_s6 + $0x78] sm:$0xff]  ;;  %v1482_v0 = vld [vmem:[%s1745_s6 + $0xc0] sm:$0xff]  ;;  %v1491_v1 = vld [vmem:[%s1745_s6 + $0x108] sm:$0xff] }
  0x48   : > { %v1465_v2 = vld [vmem:[%s1745_s6 + $0x38] sm:$0xff]  ;;  %v1474_v3 = vld [vmem:[%s1745_s6 + $0x80] sm:$0xff]  ;;  %v1483_v4 = vld [vmem:[%s1745_s6 + $0xc8] sm:$0xff] }
  0x49   : > { %v1492_v5 = vld [vmem:[%s1745_s6 + $0x110] sm:$0xff]  ;;  %v1466_v6 = vld [vmem:[%s1745_s6 + $0x40] sm:$0xff]  ;;  %v1475_v7 = vld [vmem:[%s1745_s6 + $0x88] sm:$0xff] }
  0x4a   : > { %v1484_v10 = vld [vmem:[%s1745_s6 + $0xd0] sm:$0xff]  ;;  %v1493_v11 = vld [vmem:[%s1745_s6 + $0x118] sm:$0xff]  ;;  %v1824_v19 = vld [vmem:[%s1870_s2] ss:$0 sm:$0xff] }
  0x56   : > { %1420 = vmatmul.msk.bf16.gmra.mxu0 %vm770_vm0, %v1459_v42  ;;  %1429 = vmatmul.msk.bf16.gmra.mxu1 %vm770_vm0, %v1468_v43 }
  0x57   : > { %1438 = vmatmul.msk.bf16.gmra.mxu2 %vm770_vm0, %v1477_v44  ;;  %1447 = vmatmul.msk.bf16.gmra.mxu3 %vm770_vm0, %v1486_v45 }
  0x66   : > { %1421 = vmatmul.msk.bf16.gmra.mxu0 %vm770_vm0, %v1460_v46  ;;  %1430 = vmatmul.msk.bf16.gmra.mxu1 %vm770_vm0, %v1469_v47 }
  0x67   : > { %1439 = vmatmul.msk.bf16.gmra.mxu2 %vm770_vm0, %v1478_v48  ;;  %1448 = vmatmul.msk.bf16.gmra.mxu3 %vm770_vm0, %v1487_v49 }
  0x76   : > { %1422 = vmatmul.msk.bf16.gmra.mxu0 %vm770_vm0, %v1461_v50  ;;  %1431 = vmatmul.msk.bf16.gmra.mxu1 %vm770_vm0, %v1470_v51 }
  0x77   : > { %1440 = vmatmul.msk.bf16.gmra.mxu2 %vm770_vm0, %v1479_v52  ;;  %1449 = vmatmul.msk.bf16.gmra.mxu3 %vm770_vm0, %v1488_v53 }
  0x86   : > { %1423 = vmatmul.msk.bf16.gmra.mxu0 %vm770_vm0, %v1462_v54  ;;  %1432 = vmatmul.msk.bf16.gmra.mxu1 %vm770_vm0, %v1471_v55 }
  0x87   : > { %1441 = vmatmul.msk.bf16.gmra.mxu2 %vm770_vm0, %v1480_v56  ;;  %1450 = vmatmul.msk.bf16.gmra.mxu3 %vm770_vm0, %v1489_v57 }
  0x96   : > { %1424 = vmatmul.msk.bf16.gmra.mxu0 %vm770_vm0, %v1463_v58  ;;  %1433 = vmatmul.msk.bf16.gmra.mxu1 %vm770_vm0, %v1472_v59 }
  0x97   : > { %1442 = vmatmul.msk.bf16.gmra.mxu2 %vm770_vm0, %v1481_v60  ;;  %1451 = vmatmul.msk.bf16.gmra.mxu3 %vm770_vm0, %v1490_v61 }
  0xa6   : > { %1425 = vmatmul.msk.bf16.gmra.mxu0 %vm770_vm0, %v1464_v62  ;;  %1434 = vmatmul.msk.bf16.gmra.mxu1 %vm770_vm0, %v1473_v63 }
  0xa7   : > { %1443 = vmatmul.msk.bf16.gmra.mxu2 %vm770_vm0, %v1482_v0  ;;  %1452 = vmatmul.msk.bf16.gmra.mxu3 %vm770_vm0, %v1491_v1 }
  0xb6   : > { %1426 = vmatmul.msk.bf16.gmra.mxu0 %vm770_vm0, %v1465_v2  ;;  %1435 = vmatmul.msk.bf16.gmra.mxu1 %vm770_vm0, %v1474_v3 }
  0xb7   : > { %1444 = vmatmul.msk.bf16.gmra.mxu2 %vm770_vm0, %v1483_v4  ;;  %1453 = vmatmul.msk.bf16.gmra.mxu3 %vm770_vm0, %v1492_v5 }
  0xc3   : > { %v888_v8 = vpop.f32.mrf.mxu0  ;;  %v933_v9 = vpop.f32.mrf.mxu1 }
  0xc4   : > { %v1068_v12 = vmax.f32 %v888_v8, %v933_v9 }
  0xc6   : > { %1427 = vmatmul.msk.bf16.gmra.mxu0 %vm770_vm0, %v1466_v6  ;;  %1436 = vmatmul.msk.bf16.gmra.mxu1 %vm770_vm0, %v1475_v7 }
  0xc7   : > { %1445 = vmatmul.msk.bf16.gmra.mxu2 %vm770_vm0, %v1484_v10  ;;  %1454 = vmatmul.msk.bf16.gmra.mxu3 %vm770_vm0, %v1493_v11 }
  0xca   : > { %v978_v13 = vpop.f32.mrf.mxu2  ;;  %v1023_v14 = vpop.f32.mrf.mxu3 }
  0xcb   : > { %v890_v15 = vpop.f32.mrf.mxu0  ;;  %v935_v16 = vpop.f32.mrf.mxu1  ;;  %v1069_v17 = vmax.f32 %v1068_v12, %v978_v13 }
  0xcc   : > { %v1071_v20 = vmax.f32 %v890_v15, %v935_v16 }
  0xcd   : > { %v1070_v18 = vmax.f32 %v1069_v17, %v1023_v14 }
  0xcf   : > { %v1126_v26 = vadd.f32 %v1824_v19, %v1070_v18 }
  0xd1   : > { %v1144_v29 = vmax.f32 %v1126_v26, 0.0 }
  0xd2   : > { %v980_v21 = vpop.f32.mrf.mxu2  ;;  %v1025_v22 = vpop.f32.mrf.mxu3 }
  0xd3   : > { %v1072_v23 = vmax.f32 %v1071_v20, %v980_v21  ;;  %v893_v24 = vpop.f32.mrf.mxu0  ;;  %v938_v25 = vpop.f32.mrf.mxu1 }
  0xd4   : > { %v1074_v31 = vmax.f32 %v893_v24, %v938_v25 }
  0xd5   : > { %v1073_v27 = vmax.f32 %v1072_v23, %v1025_v22 }
  0xd7   : > { %v1127_v28 = vadd.f32 %v1824_v19, %v1073_v27 }
  0xd9   : > { %v1145_v30 = vmax.f32 %v1127_v28, 0.0 }
  0xda   : > { %v983_v32 = vpop.f32.mrf.mxu2  ;;  %v1028_v33 = vpop.f32.mrf.mxu3 }
  0xdb   : > { %v1499_v34 = vpack.c.bf16 %v1145_v30, %v1144_v29  ;;  %v895_v35 = vpop.f32.mrf.mxu0  ;;  %v940_v36 = vpop.f32.mrf.mxu1  ;;  %v1075_v37 = vmax.f32 %v1074_v31, %v983_v32 }
  0xdc   : > { %v1077_v39 = vmax.f32 %v895_v35, %v940_v36 }
  0xdd   : > { %1500 = vst [vmem:[%s1831_s14] sm:$0xff] %v1499_v34   ;;  %v1076_v38 = vmax.f32 %v1075_v37, %v1028_v33 }
  0xdf   : > { %v1128_v45 = vadd.f32 %v1824_v19, %v1076_v38 }
  0xe1   : > { %v1146_v48 = vmax.f32 %v1128_v45, 0.0 }
  0xe2   : > { %v985_v40 = vpop.f32.mrf.mxu2  ;;  %v1030_v41 = vpop.f32.mrf.mxu3 }
  0xe3   : > { %v1078_v42 = vmax.f32 %v1077_v39, %v985_v40  ;;  %v898_v43 = vpop.f32.mrf.mxu0  ;;  %v943_v44 = vpop.f32.mrf.mxu1 }
  0xe4   : > { %v1080_v50 = vmax.f32 %v898_v43, %v943_v44 }
  0xe5   : > { %v1079_v46 = vmax.f32 %v1078_v42, %v1030_v41 }
  0xe7   : > { %v1129_v47 = vadd.f32 %v1824_v19, %v1079_v46 }
  0xe9   : > { %v1147_v49 = vmax.f32 %v1129_v47, 0.0 }
  0xea   : > { %v988_v51 = vpop.f32.mrf.mxu2  ;;  %v1033_v52 = vpop.f32.mrf.mxu3 }
  0xeb   : > { %v1504_v53 = vpack.c.bf16 %v1147_v49, %v1146_v48  ;;  %v900_v54 = vpop.f32.mrf.mxu0  ;;  %v945_v55 = vpop.f32.mrf.mxu1  ;;  %v1081_v56 = vmax.f32 %v1080_v50, %v988_v51 }
  0xec   : > { %v1083_v58 = vmax.f32 %v900_v54, %v945_v55 }
  0xed   : > { %1541 = vst [vmem:[%s1831_s14 + $0x8] sm:$0xff] %v1504_v53   ;;  %v1082_v57 = vmax.f32 %v1081_v56, %v1033_v52 }
  0xef   : > { %v1130_v0 = vadd.f32 %v1824_v19, %v1082_v57 }
  0xf1   : > { %v1148_v3 = vmax.f32 %v1130_v0, 0.0 }
  0xf2   : > { %v990_v59 = vpop.f32.mrf.mxu2  ;;  %v1035_v60 = vpop.f32.mrf.mxu3 }
  0xf3   : > { %v1084_v61 = vmax.f32 %v1083_v58, %v990_v59  ;;  %v903_v62 = vpop.f32.mrf.mxu0  ;;  %v948_v63 = vpop.f32.mrf.mxu1 }
  0xf4   : > { %v1086_v5 = vmax.f32 %v903_v62, %v948_v63 }
  0xf5   : > { %v1085_v1 = vmax.f32 %v1084_v61, %v1035_v60 }
  0xf7   : > { %v1131_v2 = vadd.f32 %v1824_v19, %v1085_v1 }
  0xf9   : > { %v1149_v4 = vmax.f32 %v1131_v2, 0.0 }
  0xfa   : > { %v993_v6 = vpop.f32.mrf.mxu2  ;;  %v1038_v7 = vpop.f32.mrf.mxu3 }
  0xfb   : > { %v1509_v8 = vpack.c.bf16 %v1149_v4, %v1148_v3  ;;  %v905_v9 = vpop.f32.mrf.mxu0  ;;  %v950_v10 = vpop.f32.mrf.mxu1  ;;  %v1087_v11 = vmax.f32 %v1086_v5, %v993_v6 }
  0xfc   : > { %v1089_v13 = vmax.f32 %v905_v9, %v950_v10 }
  0xfd   : > { %1542 = vst [vmem:[%s1831_s14 + $0x10] sm:$0xff] %v1509_v8   ;;  %v1088_v12 = vmax.f32 %v1087_v11, %v1038_v7 }
  0xff   : > { %v1132_v20 = vadd.f32 %v1824_v19, %v1088_v12 }
 0x101   : > { %v1150_v23 = vmax.f32 %v1132_v20, 0.0 }
 0x102   : > { %v995_v14 = vpop.f32.mrf.mxu2  ;;  %v1040_v15 = vpop.f32.mrf.mxu3 }
 0x103   : > { %v1090_v16 = vmax.f32 %v1089_v13, %v995_v14  ;;  %v908_v17 = vpop.f32.mrf.mxu0  ;;  %v953_v18 = vpop.f32.mrf.mxu1 }
 0x104   : > { %v1092_v25 = vmax.f32 %v908_v17, %v953_v18 }
 0x105   : > { %v1091_v21 = vmax.f32 %v1090_v16, %v1040_v15 }
 0x107   : > { %v1133_v22 = vadd.f32 %v1824_v19, %v1091_v21 }
 0x109   : > { %v1151_v24 = vmax.f32 %v1133_v22, 0.0 }
 0x10a   : > { %v998_v26 = vpop.f32.mrf.mxu2  ;;  %v1043_v27 = vpop.f32.mrf.mxu3 }
 0x10b   : > { %v1514_v28 = vpack.c.bf16 %v1151_v24, %v1150_v23  ;;  %v910_v29 = vpop.f32.mrf.mxu0  ;;  %v955_v30 = vpop.f32.mrf.mxu1  ;;  %v1093_v31 = vmax.f32 %v1092_v25, %v998_v26 }
 0x10c   : > { %v1095_v33 = vmax.f32 %v910_v29, %v955_v30 }
 0x10d   : > { %1543 = vst [vmem:[%s1831_s14 + $0x18] sm:$0xff] %v1514_v28   ;;  %v1094_v32 = vmax.f32 %v1093_v31, %v1043_v27 }
 0x10f   : > { %v1134_v39 = vadd.f32 %v1824_v19, %v1094_v32 }
 0x111   : > { %v1152_v42 = vmax.f32 %v1134_v39, 0.0 }
 0x112   : > { %v1000_v34 = vpop.f32.mrf.mxu2  ;;  %v1045_v35 = vpop.f32.mrf.mxu3 }
 0x113   : > { %v1096_v36 = vmax.f32 %v1095_v33, %v1000_v34  ;;  %v913_v37 = vpop.f32.mrf.mxu0  ;;  %v958_v38 = vpop.f32.mrf.mxu1 }
 0x114   : > { %v1098_v44 = vmax.f32 %v913_v37, %v958_v38 }
 0x115   : > { %v1097_v40 = vmax.f32 %v1096_v36, %v1045_v35 }
 0x117   : > { %v1135_v41 = vadd.f32 %v1824_v19, %v1097_v40 }
 0x119   : > { %v1153_v43 = vmax.f32 %v1135_v41, 0.0 }
 0x11a   : > { %v1003_v45 = vpop.f32.mrf.mxu2  ;;  %v1048_v46 = vpop.f32.mrf.mxu3 }
 0x11b   : > { %v1519_v47 = vpack.c.bf16 %v1153_v43, %v1152_v42  ;;  %v915_v48 = vpop.f32.mrf.mxu0  ;;  %v960_v49 = vpop.f32.mrf.mxu1  ;;  %v1099_v50 = vmax.f32 %v1098_v44, %v1003_v45 }
 0x11c   : > { %v1101_v52 = vmax.f32 %v915_v48, %v960_v49 }
 0x11d   : > { %1544 = vst [vmem:[%s1831_s14 + $0x20] sm:$0xff] %v1519_v47   ;;  %v1100_v51 = vmax.f32 %v1099_v50, %v1048_v46 }
 0x11f   : > { %v1136_v58 = vadd.f32 %v1824_v19, %v1100_v51 }
 0x121   : > { %v1154_v61 = vmax.f32 %v1136_v58, 0.0 }
 0x122   : > { %v1005_v53 = vpop.f32.mrf.mxu2  ;;  %v1050_v54 = vpop.f32.mrf.mxu3 }
 0x123   : > { %v1102_v55 = vmax.f32 %v1101_v52, %v1005_v53  ;;  %v918_v56 = vpop.f32.mrf.mxu0  ;;  %v963_v57 = vpop.f32.mrf.mxu1 }
 0x124   : > { %v1104_v63 = vmax.f32 %v918_v56, %v963_v57 }
 0x125   : > { %v1103_v59 = vmax.f32 %v1102_v55, %v1050_v54 }
 0x127   : > { %v1137_v60 = vadd.f32 %v1824_v19, %v1103_v59 }
 0x129   : > { %v1155_v62 = vmax.f32 %v1137_v60, 0.0 }
 0x12a   : > { %v1008_v0 = vpop.f32.mrf.mxu2  ;;  %v1053_v1 = vpop.f32.mrf.mxu3 }
 0x12b   : > { %v1524_v2 = vpack.c.bf16 %v1155_v62, %v1154_v61  ;;  %v920_v3 = vpop.f32.mrf.mxu0  ;;  %v965_v4 = vpop.f32.mrf.mxu1  ;;  %v1105_v5 = vmax.f32 %v1104_v63, %v1008_v0 }
 0x12c   : > { %v1107_v7 = vmax.f32 %v920_v3, %v965_v4 }
 0x12d   : > { %1545 = vst [vmem:[%s1831_s14 + $0x28] sm:$0xff] %v1524_v2   ;;  %v1106_v6 = vmax.f32 %v1105_v5, %v1053_v1 }
 0x12f   : > { %v1138_v13 = vadd.f32 %v1824_v19, %v1106_v6 }
 0x131   : > { %v1156_v16 = vmax.f32 %v1138_v13, 0.0 }
 0x132   : > { %v1010_v8 = vpop.f32.mrf.mxu2  ;;  %v1055_v9 = vpop.f32.mrf.mxu3 }
 0x133   : > { %v1108_v10 = vmax.f32 %v1107_v7, %v1010_v8  ;;  %v923_v11 = vpop.f32.mrf.mxu0  ;;  %v968_v12 = vpop.f32.mrf.mxu1 }
 0x134   : > { %v1110_v18 = vmax.f32 %v923_v11, %v968_v12 }
 0x135   : > { %v1109_v14 = vmax.f32 %v1108_v10, %v1055_v9 }
 0x137   : > { %v1139_v15 = vadd.f32 %v1824_v19, %v1109_v14 }
 0x139   : > { %v1157_v17 = vmax.f32 %v1139_v15, 0.0 }
 0x13a   : > { %v1013_v20 = vpop.f32.mrf.mxu2  ;;  %v1058_v21 = vpop.f32.mrf.mxu3 }
 0x13b   : > { %v1529_v22 = vpack.c.bf16 %v1157_v17, %v1156_v16  ;;  %v925_v23 = vpop.f32.mrf.mxu0  ;;  %v970_v24 = vpop.f32.mrf.mxu1  ;;  %v1111_v25 = vmax.f32 %v1110_v18, %v1013_v20 }
 0x13c   : > { %v1113_v27 = vmax.f32 %v925_v23, %v970_v24 }
 0x13d   : > { %1546 = vst [vmem:[%s1831_s14 + $0x30] sm:$0xff] %v1529_v22   ;;  %v1112_v26 = vmax.f32 %v1111_v25, %v1058_v21 }
 0x13f   : > { %v1140_v33 = vadd.f32 %v1824_v19, %v1112_v26 }
 0x141   : > { %v1158_v36 = vmax.f32 %v1140_v33, 0.0 }
 0x142   : > { %v1015_v28 = vpop.f32.mrf.mxu2  ;;  %v1060_v29 = vpop.f32.mrf.mxu3 }
 0x143   : > { %v1114_v30 = vmax.f32 %v1113_v27, %v1015_v28  ;;  %v928_v31 = vpop.f32.mrf.mxu0  ;;  %v973_v32 = vpop.f32.mrf.mxu1 }
 0x144   : > { %v1116_v38 = vmax.f32 %v928_v31, %v973_v32 }
 0x145   : > { %v1115_v34 = vmax.f32 %v1114_v30, %v1060_v29 }
 0x147   : > { %v1141_v35 = vadd.f32 %v1824_v19, %v1115_v34 }
 0x149   : > { %v1159_v37 = vmax.f32 %v1141_v35, 0.0 }
 0x14a   : > { %v1018_v39 = vpop.f32.mrf.mxu2  ;;  %v1063_v40 = vpop.f32.mrf.mxu3 }
 0x14b   : > { %v1534_v41 = vpack.c.bf16 %v1159_v37, %v1158_v36  ;;  %v1117_v42 = vmax.f32 %v1116_v38, %v1018_v39  ;;  %v930_v43 = vpop.f32.mrf.mxu0  ;;  %v975_v44 = vpop.f32.mrf.mxu1 }
 0x14c   : > { %v1119_v46 = vmax.f32 %v930_v43, %v975_v44 }
 0x14d   : > { %1547 = vst [vmem:[%s1831_s14 + $0x38] sm:$0xff] %v1534_v41   ;;  %v1118_v45 = vmax.f32 %v1117_v42, %v1063_v40 }
 0x14f   : > { %v1142_v50 = vadd.f32 %v1824_v19, %v1118_v45 }
 0x151   : > { %v1160_v53 = vmax.f32 %v1142_v50, 0.0 }
 0x152   : > { %v1020_v47 = vpop.f32.mrf.mxu2  ;;  %v1065_v49 = vpop.f32.mrf.mxu3 }
 0x153   : > { %v1120_v48 = vmax.f32 %v1119_v46, %v1020_v47 }
 0x155   : > { %v1121_v51 = vmax.f32 %v1120_v48, %v1065_v49 }
 0x157   : > { %v1143_v52 = vadd.f32 %v1824_v19, %v1121_v51 }
 0x159   : > { %v1161_v54 = vmax.f32 %v1143_v52, 0.0 }
 0x15b   : > { %v1539_v55 = vpack.c.bf16 %v1161_v54, %v1160_v53 }
 0x15d   : > { %1548 = vst [vmem:[%s1831_s14 + $0x40] sm:$0xff] %v1539_v55  }
 0x15e PF: > { %p10_p9 = scmp.ge.s32.totalorder %s1643_s16, 4   ;;  %s1872_s12 = smov %s1600_s13 }
 0x15f   : > { %s1873_s13 = smov %s1652_s19  ;;  %s1874_s14 = smov %s1643_s16 }
 0x160   :  { %12 = sbr.rel (!%p10_p9) target bundleno = 2 (0x2), region = 108 }

// kernel: net_forward.4
= control target key start
LH: loop header
LB: loop body
LE: loop exit
PB: predicated region body
PF: predicated region fallthrough
CT: control target
= control target key end

     0   :  { %s1102_s12 = smov 0   ;;  %s1104_s13 = smov 0   ;;  %s1305_s0 = inlined_call_operand.vmem [shape: bf16[4,32,512], index: 0, kind: input, shape index: {}]   ;;  %s1306_s1 = inlined_call_operand.vmem [shape: bf16[512,128], index: 1, kind: input, shape index: {}]   ;;  %s1307_s2 = inlined_call_operand.vmem [shape: f32[1,128], index: 2, kind: input, shape index: {}]   ;;  %s1308_s3 = inlined_call_operand.vmem [shape: bf16[32,128], index: 3, kind: output, shape index: {}]  }
   0x1   :  { %s1106_s14 = smov 0  }
   0x2 LB: > { %s772_s15 = sadd.s32 4294967295, %s1080_s14   ;;  %s1119_s16 = sadd.s32 1, %s1080_s14   ;;  %s1080_s14 = sphi %s1106_s14, %s1311_s14   ;;  %s1076_s13 = sphi %s1104_s13, %s1310_s13   ;;  %s1072_s12 = sphi %s1102_s12, %s1309_s12  }
   0x3   : > { %s17_s17 = ssub.s32 %s1080_s14, %s1119_s16  ;;  %s20_s18 = sadd.s32 1, %s1076_s13 }
   0x4   : > { %p18_p0 = scmp.eq.s32.totalorder %s17_s17, 0  ;;  %p27_p1 = scmp.ne.s32.totalorder %s1076_s13, %s1072_s12 }
   0x5   : > { %p28_p2 = scmp.eq.s32.totalorder %s1080_s14, 0  ;;  %p775_p4 = scmp.ge.s32.totalorder %s1080_s14, 2 }
   0x6   : > { %s1128_s19 = scalar_select %p18_p0, %s1076_s13, %s20_s18  }
   0x7   : > { %p29_p3 = por %p28_p2, %p27_p1  ;;  %127 = sbr.rel (%p775_p4) target bundleno = 32 (0x20), region = 24 }
   0xc   : > { %130 = sbr.rel (!%p29_p3) target bundleno = 32 (0x20), region = 28  ;;  %s132_s20 = sand.u32 (%p29_p3), 1, %s1076_s13  }
   0xd   : > { %s979_s21 = sshll.u32 (%p29_p3), %s1080_s14, 5  ;;  %s776_s22 = sshll.u32 (%p29_p3), %s132_s20, 7 }
   0xe   : > { %s1136_s25 = scalar_lea.vmem (%p29_p3), %s1305_s0, %s979_s21  ;;  %s134_s26 = scalar_lea.vmem (%p29_p3), [#allocation2], %s776_s22 }
   0xf   : > { %v151_v0 = vld [vmem:[%s1136_s25] sm:$0xff] (%p29_p3)  ;;  %v153_v1 = vld [vmem:[%s1136_s25 + $0x8] sm:$0xff] (%p29_p3)  ;;  %v155_v2 = vld [vmem:[%s1136_s25 + $0x10] sm:$0xff] (%p29_p3) }
  0x10   : > { %152 = vst [vmem:[%s134_s26] sm:$0xff] (%p29_p3), %v151_v0  ;;  %v157_v3 = vld [vmem:[%s1136_s25 + $0x18] sm:$0xff] (%p29_p3)  ;;  %v159_v4 = vld [vmem:[%s1136_s25 + $0x40] sm:$0xff] (%p29_p3)  ;;  %v161_v5 = vld [vmem:[%s1136_s25 + $0x48] sm:$0xff] (%p29_p3) }
  0x11   : > { %154 = vst [vmem:[%s134_s26 + $0x8] sm:$0xff] %v153_v1  ;;  %v163_v6 = vld [vmem:[%s1136_s25 + $0x50] sm:$0xff]  ;;  %v165_v7 = vld [vmem:[%s1136_s25 + $0x58] sm:$0xff]  ;;  %v167_v8 = vld [vmem:[%s1136_s25 + $0x80] sm:$0xff] }
  0x12   : > { %156 = vst [vmem:[%s134_s26 + $0x10] sm:$0xff] %v155_v2  ;;  %v169_v9 = vld [vmem:[%s1136_s25 + $0x88] sm:$0xff]  ;;  %v171_v10 = vld [vmem:[%s1136_s25 + $0x90] sm:$0xff]  ;;  %v173_v11 = vld [vmem:[%s1136_s25 + $0x98] sm:$0xff] }
  0x13   : > { %158 = vst [vmem:[%s134_s26 + $0x18] sm:$0xff] %v157_v3  ;;  %v175_v12 = vld [vmem:[%s1136_s25 + $0xc0] sm:$0xff]  ;;  %v177_v13 = vld [vmem:[%s1136_s25 + $0xc8] sm:$0xff]  ;;  %v179_v14 = vld [vmem:[%s1136_s25 + $0xd0] sm:$0xff] }
  0x14   : > { %160 = vst [vmem:[%s134_s26 + $0x20] sm:$0xff] %v159_v4  ;;  %v181_v15 = vld [vmem:[%s1136_s25 + $0xd8] sm:$0xff] }
  0x15   : > { %162 = vst [vmem:[%s134_s26 + $0x28] sm:$0xff] %v161_v5 }
  0x16   : > { %164 = vst [vmem:[%s134_s26 + $0x30] sm:$0xff] %v163_v6 }
  0x17   : > { %166 = vst [vmem:[%s134_s26 + $0x38] sm:$0xff] %v165_v7 }
  0x18   : > { %168 = vst [vmem:[%s134_s26 + $0x40] sm:$0xff] %v167_v8 }
  0x19   : > { %170 = vst [vmem:[%s134_s26 + $0x48] sm:$0xff] %v169_v9 }
  0x1a   : > { %172 = vst [vmem:[%s134_s26 + $0x50] sm:$0xff] %v171_v10 }
  0x1b   : > { %174 = vst [vmem:[%s134_s26 + $0x58] sm:$0xff] %v173_v11 }
  0x1c   : > { %176 = vst [vmem:[%s134_s26 + $0x60] sm:$0xff] %v175_v12 }
  0x1d   : > { %178 = vst [vmem:[%s134_s26 + $0x68] sm:$0xff] %v177_v13 }
  0x1e   : > { %180 = vst [vmem:[%s134_s26 + $0x70] sm:$0xff] %v179_v14 }
  0x1f   : > { %182 = vst [vmem:[%s134_s26 + $0x78] sm:$0xff] %v181_v15 }
  0x20 PF: > { %p780_p5 = scmp.ge.s32.totalorder %s1080_s14, 1  ;;  %p187_p6 = scmp.lt.s32.totalorder %s1080_s14, 3 }
  0x22   : > { %p188_p7 = pnand %p780_p5, %p187_p6 }
  0x23   : > { %s194_s25 = sand.u32 (!%p188_p7), 1, %s1072_s12   ;;  %s782_s30 = sshll.u32 (!%p188_p7), %s772_s15, 1 }
  0x24   : > { %191 = sbr.rel (%p188_p7) target bundleno = 278 (0x116), region = 51  ;;  %s781_s12 = sshll.u32 (!%p188_p7), %s194_s25, 7 }
  0x25   : > { %s1253_s29 = scalar_lea.vmem (!%p188_p7), [#allocation2], %s781_s12  ;;  %p219_p8 = scmp.lt.s32.totalorder (!%p188_p7), %s782_s30, 3 }
  0x29   : > { %v1003_v16 = vld [vmem:[%s1306_s1 + $0x38] sm:$0xff]  ;;  %v1002_v20 = vld [vmem:[%s1306_s1 + $0x30] sm:$0xff]  ;;  %v1001_v24 = vld [vmem:[%s1306_s1 + $0x28] sm:$0xff]  ;;  %s1313_s30 = smov (!%p219_p8, %s782_s30), 3 }
  0x2a   : > { %v1011_v17 = vld [vmem:[%s1306_s1 + $0x78] sm:$0xff]  ;;  %576 = vmatpush.bf16.msra.mxu0 %v1003_v16  ;;  %v1010_v21 = vld [vmem:[%s1306_s1 + $0x70] sm:$0xff]  ;;  %v1009_v25 = vld [vmem:[%s1306_s1 + $0x68] sm:$0xff]  ;;  %s783_s14 = sshll.u32 %s1313_s30, 2 }
  0x2b   : > { %v1019_v18 = vld [vmem:[%s1306_s1 + $0xb8] sm:$0xff]  ;;  %605 = vmatpush.bf16.msra.mxu1 %v1011_v17  ;;  %v1018_v22 = vld [vmem:[%s1306_s1 + $0xb0] sm:$0xff]  ;;  %v1017_v26 = vld [vmem:[%s1306_s1 + $0xa8] sm:$0xff]  ;;  %s222_s12 = scalar_lea.vmem %s1308_s3, %s783_s14 }
  0x2c   : > { %v1027_v19 = vld [vmem:[%s1306_s1 + $0xf8] sm:$0xff]  ;;  %634 = vmatpush.bf16.msra.mxu2 %v1019_v18  ;;  %v1026_v23 = vld [vmem:[%s1306_s1 + $0xf0] sm:$0xff]  ;;  %v1025_v27 = vld [vmem:[%s1306_s1 + $0xe8] sm:$0xff] }
  0x2d   : > { %663 = vmatpush.bf16.msra.mxu3 %v1027_v19  ;;  %v1000_v28 = vld [vmem:[%s1306_s1 + $0x20] sm:$0xff]  ;;  %v999_v32 = vld [vmem:[%s1306_s1 + $0x18] sm:$0xff]  ;;  %v998_v36 = vld [vmem:[%s1306_s1 + $0x10] sm:$0xff] }
  0x2e   : > { %577 = vmatpush.bf16.msra.mxu0 %v1002_v20  ;;  %v1008_v29 = vld [vmem:[%s1306_s1 + $0x60] sm:$0xff]  ;;  %v1007_v33 = vld [vmem:[%s1306_s1 + $0x58] sm:$0xff]  ;;  %v1006_v37 = vld [vmem:[%s1306_s1 + $0x50] sm:$0xff] }
  0x2f   : > { %606 = vmatpush.bf16.msra.mxu1 %v1010_v21  ;;  %v1016_v30 = vld [vmem:[%s1306_s1 + $0xa0] sm:$0xff]  ;;  %v1015_v34 = vld [vmem:[%s1306_s1 + $0x98] sm:$0xff]  ;;  %v1014_v38 = vld [vmem:[%s1306_s1 + $0x90] sm:$0xff] }
  0x30   : > { %635 = vmatpush.bf16.msra.mxu2 %v1018_v22  ;;  %v1024_v31 = vld [vmem:[%s1306_s1 + $0xe0] sm:$0xff]  ;;  %v1023_v35 = vld [vmem:[%s1306_s1 + $0xd8] sm:$0xff]  ;;  %v1022_v39 = vld [vmem:[%s1306_s1 + $0xd0] sm:$0xff] }
  0x31   : > { %664 = vmatpush.bf16.msra.mxu3 %v1026_v23  ;;  %v997_v40 = vld [vmem:[%s1306_s1 + $0x8] sm:$0xff]  ;;  %v996_v44 = vld [vmem:[%s1306_s1] sm:$0xff]  ;;  %v982_v49 = vld [vmem:[%s1253_s29 + $0xc] sm:$0xf0] }
  0x32   : > { %578 = vmatpush.bf16.msra.mxu0 %v1001_v24  ;;  %v1005_v41 = vld [vmem:[%s1306_s1 + $0x48] sm:$0xff]  ;;  %v1004_v45 = vld [vmem:[%s1306_s1 + $0x40] sm:$0xff]  ;;  %v788_v51 = vld [vmem:[%s1253_s29 + $0x10] sm:$0xf0] }
  0x33   : > { %607 = vmatpush.bf16.msra.mxu1 %v1009_v25  ;;  %v1013_v42 = vld [vmem:[%s1306_s1 + $0x88] sm:$0xff]  ;;  %v1012_v46 = vld [vmem:[%s1306_s1 + $0x80] sm:$0xff]  ;;  %v983_v53 = vld [vmem:[%s1253_s29 + $0x14] sm:$0xf0] }
  0x34   : > { %636 = vmatpush.bf16.msra.mxu2 %v1017_v26  ;;  %v1021_v43 = vld [vmem:[%s1306_s1 + $0xc8] sm:$0xff]  ;;  %v1020_v47 = vld [vmem:[%s1306_s1 + $0xc0] sm:$0xff]  ;;  %v796_v55 = vld [vmem:[%s1253_s29 + $0x18] sm:$0xf0] }
  0x35   : > { %665 = vmatpush.bf16.msra.mxu3 %v1025_v27  ;;  %v786_v48 = vld [vmem:[%s1253_s29] sm:$0xf]  ;;  %v980_v50 = vld [vmem:[%s1253_s29 + $0x4] sm:$0xf]  ;;  %v794_v52 = vld [vmem:[%s1253_s29 + $0x8] sm:$0xf] }
  0x36   : > { %579 = vmatpush.bf16.msra.mxu0 %v1000_v28  ;;  %v981_v54 = vld [vmem:[%s1253_s29 + $0xc] sm:$0xf]  ;;  %v787_v56 = vor.u32 %v982_v49, %v786_v48  ;;  %v791_v57 = vor.u32 %v980_v50, %v788_v51  ;;  %v795_v58 = vor.u32 %v983_v53, %v794_v52  ;;  %v802_v60 = vld [vmem:[%s1253_s29 + $0x20] sm:$0xf]  ;;  %v986_v61 = vld [vmem:[%s1253_s29 + $0x2c] sm:$0xf0] }
  0x37   : > { %608 = vmatpush.bf16.msra.mxu1 %v1008_v29  ;;  %v799_v59 = vor.u32 %v981_v54, %v796_v55  ;;  %v984_v62 = vld [vmem:[%s1253_s29 + $0x24] sm:$0xf]  ;;  %v804_v63 = vld [vmem:[%s1253_s29 + $0x30] sm:$0xf0]  ;;  %v810_v0 = vld [vmem:[%s1253_s29 + $0x28] sm:$0xf]  ;;  %v803_v4 = vor.u32 %v986_v61, %v802_v60 }
  0x38   : > { %637 = vmatpush.bf16.msra.mxu2 %v1016_v30  ;;  %v987_v1 = vld [vmem:[%s1253_s29 + $0x34] sm:$0xf0]  ;;  %v985_v2 = vld [vmem:[%s1253_s29 + $0x2c] sm:$0xf]  ;;  %v812_v3 = vld [vmem:[%s1253_s29 + $0x38] sm:$0xf0]  ;;  %v807_v5 = vor.u32 %v984_v62, %v804_v63 }
  0x39   : > { %666 = vmatpush.bf16.msra.mxu3 %v1024_v31  ;;  %v811_v6 = vor.u32 %v987_v1, %v810_v0  ;;  %v815_v7 = vor.u32 %v985_v2, %v812_v3  ;;  %v818_v8 = vld [vmem:[%s1253_s29 + $0x40] sm:$0xf]  ;;  %v990_v9 = vld [vmem:[%s1253_s29 + $0x4c] sm:$0xf0]  ;;  %v988_v10 = vld [vmem:[%s1253_s29 + $0x44] sm:$0xf] }
  0x3a   : > { %580 = vmatpush.bf16.msra.mxu0 %v999_v32  ;;  %v820_v11 = vld [vmem:[%s1253_s29 + $0x50] sm:$0xf0]  ;;  %v826_v12 = vld [vmem:[%s1253_s29 + $0x48] sm:$0xf]  ;;  %v991_v13 = vld [vmem:[%s1253_s29 + $0x54] sm:$0xf0]  ;;  %v819_v16 = vor.u32 %v990_v9, %v818_v8 }
  0x3b   : > { %609 = vmatpush.bf16.msra.mxu1 %v1007_v33  ;;  %v989_v14 = vld [vmem:[%s1253_s29 + $0x4c] sm:$0xf]  ;;  %v828_v15 = vld [vmem:[%s1253_s29 + $0x58] sm:$0xf0]  ;;  %v823_v17 = vor.u32 %v988_v10, %v820_v11  ;;  %v827_v18 = vor.u32 %v991_v13, %v826_v12  ;;  %v834_v20 = vld [vmem:[%s1253_s29 + $0x60] sm:$0xf] }
  0x3c   : > { %638 = vmatpush.bf16.msra.mxu2 %v1015_v34  ;;  %v831_v19 = vor.u32 %v989_v14, %v828_v15  ;;  %v994_v21 = vld [vmem:[%s1253_s29 + $0x6c] sm:$0xf0]  ;;  %v992_v22 = vld [vmem:[%s1253_s29 + $0x64] sm:$0xf]  ;;  %v836_v23 = vld [vmem:[%s1253_s29 + $0x70] sm:$0xf0] }
  0x3d   : > { %667 = vmatpush.bf16.msra.mxu3 %v1023_v35  ;;  %v842_v24 = vld [vmem:[%s1253_s29 + $0x68] sm:$0xf]  ;;  %v995_v25 = vld [vmem:[%s1253_s29 + $0x74] sm:$0xf0]  ;;  %v993_v26 = vld [vmem:[%s1253_s29 + $0x6c] sm:$0xf]  ;;  %v835_v28 = vor.u32 %v994_v21, %v834_v20  ;;  %v839_v29 = vor.u32 %v992_v22, %v836_v23 }
  0x3e   : > { %581 = vmatpush.bf16.msra.mxu0 %v998_v36  ;;  %v844_v27 = vld [vmem:[%s1253_s29 + $0x78] sm:$0xf0]  ;;  %v843_v30 = vor.u32 %v995_v25, %v842_v24 }
  0x3f   : > { %610 = vmatpush.bf16.msra.mxu1 %v1006_v37  ;;  %v847_v31 = vor.u32 %v993_v26, %v844_v27  ;;  %v1057_v26 = vld [vmem:[%s1307_s2] ss:$0 sm:$0xff] }
  0x40   : > { %639 = vmatpush.bf16.msra.mxu2 %v1014_v38 }
  0x41   : > { %668 = vmatpush.bf16.msra.mxu3 %v1022_v39 }
  0x42   : > { %582 = vmatpush.bf16.msra.mxu0 %v997_v40 }
  0x43   : > { %611 = vmatpush.bf16.msra.mxu1 %v1005_v41 }
  0x44   : > { %640 = vmatpush.bf16.msra.mxu2 %v1013_v42 }
  0x45   : > { %669 = vmatpush.bf16.msra.mxu3 %v1021_v43 }
  0x46   : > { %583 = vmatpush.bf16.msra.mxu0 %v996_v44 }
  0x47   : > { %612 = vmatpush.bf16.msra.mxu1 %v1004_v45 }
  0x48   : > { %641 = vmatpush.bf16.msra.mxu2 %v1012_v46 }
  0x49   : > { %670 = vmatpush.bf16.msra.mxu3 %v1020_v47  ;;  %584 = vmatmul.bf16.vlgmr.msra.gmra.mxu0 %v787_v56 }
  0x4a   : > { %613 = vmatmul.bf16.vlgmr.msra.gmra.mxu1 %v791_v57 }
  0x4b   : > { %642 = vmatmul.bf16.vlgmr.msra.gmra.mxu2 %v795_v58 }
  0x4c   : > { %671 = vmatmul.bf16.vlgmr.msra.gmra.mxu3 %v799_v59 }
  0x59   : > { %589 = vmatmul.bf16.gmra.mxu0 %v803_v4 }
  0x5a   : > { %618 = vmatmul.bf16.gmra.mxu1 %v807_v5 }
  0x5b   : > { %647 = vmatmul.bf16.gmra.mxu2 %v811_v6 }
  0x5c   : > { %676 = vmatmul.bf16.gmra.mxu3 %v815_v7 }
  0x69   : > { %594 = vmatmul.bf16.gmra.mxu0 %v819_v16 }
  0x6a   : > { %623 = vmatmul.bf16.gmra.mxu1 %v823_v17 }
  0x6b   : > { %652 = vmatmul.bf16.gmra.mxu2 %v827_v18 }
  0x6c   : > { %681 = vmatmul.bf16.gmra.mxu3 %v831_v19 }
  0x79   : > { %599 = vmatmul.bf16.gmra.mxu0 %v835_v28 }
  0x7a   : > { %628 = vmatmul.bf16.gmra.mxu1 %v839_v29 }
  0x7b   : > { %657 = vmatmul.bf16.gmra.mxu2 %v843_v30 }
  0x7c   : > { %686 = vmatmul.bf16.gmra.mxu3 %v847_v31 }
  0xc6   : > { %v585_v32 = vpop.f32.mrf.mxu0 }
  0xc7   : > { %v614_v33 = vpop.f32.mrf.mxu1 }
  0xc8   : > { %v615_v61 = vadd.f32 %v614_v33, %v585_v32 }
  0xce   : > { %v643_v34 = vpop.f32.mrf.mxu2  ;;  %v587_v36 = vpop.f32.mrf.mxu0 }
  0xcf   : > { %v672_v35 = vpop.f32.mrf.mxu3  ;;  %v616_v37 = vpop.f32.mrf.mxu1  ;;  %v644_v3 = vadd.f32 %v643_v34, %v615_v61 }
  0xd0   : > { %v617_v6 = vadd.f32 %v616_v37, %v587_v36 }
  0xd1   : > { %v673_v13 = vadd.f32 %v672_v35, %v644_v3 }
  0xd6   : > { %v645_v38 = vpop.f32.mrf.mxu2  ;;  %v590_v40 = vpop.f32.mrf.mxu0 }
  0xd7   : > { %v674_v39 = vpop.f32.mrf.mxu3  ;;  %v619_v41 = vpop.f32.mrf.mxu1  ;;  %v646_v14 = vadd.f32 %v645_v38, %v617_v6 }
  0xd8   : > { %v620_v58 = vadd.f32 %v619_v41, %v590_v40 }
  0xd9   : > { %v675_v23 = vadd.f32 %v674_v39, %v646_v14 }
  0xde   : > { %v648_v42 = vpop.f32.mrf.mxu2  ;;  %v592_v44 = vpop.f32.mrf.mxu0 }
  0xdf   : > { %v677_v43 = vpop.f32.mrf.mxu3  ;;  %v621_v45 = vpop.f32.mrf.mxu1  ;;  %v649_v0 = vadd.f32 %v648_v42, %v620_v58 }
  0xe0   : > { %v622_v10 = vadd.f32 %v621_v45, %v592_v44 }
  0xe1   : > { %v678_v9 = vadd.f32 %v677_v43, %v649_v0 }
  0xe6   : > { %v650_v46 = vpop.f32.mrf.mxu2  ;;  %v595_v48 = vpop.f32.mrf.mxu0 }
  0xe7   : > { %v679_v47 = vpop.f32.mrf.mxu3  ;;  %v624_v49 = vpop.f32.mrf.mxu1  ;;  %v651_v15 = vadd.f32 %v650_v46, %v622_v10 }
  0xe8   : > { %v625_v59 = vadd.f32 %v624_v49, %v595_v48 }
  0xe9   : > { %v680_v24 = vadd.f32 %v679_v47, %v651_v15 }
  0xee   : > { %v653_v50 = vpop.f32.mrf.mxu2  ;;  %v597_v52 = vpop.f32.mrf.mxu0 }
  0xef   : > { %v682_v51 = vpop.f32.mrf.mxu3  ;;  %v626_v53 = vpop.f32.mrf.mxu1  ;;  %v654_v1 = vadd.f32 %v653_v50, %v625_v59 }
  0xf0   : > { %v627_v4 = vadd.f32 %v626_v53, %v597_v52 }
  0xf1   : > { %v683_v11 = vadd.f32 %v682_v51, %v654_v1 }
  0xf3   : > { %v692_v19 = vmax.f32 %v673_v13, %v683_v11 }
  0xf6   : > { %v655_v54 = vpop.f32.mrf.mxu2  ;;  %v600_v56 = vpop.f32.mrf.mxu0 }
  0xf7   : > { %v684_v55 = vpop.f32.mrf.mxu3  ;;  %v629_v57 = vpop.f32.mrf.mxu1  ;;  %v656_v12 = vadd.f32 %v655_v54, %v627_v4 }
  0xf8   : > { %v630_v60 = vadd.f32 %v629_v57, %v600_v56 }
  0xf9   : > { %v685_v20 = vadd.f32 %v684_v55, %v656_v12 }
  0xfb   : > { %v695_v28 = vmax.f32 %v675_v23, %v685_v20 }
  0xfe   : > { %v658_v62 = vpop.f32.mrf.mxu2  ;;  %v602_v7 = vpop.f32.mrf.mxu0 }
  0xff   : > { %v687_v63 = vpop.f32.mrf.mxu3  ;;  %v659_v2 = vadd.f32 %v658_v62, %v630_v60  ;;  %v631_v8 = vpop.f32.mrf.mxu1 }
 0x100   : > { %v632_v17 = vadd.f32 %v631_v8, %v602_v7 }
 0x101   : > { %v688_v5 = vadd.f32 %v687_v63, %v659_v2 }
 0x103   : > { %v693_v16 = vmax.f32 %v678_v9, %v688_v5 }
 0x105   : > { %v694_v25 = vmax.f32 %v692_v19, %v693_v16 }
 0x106   : > { %v660_v18 = vpop.f32.mrf.mxu2 }
 0x107   : > { %v661_v21 = vadd.f32 %v660_v18, %v632_v17  ;;  %v689_v22 = vpop.f32.mrf.mxu3  ;;  %v702_v30 = vadd.f32 %v1057_v26, %v694_v25 }
 0x109   : > { %v690_v27 = vadd.f32 %v689_v22, %v661_v21  ;;  %v704_v33 = vmax.f32 %v702_v30, 0.0 }
 0x10b   : > { %v696_v29 = vmax.f32 %v680_v24, %v690_v27 }
 0x10d   : > { %v697_v31 = vmax.f32 %v695_v28, %v696_v29 }
 0x10f   : > { %v703_v32 = vadd.f32 %v1057_v26, %v697_v31 }
 0x111   : > { %v705_v34 = vmax.f32 %v703_v32, 0.0 }
 0x113   : > { %v1031_v35 = vpack.c.bf16 %v705_v34, %v704_v33 }
 0x115   : > { %1032 = vst [vmem:[%s222_s12] sm:$0xff] %v1031_v35  }
 0x116 PF: > { %p10_p9 = scmp.ge.s32.totalorder %s1119_s16, 4   ;;  %s1309_s12 = smov %s1076_s13 }
 0x117   : > { %s1310_s13 = smov %s1128_s19  ;;  %s1311_s14 = smov %s1119_s16 }
 0x118   :  { %12 = sbr.rel (!%p10_p9) target bundleno = 2 (0x2), region = 90 }

// kernel: net_forward.5
= control target key start
LH: loop header
LB: loop body
LE: loop exit
PB: predicated region body
PF: predicated region fallthrough
CT: control target
= control target key end

     0   :  { %s10424_s0 = inlined_call_operand.vmem [shape: bf16[2,2048], index: 0, kind: input, shape index: {}]   ;;  %s10425_s1 = inlined_call_operand.vmem [shape: bf16[2048,512], index: 1, kind: input, shape index: {}]   ;;  %s10426_s2 = inlined_call_operand.vmem [shape: f32[1,512], index: 2, kind: input, shape index: {}]   ;;  %s10427_s3 = inlined_call_operand.vmem [shape: bf16[512,10], index: 3, kind: input, shape index: {}]   ;;  %s10428_s4 = inlined_call_operand.vmem [shape: f32[1,10], index: 4, kind: input, shape index: {}]   ;;  %s10429_s5 = inlined_call_operand.hbm [shape: f32[2,10], index: 5, kind: output, shape index: {}]  }
   0x1   :  { %v4437_v0 = vld [vmem:[%s10425_s1 + $0xe0] sm:$0xf]  ;;  %v6529_v1 = vld [vmem:[%s10425_s1 + $0xec] sm:$0xf0] }
   0x2   :  { %v4565_v2 = vld [vmem:[%s10425_s1 + $0x1e0] sm:$0xf]  ;;  %v4438_v3 = vor.u32 %v6529_v1, %v4437_v0  ;;  %v6561_v4 = vld [vmem:[%s10425_s1 + $0x1ec] sm:$0xf0] }
   0x3   :  { %v4693_v5 = vld [vmem:[%s10425_s1 + $0x2e0] sm:$0xf]  ;;  %v6593_v6 = vld [vmem:[%s10425_s1 + $0x2ec] sm:$0xf0]  ;;  %v4566_v7 = vor.u32 %v6561_v4, %v4565_v2 }
   0x4   :  { %v4694_v8 = vor.u32 %v6593_v6, %v4693_v5  ;;  %v4821_v9 = vld [vmem:[%s10425_s1 + $0x3e0] sm:$0xf]  ;;  %v6625_v10 = vld [vmem:[%s10425_s1 + $0x3ec] sm:$0xf0]  ;;  %3141 = vmatpush.bf16.msra.mxu0 %v4438_v3 }
   0x5   :  { %v4421_v11 = vld [vmem:[%s10425_s1 + $0xc0] sm:$0xf]  ;;  %v4822_v12 = vor.u32 %v6625_v10, %v4821_v9  ;;  %v6525_v13 = vld [vmem:[%s10425_s1 + $0xcc] sm:$0xf0]  ;;  %3154 = vmatpush.bf16.msra.mxu1 %v4566_v7 }
   0x6   :  { %v4549_v14 = vld [vmem:[%s10425_s1 + $0x1c0] sm:$0xf]  ;;  %v6557_v15 = vld [vmem:[%s10425_s1 + $0x1cc] sm:$0xf0]  ;;  %3167 = vmatpush.bf16.msra.mxu2 %v4694_v8  ;;  %v4422_v16 = vor.u32 %v6525_v13, %v4421_v11 }
   0x7   :  { %v4550_v17 = vor.u32 %v6557_v15, %v4549_v14  ;;  %v4677_v18 = vld [vmem:[%s10425_s1 + $0x2c0] sm:$0xf]  ;;  %v6589_v19 = vld [vmem:[%s10425_s1 + $0x2cc] sm:$0xf0]  ;;  %3180 = vmatpush.bf16.msra.mxu3 %v4822_v12 }
   0x8   :  { %v4805_v20 = vld [vmem:[%s10425_s1 + $0x3c0] sm:$0xf]  ;;  %v4678_v21 = vor.u32 %v6589_v19, %v4677_v18  ;;  %v6621_v22 = vld [vmem:[%s10425_s1 + $0x3cc] sm:$0xf0]  ;;  %3142 = vmatpush.bf16.msra.mxu0 %v4422_v16 }
   0x9   :  { %v4405_v23 = vld [vmem:[%s10425_s1 + $0xa0] sm:$0xf]  ;;  %v6521_v24 = vld [vmem:[%s10425_s1 + $0xac] sm:$0xf0]  ;;  %v4806_v25 = vor.u32 %v6621_v22, %v4805_v20  ;;  %3155 = vmatpush.bf16.msra.mxu1 %v4550_v17 }
   0xa   :  { %v4533_v26 = vld [vmem:[%s10425_s1 + $0x1a0] sm:$0xf]  ;;  %v6553_v27 = vld [vmem:[%s10425_s1 + $0x1ac] sm:$0xf0]  ;;  %v4406_v29 = vor.u32 %v6521_v24, %v4405_v23  ;;  %3168 = vmatpush.bf16.msra.mxu2 %v4678_v21 }
   0xb   :  { %v4661_v28 = vld [vmem:[%s10425_s1 + $0x2a0] sm:$0xf]  ;;  %v6585_v30 = vld [vmem:[%s10425_s1 + $0x2ac] sm:$0xf0]  ;;  %v4534_v33 = vor.u32 %v6553_v27, %v4533_v26  ;;  %3181 = vmatpush.bf16.msra.mxu3 %v4806_v25 }
   0xc   :  { %v4789_v31 = vld [vmem:[%s10425_s1 + $0x3a0] sm:$0xf]  ;;  %v6617_v32 = vld [vmem:[%s10425_s1 + $0x3ac] sm:$0xf0]  ;;  %v4662_v34 = vor.u32 %v6585_v30, %v4661_v28  ;;  %3143 = vmatpush.bf16.msra.mxu0 %v4406_v29 }
   0xd   :  { %v4389_v35 = vld [vmem:[%s10425_s1 + $0x80] sm:$0xf]  ;;  %v6517_v36 = vld [vmem:[%s10425_s1 + $0x8c] sm:$0xf0]  ;;  %v4790_v38 = vor.u32 %v6617_v32, %v4789_v31  ;;  %3156 = vmatpush.bf16.msra.mxu1 %v4534_v33 }
   0xe   :  { %v4517_v37 = vld [vmem:[%s10425_s1 + $0x180] sm:$0xf]  ;;  %v6549_v39 = vld [vmem:[%s10425_s1 + $0x18c] sm:$0xf0]  ;;  %v4390_v44 = vor.u32 %v6517_v36, %v4389_v35  ;;  %3169 = vmatpush.bf16.msra.mxu2 %v4662_v34 }
   0xf   :  { %v4645_v40 = vld [vmem:[%s10425_s1 + $0x280] sm:$0xf]  ;;  %v6581_v41 = vld [vmem:[%s10425_s1 + $0x28c] sm:$0xf0]  ;;  %v4518_v45 = vor.u32 %v6549_v39, %v4517_v37  ;;  %3182 = vmatpush.bf16.msra.mxu3 %v4790_v38 }
  0x10   :  { %v4773_v42 = vld [vmem:[%s10425_s1 + $0x380] sm:$0xf]  ;;  %v6613_v43 = vld [vmem:[%s10425_s1 + $0x38c] sm:$0xf0]  ;;  %v4646_v46 = vor.u32 %v6581_v41, %v4645_v40  ;;  %3144 = vmatpush.bf16.msra.mxu0 %v4390_v44 }
  0x11   :  { %v4373_v47 = vld [vmem:[%s10425_s1 + $0x60] sm:$0xf]  ;;  %v6513_v48 = vld [vmem:[%s10425_s1 + $0x6c] sm:$0xf0]  ;;  %v4774_v50 = vor.u32 %v6613_v43, %v4773_v42  ;;  %3157 = vmatpush.bf16.msra.mxu1 %v4518_v45 }
  0x12   :  { %v4501_v49 = vld [vmem:[%s10425_s1 + $0x160] sm:$0xf]  ;;  %v6545_v51 = vld [vmem:[%s10425_s1 + $0x16c] sm:$0xf0]  ;;  %v4374_v56 = vor.u32 %v6513_v48, %v4373_v47  ;;  %3170 = vmatpush.bf16.msra.mxu2 %v4646_v46 }
  0x13   :  { %v4629_v52 = vld [vmem:[%s10425_s1 + $0x260] sm:$0xf]  ;;  %v6577_v53 = vld [vmem:[%s10425_s1 + $0x26c] sm:$0xf0]  ;;  %v4502_v57 = vor.u32 %v6545_v51, %v4501_v49  ;;  %3183 = vmatpush.bf16.msra.mxu3 %v4774_v50 }
  0x14   :  { %v4757_v54 = vld [vmem:[%s10425_s1 + $0x360] sm:$0xf]  ;;  %v6609_v55 = vld [vmem:[%s10425_s1 + $0x36c] sm:$0xf0]  ;;  %v4630_v58 = vor.u32 %v6577_v53, %v4629_v52  ;;  %3145 = vmatpush.bf16.msra.mxu0 %v4374_v56 }
  0x15   :  { %v4357_v59 = vld [vmem:[%s10425_s1 + $0x40] sm:$0xf]  ;;  %v6509_v60 = vld [vmem:[%s10425_s1 + $0x4c] sm:$0xf0]  ;;  %v4758_v62 = vor.u32 %v6609_v55, %v4757_v54  ;;  %3158 = vmatpush.bf16.msra.mxu1 %v4502_v57 }
  0x16   :  { %v4485_v61 = vld [vmem:[%s10425_s1 + $0x140] sm:$0xf]  ;;  %v6541_v63 = vld [vmem:[%s10425_s1 + $0x14c] sm:$0xf0]  ;;  %v4358_v4 = vor.u32 %v6509_v60, %v4357_v59  ;;  %3171 = vmatpush.bf16.msra.mxu2 %v4630_v58 }
  0x17   :  { %v4613_v0 = vld [vmem:[%s10425_s1 + $0x240] sm:$0xf]  ;;  %v6573_v1 = vld [vmem:[%s10425_s1 + $0x24c] sm:$0xf0]  ;;  %v4486_v5 = vor.u32 %v6541_v63, %v4485_v61  ;;  %3184 = vmatpush.bf16.msra.mxu3 %v4758_v62 }
  0x18   :  { %v4741_v2 = vld [vmem:[%s10425_s1 + $0x340] sm:$0xf]  ;;  %v6605_v3 = vld [vmem:[%s10425_s1 + $0x34c] sm:$0xf0]  ;;  %v4614_v6 = vor.u32 %v6573_v1, %v4613_v0  ;;  %3146 = vmatpush.bf16.msra.mxu0 %v4358_v4 }
  0x19   :  { %v4341_v7 = vld [vmem:[%s10425_s1 + $0x20] sm:$0xf]  ;;  %v6505_v8 = vld [vmem:[%s10425_s1 + $0x2c] sm:$0xf0]  ;;  %v4742_v10 = vor.u32 %v6605_v3, %v4741_v2  ;;  %3159 = vmatpush.bf16.msra.mxu1 %v4486_v5 }
  0x1a   :  { %v4469_v9 = vld [vmem:[%s10425_s1 + $0x120] sm:$0xf]  ;;  %v6537_v11 = vld [vmem:[%s10425_s1 + $0x12c] sm:$0xf0]  ;;  %v4342_v16 = vor.u32 %v6505_v8, %v4341_v7  ;;  %3172 = vmatpush.bf16.msra.mxu2 %v4614_v6 }
  0x1b   :  { %v4597_v12 = vld [vmem:[%s10425_s1 + $0x220] sm:$0xf]  ;;  %v6569_v13 = vld [vmem:[%s10425_s1 + $0x22c] sm:$0xf0]  ;;  %v4470_v19 = vor.u32 %v6537_v11, %v4469_v9  ;;  %3185 = vmatpush.bf16.msra.mxu3 %v4742_v10 }
  0x1c   :  { %v4725_v14 = vld [vmem:[%s10425_s1 + $0x320] sm:$0xf]  ;;  %v6601_v15 = vld [vmem:[%s10425_s1 + $0x32c] sm:$0xf0]  ;;  %v4598_v20 = vor.u32 %v6569_v13, %v4597_v12  ;;  %3147 = vmatpush.bf16.msra.mxu0 %v4342_v16 }
  0x1d   :  { %v4325_v17 = vld [vmem:[%s10425_s1] sm:$0xf]  ;;  %v6501_v18 = vld [vmem:[%s10425_s1 + $0xc] sm:$0xf0]  ;;  %v4726_v24 = vor.u32 %v6601_v15, %v4725_v14  ;;  %3160 = vmatpush.bf16.msra.mxu1 %v4470_v19 }
  0x1e   :  { %v4453_v21 = vld [vmem:[%s10425_s1 + $0x100] sm:$0xf]  ;;  %v6533_v22 = vld [vmem:[%s10425_s1 + $0x10c] sm:$0xf0]  ;;  %v4326_v31 = vor.u32 %v6501_v18, %v4325_v17  ;;  %3173 = vmatpush.bf16.msra.mxu2 %v4598_v20 }
  0x1f   :  { %v4581_v23 = vld [vmem:[%s10425_s1 + $0x200] sm:$0xf]  ;;  %v6565_v25 = vld [vmem:[%s10425_s1 + $0x20c] sm:$0xf0]  ;;  %v4454_v35 = vor.u32 %v6533_v22, %v4453_v21  ;;  %3186 = vmatpush.bf16.msra.mxu3 %v4726_v24 }
  0x20   :  { %v4709_v26 = vld [vmem:[%s10425_s1 + $0x300] sm:$0xf]  ;;  %v6597_v27 = vld [vmem:[%s10425_s1 + $0x30c] sm:$0xf0]  ;;  %v4582_v36 = vor.u32 %v6565_v25, %v4581_v23  ;;  %3148 = vmatpush.bf16.msra.mxu0 %v4326_v31 }
  0x21   :  { %v4949_v28 = vld [vmem:[%s10425_s1 + $0x4e0] sm:$0xf]  ;;  %v6657_v29 = vld [vmem:[%s10425_s1 + $0x4ec] sm:$0xf0]  ;;  %v4710_v39 = vor.u32 %v6597_v27, %v4709_v26  ;;  %3161 = vmatpush.bf16.msra.mxu1 %v4454_v35 }
  0x22   :  { %v5077_v30 = vld [vmem:[%s10425_s1 + $0x5e0] sm:$0xf]  ;;  %v6689_v32 = vld [vmem:[%s10425_s1 + $0x5ec] sm:$0xf0]  ;;  %v4950_v40 = vor.u32 %v6657_v29, %v4949_v28  ;;  %3174 = vmatpush.bf16.msra.mxu2 %v4582_v36 }
  0x23   :  { %v5205_v33 = vld [vmem:[%s10425_s1 + $0x6e0] sm:$0xf]  ;;  %v6721_v34 = vld [vmem:[%s10425_s1 + $0x6ec] sm:$0xf0]  ;;  %v5078_v41 = vor.u32 %v6689_v32, %v5077_v30  ;;  %3187 = vmatpush.bf16.msra.mxu3 %v4710_v39 }
  0x24   :  { %v5333_v37 = vld [vmem:[%s10425_s1 + $0x7e0] sm:$0xf]  ;;  %v6753_v38 = vld [vmem:[%s10425_s1 + $0x7ec] sm:$0xf0]  ;;  %v5206_v42 = vor.u32 %v6721_v34, %v5205_v33  ;;  %3193 = vmatpush.bf16.msrb.mxu0 %v4950_v40 }
  0x25   :  { %v4933_v43 = vld [vmem:[%s10425_s1 + $0x4c0] sm:$0xf]  ;;  %v6653_v44 = vld [vmem:[%s10425_s1 + $0x4cc] sm:$0xf0]  ;;  %v5334_v46 = vor.u32 %v6753_v38, %v5333_v37  ;;  %3206 = vmatpush.bf16.msrb.mxu1 %v5078_v41 }
  0x26   :  { %v5061_v45 = vld [vmem:[%s10425_s1 + $0x5c0] sm:$0xf]  ;;  %v6685_v47 = vld [vmem:[%s10425_s1 + $0x5cc] sm:$0xf0]  ;;  %v4934_v52 = vor.u32 %v6653_v44, %v4933_v43  ;;  %3219 = vmatpush.bf16.msrb.mxu2 %v5206_v42 }
  0x27   :  { %v5189_v48 = vld [vmem:[%s10425_s1 + $0x6c0] sm:$0xf]  ;;  %v6717_v49 = vld [vmem:[%s10425_s1 + $0x6cc] sm:$0xf0]  ;;  %v5062_v53 = vor.u32 %v6685_v47, %v5061_v45  ;;  %3232 = vmatpush.bf16.msrb.mxu3 %v5334_v46 }
  0x28   :  { %v5317_v50 = vld [vmem:[%s10425_s1 + $0x7c0] sm:$0xf]  ;;  %v6749_v51 = vld [vmem:[%s10425_s1 + $0x7cc] sm:$0xf0]  ;;  %v5190_v54 = vor.u32 %v6717_v49, %v5189_v48  ;;  %3194 = vmatpush.bf16.msrb.mxu0 %v4934_v52 }
  0x29   :  { %v4917_v55 = vld [vmem:[%s10425_s1 + $0x4a0] sm:$0xf]  ;;  %v6649_v56 = vld [vmem:[%s10425_s1 + $0x4ac] sm:$0xf0]  ;;  %v5318_v58 = vor.u32 %v6749_v51, %v5317_v50  ;;  %3207 = vmatpush.bf16.msrb.mxu1 %v5062_v53 }
  0x2a   :  { %v5045_v57 = vld [vmem:[%s10425_s1 + $0x5a0] sm:$0xf]  ;;  %v6681_v59 = vld [vmem:[%s10425_s1 + $0x5ac] sm:$0xf0]  ;;  %v4918_v0 = vor.u32 %v6649_v56, %v4917_v55  ;;  %3220 = vmatpush.bf16.msrb.mxu2 %v5190_v54 }
  0x2b   :  { %v5173_v60 = vld [vmem:[%s10425_s1 + $0x6a0] sm:$0xf]  ;;  %v6713_v61 = vld [vmem:[%s10425_s1 + $0x6ac] sm:$0xf0]  ;;  %v5046_v3 = vor.u32 %v6681_v59, %v5045_v57  ;;  %3233 = vmatpush.bf16.msrb.mxu3 %v5318_v58 }
  0x2c   :  { %v5301_v62 = vld [vmem:[%s10425_s1 + $0x7a0] sm:$0xf]  ;;  %v6745_v63 = vld [vmem:[%s10425_s1 + $0x7ac] sm:$0xf0]  ;;  %v5174_v4 = vor.u32 %v6713_v61, %v5173_v60  ;;  %3195 = vmatpush.bf16.msrb.mxu0 %v4918_v0  ;;  %v22_v61 = vld [vmem:[%s10424_s0 + $0x8] sm:$0xff] }
  0x2d   :  { %v4901_v1 = vld [vmem:[%s10425_s1 + $0x480] sm:$0xf]  ;;  %v6645_v5 = vld [vmem:[%s10425_s1 + $0x48c] sm:$0xf0]  ;;  %v5302_v7 = vor.u32 %v6745_v63, %v5301_v62  ;;  %3208 = vmatpush.bf16.msrb.mxu1 %v5046_v3 }
  0x2e   :  { %v21_v2 = vld [vmem:[%s10424_s0] sm:$0xff]  ;;  %v6677_v8 = vld [vmem:[%s10425_s1 + $0x58c] sm:$0xf0]  ;;  %v4902_v13 = vor.u32 %v6645_v5, %v4901_v1  ;;  %3221 = vmatpush.bf16.msrb.mxu2 %v5174_v4 }
  0x2f   :  { %v5029_v6 = vld [vmem:[%s10425_s1 + $0x580] sm:$0xf]  ;;  %546 = vst [vmem:[#allocation1] ss:$9 sm:$0xff] %v21_v2  ;;  %v6709_v10 = vld [vmem:[%s10425_s1 + $0x68c] sm:$0xf0]  ;;  %3234 = vmatpush.bf16.msrb.mxu3 %v5302_v7 }
  0x30   :  { %v5157_v9 = vld [vmem:[%s10425_s1 + $0x680] sm:$0xf]  ;;  %v6741_v12 = vld [vmem:[%s10425_s1 + $0x78c] sm:$0xf0]  ;;  %v5030_v14 = vor.u32 %v6677_v8, %v5029_v6  ;;  %3196 = vmatpush.bf16.msrb.mxu0 %v4902_v13 }
  0x31   :  { %v5285_v11 = vld [vmem:[%s10425_s1 + $0x780] sm:$0xf]  ;;  %v5158_v15 = vor.u32 %v6709_v10, %v5157_v9  ;;  %v6641_v17 = vld [vmem:[%s10425_s1 + $0x46c] sm:$0xf0] }
  0x32   :  { %v4885_v16 = vld [vmem:[%s10425_s1 + $0x460] sm:$0xf]  ;;  %v5286_v19 = vor.u32 %v6741_v12, %v5285_v11  ;;  %v6673_v20 = vld [vmem:[%s10425_s1 + $0x56c] sm:$0xf0]  ;;  %3209 = vmatpush.bf16.msrb.mxu1 %v5030_v14 }
  0x33   :  { %v5013_v18 = vld [vmem:[%s10425_s1 + $0x560] sm:$0xf]  ;;  %v6705_v22 = vld [vmem:[%s10425_s1 + $0x66c] sm:$0xf0]  ;;  %v4886_v26 = vor.u32 %v6641_v17, %v4885_v16  ;;  %3222 = vmatpush.bf16.msrb.mxu2 %v5158_v15 }
  0x34   :  { %v5141_v21 = vld [vmem:[%s10425_s1 + $0x660] sm:$0xf]  ;;  %v6737_v24 = vld [vmem:[%s10425_s1 + $0x76c] sm:$0xf0]  ;;  %v5014_v30 = vor.u32 %v6673_v20, %v5013_v18  ;;  %3235 = vmatpush.bf16.msrb.mxu3 %v5286_v19 }
  0x35   :  { %v5269_v23 = vld [vmem:[%s10425_s1 + $0x760] sm:$0xf]  ;;  %v5142_v31 = vor.u32 %v6705_v22, %v5141_v21  ;;  %v6637_v32 = vld [vmem:[%s10425_s1 + $0x44c] sm:$0xf0]  ;;  %3197 = vmatpush.bf16.msrb.mxu0 %v4886_v26 }
  0x36   :  { %v4869_v25 = vld [vmem:[%s10425_s1 + $0x440] sm:$0xf]  ;;  %v7450_v27 = vld [vmem:[#allocation1 + $0x12] sm:$0xff]  ;;  %v7462_v34 = vld [vmem:[#allocation1 + $0x9] sm:$0xff]  ;;  %v5270_v35 = vor.u32 %v6737_v24, %v5269_v23  ;;  %3210 = vmatpush.bf16.msrb.mxu1 %v5014_v30 }
  0x37   :  { %v7452_v28 = vld [vmem:[#allocation1] sm:$0xff]  ;;  %v6669_v36 = vld [vmem:[%s10425_s1 + $0x54c] sm:$0xf0]  ;;  %3175 = vmatmul.bf16.vlgmr.msra.gmra.mxu2 %v7450_v27  ;;  %v4870_v41 = vor.u32 %v6637_v32, %v4869_v25  ;;  %3162 = vmatmul.bf16.vlgmr.msra.gmra.mxu1 %v7462_v34  ;;  %v7525_v60 = vld [vmem:[#allocation1 + $0x36] sm:$0xff] }
  0x38   :  { %v7454_v29 = vld [vmem:[#allocation1 + $0x1b] sm:$0xff]  ;;  %v6701_v38 = vld [vmem:[%s10425_s1 + $0x64c] sm:$0xf0]  ;;  %3149 = vmatmul.bf16.vlgmr.msra.gmra.mxu0 %v7452_v28  ;;  %3223 = vmatpush.bf16.msrb.mxu2 %v5142_v31  ;;  %v7530_v0 = vld [vmem:[#allocation1 + $0x24] sm:$0xff] }
  0x39   :  { %v4997_v33 = vld [vmem:[%s10425_s1 + $0x540] sm:$0xf]  ;;  %v6733_v40 = vld [vmem:[%s10425_s1 + $0x74c] sm:$0xf0]  ;;  %3188 = vmatmul.bf16.vlgmr.msra.gmra.mxu3 %v7454_v29  ;;  %3198 = vmatpush.bf16.msrb.mxu0 %v4870_v41 }
  0x3a   :  { %v5125_v37 = vld [vmem:[%s10425_s1 + $0x640] sm:$0xf]  ;;  %v4998_v43 = vor.u32 %v6669_v36, %v4997_v33  ;;  %v6633_v45 = vld [vmem:[%s10425_s1 + $0x42c] sm:$0xf0]  ;;  %3236 = vmatpush.bf16.msrb.mxu3 %v5270_v35 }
  0x3b   :  { %v5253_v39 = vld [vmem:[%s10425_s1 + $0x740] sm:$0xf]  ;;  %v5126_v44 = vor.u32 %v6701_v38, %v5125_v37  ;;  %v6665_v47 = vld [vmem:[%s10425_s1 + $0x52c] sm:$0xf0] }
  0x3c   :  { %v4853_v42 = vld [vmem:[%s10425_s1 + $0x420] sm:$0xf]  ;;  %v5254_v48 = vor.u32 %v6733_v40, %v5253_v39  ;;  %v6697_v50 = vld [vmem:[%s10425_s1 + $0x62c] sm:$0xf0]  ;;  %3211 = vmatpush.bf16.msrb.mxu1 %v4998_v43 }
  0x3d   :  { %v4981_v46 = vld [vmem:[%s10425_s1 + $0x520] sm:$0xf]  ;;  %v6729_v52 = vld [vmem:[%s10425_s1 + $0x72c] sm:$0xf0]  ;;  %v4854_v55 = vor.u32 %v6633_v45, %v4853_v42  ;;  %3224 = vmatpush.bf16.msrb.mxu2 %v5126_v44 }
  0x3e   :  { %v5109_v49 = vld [vmem:[%s10425_s1 + $0x620] sm:$0xf]  ;;  %v6629_v54 = vld [vmem:[%s10425_s1 + $0x40c] sm:$0xf0]  ;;  %v4982_v62 = vor.u32 %v6665_v47, %v4981_v46  ;;  %3237 = vmatpush.bf16.msrb.mxu3 %v5254_v48 }
  0x3f   :  { %v5237_v51 = vld [vmem:[%s10425_s1 + $0x720] sm:$0xf]  ;;  %v6661_v57 = vld [vmem:[%s10425_s1 + $0x50c] sm:$0xf0]  ;;  %v5110_v63 = vor.u32 %v6697_v50, %v5109_v49  ;;  %3199 = vmatpush.bf16.msrb.mxu0 %v4854_v55 }
  0x40   :  { %v4837_v53 = vld [vmem:[%s10425_s1 + $0x400] sm:$0xf]  ;;  %v6693_v59 = vld [vmem:[%s10425_s1 + $0x60c] sm:$0xf0]  ;;  %v5238_v3 = vor.u32 %v6729_v52, %v5237_v51  ;;  %3212 = vmatpush.bf16.msrb.mxu1 %v4982_v62 }
  0x41   :  { %v4965_v56 = vld [vmem:[%s10425_s1 + $0x500] sm:$0xf]  ;;  %v7534_v2 = vld [vmem:[#allocation1 + $0x2d] sm:$0xff]  ;;  %v4838_v9 = vor.u32 %v6629_v54, %v4837_v53  ;;  %3225 = vmatpush.bf16.msrb.mxu2 %v5110_v63 }
  0x42   :  { %v5093_v58 = vld [vmem:[%s10425_s1 + $0x600] sm:$0xf]  ;;  %v6725_v5 = vld [vmem:[%s10425_s1 + $0x70c] sm:$0xf0]  ;;  %v4966_v13 = vor.u32 %v6661_v57, %v4965_v56  ;;  %3238 = vmatpush.bf16.msrb.mxu3 %v5238_v3 }
  0x43   :  { %v7532_v1 = vld [vmem:[#allocation1 + $0x3f] sm:$0xff]  ;;  %v6785_v7 = vld [vmem:[%s10425_s1 + $0x8ec] sm:$0xf0]  ;;  %v5094_v14 = vor.u32 %v6693_v59, %v5093_v58  ;;  %3200 = vmatpush.bf16.msrb.mxu0 %v4838_v9 }
  0x44   :  { %v5221_v4 = vld [vmem:[%s10425_s1 + $0x700] sm:$0xf]  ;;  %556 = vst [vmem:[#allocation1] ss:$9 sm:$0xff] %v22_v61  ;;  %v6817_v10 = vld [vmem:[%s10425_s1 + $0x9ec] sm:$0xf0]  ;;  %3213 = vmatpush.bf16.msrb.mxu1 %v4966_v13 }
  0x45   :  { %v5461_v6 = vld [vmem:[%s10425_s1 + $0x8e0] sm:$0xf]  ;;  %v6849_v12 = vld [vmem:[%s10425_s1 + $0xaec] sm:$0xf0]  ;;  %v5222_v17 = vor.u32 %v6725_v5, %v5221_v4  ;;  %3226 = vmatpush.bf16.msrb.mxu2 %v5094_v14 }
  0x46   :  { %v5589_v8 = vld [vmem:[%s10425_s1 + $0x9e0] sm:$0xf]  ;;  %v6881_v16 = vld [vmem:[%s10425_s1 + $0xbec] sm:$0xf0]  ;;  %v5462_v18 = vor.u32 %v6785_v7, %v5461_v6 }
  0x47   :  { %v5717_v11 = vld [vmem:[%s10425_s1 + $0xae0] sm:$0xf]  ;;  %v5590_v19 = vor.u32 %v6817_v10, %v5589_v8  ;;  %v6781_v22 = vld [vmem:[%s10425_s1 + $0x8cc] sm:$0xf0]  ;;  %3239 = vmatpush.bf16.msrb.mxu3 %v5222_v17  ;;  %3214 = vmatmul.bf16.vlgmr.msrb.gmra.mxu1 %v7534_v2 }
  0x48   :  { %v5845_v15 = vld [vmem:[%s10425_s1 + $0xbe0] sm:$0xf]  ;;  %v5718_v20 = vor.u32 %v6849_v12, %v5717_v11  ;;  %v6813_v25 = vld [vmem:[%s10425_s1 + $0x9cc] sm:$0xf0]  ;;  %3245 = vmatpush.bf16.msra.mxu0 %v5462_v18  ;;  %3227 = vmatmul.bf16.vlgmr.msrb.gmra.mxu2 %v7525_v60 }
  0x49   :  { %v5445_v21 = vld [vmem:[%s10425_s1 + $0x8c0] sm:$0xf]  ;;  %v5846_v24 = vor.u32 %v6881_v16, %v5845_v15  ;;  %v6845_v30 = vld [vmem:[%s10425_s1 + $0xacc] sm:$0xf0]  ;;  %3258 = vmatpush.bf16.msra.mxu1 %v5590_v19  ;;  %3201 = vmatmul.bf16.vlgmr.msrb.gmra.mxu0 %v7530_v0 }
  0x4a   :  { %v5573_v23 = vld [vmem:[%s10425_s1 + $0x9c0] sm:$0xf]  ;;  %v6877_v32 = vld [vmem:[%s10425_s1 + $0xbcc] sm:$0xf0]  ;;  %v5446_v33 = vor.u32 %v6781_v22, %v5445_v21  ;;  %3271 = vmatpush.bf16.msra.mxu2 %v5718_v20  ;;  %3240 = vmatmul.bf16.vlgmr.msrb.gmra.mxu3 %v7532_v1 }
  0x4b   :  { %v5701_v26 = vld [vmem:[%s10425_s1 + $0xac0] sm:$0xf]  ;;  %v5574_v35 = vor.u32 %v6813_v25, %v5573_v23  ;;  %v6777_v38 = vld [vmem:[%s10425_s1 + $0x8ac] sm:$0xf0]  ;;  %3284 = vmatpush.bf16.msra.mxu3 %v5846_v24 }
  0x4c   :  { %v5829_v31 = vld [vmem:[%s10425_s1 + $0xbc0] sm:$0xf]  ;;  %v5702_v36 = vor.u32 %v6845_v30, %v5701_v26  ;;  %v6809_v41 = vld [vmem:[%s10425_s1 + $0x9ac] sm:$0xf0]  ;;  %3246 = vmatpush.bf16.msra.mxu0 %v5446_v33 }
  0x4d   :  { %v5429_v37 = vld [vmem:[%s10425_s1 + $0x8a0] sm:$0xf]  ;;  %v5830_v40 = vor.u32 %v6877_v32, %v5829_v31  ;;  %v6841_v43 = vld [vmem:[%s10425_s1 + $0xaac] sm:$0xf0]  ;;  %3259 = vmatpush.bf16.msra.mxu1 %v5574_v35 }
  0x4e   :  { %v5557_v39 = vld [vmem:[%s10425_s1 + $0x9a0] sm:$0xf]  ;;  %v6873_v45 = vld [vmem:[%s10425_s1 + $0xbac] sm:$0xf0]  ;;  %v5430_v46 = vor.u32 %v6777_v38, %v5429_v37  ;;  %3272 = vmatpush.bf16.msra.mxu2 %v5702_v36 }
  0x4f   :  { %v5685_v42 = vld [vmem:[%s10425_s1 + $0xaa0] sm:$0xf]  ;;  %v5558_v47 = vor.u32 %v6809_v41, %v5557_v39  ;;  %v6773_v50 = vld [vmem:[%s10425_s1 + $0x88c] sm:$0xf0]  ;;  %3285 = vmatpush.bf16.msra.mxu3 %v5830_v40 }
  0x50   :  { %v5813_v44 = vld [vmem:[%s10425_s1 + $0xba0] sm:$0xf]  ;;  %v5686_v48 = vor.u32 %v6841_v43, %v5685_v42  ;;  %v6805_v53 = vld [vmem:[%s10425_s1 + $0x98c] sm:$0xf0]  ;;  %3247 = vmatpush.bf16.msra.mxu0 %v5430_v46 }
  0x51   :  { %v5413_v49 = vld [vmem:[%s10425_s1 + $0x880] sm:$0xf]  ;;  %v5814_v52 = vor.u32 %v6873_v45, %v5813_v44  ;;  %v6837_v55 = vld [vmem:[%s10425_s1 + $0xa8c] sm:$0xf0]  ;;  %3260 = vmatpush.bf16.msra.mxu1 %v5558_v47 }
  0x52   :  { %v5541_v51 = vld [vmem:[%s10425_s1 + $0x980] sm:$0xf]  ;;  %v6869_v57 = vld [vmem:[%s10425_s1 + $0xb8c] sm:$0xf0]  ;;  %v5414_v58 = vor.u32 %v6773_v50, %v5413_v49  ;;  %3273 = vmatpush.bf16.msra.mxu2 %v5686_v48 }
  0x53   :  { %v5669_v54 = vld [vmem:[%s10425_s1 + $0xa80] sm:$0xf]  ;;  %v5542_v59 = vor.u32 %v6805_v53, %v5541_v51  ;;  %v6769_v63 = vld [vmem:[%s10425_s1 + $0x86c] sm:$0xf0]  ;;  %3286 = vmatpush.bf16.msra.mxu3 %v5814_v52 }
  0x54   :  { %v5797_v56 = vld [vmem:[%s10425_s1 + $0xb80] sm:$0xf]  ;;  %v5670_v61 = vor.u32 %v6837_v55, %v5669_v54  ;;  %v6801_v5 = vld [vmem:[%s10425_s1 + $0x96c] sm:$0xf0]  ;;  %3248 = vmatpush.bf16.msra.mxu0 %v5414_v58 }
  0x55   :  { %v5397_v62 = vld [vmem:[%s10425_s1 + $0x860] sm:$0xf]  ;;  %v5798_v4 = vor.u32 %v6869_v57, %v5797_v56  ;;  %v6833_v7 = vld [vmem:[%s10425_s1 + $0xa6c] sm:$0xf0]  ;;  %3261 = vmatpush.bf16.msra.mxu1 %v5542_v59 }
  0x56   :  { %v5525_v3 = vld [vmem:[%s10425_s1 + $0x960] sm:$0xf]  ;;  %v6865_v9 = vld [vmem:[%s10425_s1 + $0xb6c] sm:$0xf0]  ;;  %v5398_v10 = vor.u32 %v6769_v63, %v5397_v62  ;;  %3274 = vmatpush.bf16.msra.mxu2 %v5670_v61 }
  0x57   :  { %v5653_v6 = vld [vmem:[%s10425_s1 + $0xa60] sm:$0xf]  ;;  %v5526_v11 = vor.u32 %v6801_v5, %v5525_v3  ;;  %v6765_v14 = vld [vmem:[%s10425_s1 + $0x84c] sm:$0xf0]  ;;  %3287 = vmatpush.bf16.msra.mxu3 %v5798_v4 }
  0x58   :  { %v5781_v8 = vld [vmem:[%s10425_s1 + $0xb60] sm:$0xf]  ;;  %v5654_v12 = vor.u32 %v6833_v7, %v5653_v6  ;;  %v6797_v17 = vld [vmem:[%s10425_s1 + $0x94c] sm:$0xf0]  ;;  %3249 = vmatpush.bf16.msra.mxu0 %v5398_v10 }
  0x59   :  { %v5381_v13 = vld [vmem:[%s10425_s1 + $0x840] sm:$0xf]  ;;  %v5782_v16 = vor.u32 %v6865_v9, %v5781_v8  ;;  %v6829_v19 = vld [vmem:[%s10425_s1 + $0xa4c] sm:$0xf0]  ;;  %3262 = vmatpush.bf16.msra.mxu1 %v5526_v11 }
  0x5a   :  { %v5509_v15 = vld [vmem:[%s10425_s1 + $0x940] sm:$0xf]  ;;  %v6861_v21 = vld [vmem:[%s10425_s1 + $0xb4c] sm:$0xf0]  ;;  %v5382_v22 = vor.u32 %v6765_v14, %v5381_v13  ;;  %3275 = vmatpush.bf16.msra.mxu2 %v5654_v12 }
  0x5b   :  { %v5637_v18 = vld [vmem:[%s10425_s1 + $0xa40] sm:$0xf]  ;;  %v5510_v23 = vor.u32 %v6797_v17, %v5509_v15  ;;  %v6761_v26 = vld [vmem:[%s10425_s1 + $0x82c] sm:$0xf0]  ;;  %3288 = vmatpush.bf16.msra.mxu3 %v5782_v16 }
  0x5c   :  { %v5765_v20 = vld [vmem:[%s10425_s1 + $0xb40] sm:$0xf]  ;;  %v5638_v24 = vor.u32 %v6829_v19, %v5637_v18  ;;  %v6793_v32 = vld [vmem:[%s10425_s1 + $0x92c] sm:$0xf0]  ;;  %3250 = vmatpush.bf16.msra.mxu0 %v5382_v22 }
  0x5d   :  { %v5365_v25 = vld [vmem:[%s10425_s1 + $0x820] sm:$0xf]  ;;  %v5766_v31 = vor.u32 %v6861_v21, %v5765_v20  ;;  %v6825_v35 = vld [vmem:[%s10425_s1 + $0xa2c] sm:$0xf0]  ;;  %3263 = vmatpush.bf16.msra.mxu1 %v5510_v23 }
  0x5e   :  { %v5493_v30 = vld [vmem:[%s10425_s1 + $0x920] sm:$0xf]  ;;  %v6857_v37 = vld [vmem:[%s10425_s1 + $0xb2c] sm:$0xf0]  ;;  %v5366_v38 = vor.u32 %v6761_v26, %v5365_v25  ;;  %3276 = vmatpush.bf16.msra.mxu2 %v5638_v24 }
  0x5f   :  { %v5621_v33 = vld [vmem:[%s10425_s1 + $0xa20] sm:$0xf]  ;;  %v6757_v40 = vld [vmem:[%s10425_s1 + $0x80c] sm:$0xf0]  ;;  %v5494_v41 = vor.u32 %v6793_v32, %v5493_v30  ;;  %3289 = vmatpush.bf16.msra.mxu3 %v5766_v31 }
  0x60   :  { %v5749_v36 = vld [vmem:[%s10425_s1 + $0xb20] sm:$0xf]  ;;  %v5622_v42 = vor.u32 %v6825_v35, %v5621_v33  ;;  %v6789_v44 = vld [vmem:[%s10425_s1 + $0x90c] sm:$0xf0]  ;;  %3251 = vmatpush.bf16.msra.mxu0 %v5366_v38 }
  0x61   :  { %v5349_v39 = vld [vmem:[%s10425_s1 + $0x800] sm:$0xf]  ;;  %v5750_v46 = vor.u32 %v6857_v37, %v5749_v36  ;;  %v6821_v47 = vld [vmem:[%s10425_s1 + $0xa0c] sm:$0xf0]  ;;  %3264 = vmatpush.bf16.msra.mxu1 %v5494_v41 }
  0x62   :  { %v5477_v43 = vld [vmem:[%s10425_s1 + $0x900] sm:$0xf]  ;;  %v6853_v49 = vld [vmem:[%s10425_s1 + $0xb0c] sm:$0xf0]  ;;  %v5350_v53 = vor.u32 %v6757_v40, %v5349_v39  ;;  %3277 = vmatpush.bf16.msra.mxu2 %v5622_v42 }
  0x63   :  { %v5605_v45 = vld [vmem:[%s10425_s1 + $0xa00] sm:$0xf]  ;;  %v6913_v51 = vld [vmem:[%s10425_s1 + $0xcec] sm:$0xf0]  ;;  %v5478_v57 = vor.u32 %v6789_v44, %v5477_v43  ;;  %3290 = vmatpush.bf16.msra.mxu3 %v5750_v46 }
  0x64   :  { %v5733_v48 = vld [vmem:[%s10425_s1 + $0xb00] sm:$0xf]  ;;  %v6945_v54 = vld [vmem:[%s10425_s1 + $0xdec] sm:$0xf0]  ;;  %v5606_v58 = vor.u32 %v6821_v47, %v5605_v45  ;;  %3252 = vmatpush.bf16.msra.mxu0 %v5350_v53 }
  0x65   :  { %v5973_v50 = vld [vmem:[%s10425_s1 + $0xce0] sm:$0xf]  ;;  %v6977_v56 = vld [vmem:[%s10425_s1 + $0xeec] sm:$0xf0]  ;;  %v5734_v62 = vor.u32 %v6853_v49, %v5733_v48  ;;  %3265 = vmatpush.bf16.msra.mxu1 %v5478_v57 }
  0x66   :  { %v6101_v52 = vld [vmem:[%s10425_s1 + $0xde0] sm:$0xf]  ;;  %v7009_v61 = vld [vmem:[%s10425_s1 + $0xfec] sm:$0xf0]  ;;  %v5974_v63 = vor.u32 %v6913_v51, %v5973_v50  ;;  %3278 = vmatpush.bf16.msra.mxu2 %v5606_v58 }
  0x67   :  { %v6229_v55 = vld [vmem:[%s10425_s1 + $0xee0] sm:$0xf]  ;;  %v6102_v3 = vor.u32 %v6945_v54, %v6101_v52  ;;  %v6909_v6 = vld [vmem:[%s10425_s1 + $0xccc] sm:$0xf0]  ;;  %3291 = vmatpush.bf16.msra.mxu3 %v5734_v62 }
  0x68   :  { %v6357_v59 = vld [vmem:[%s10425_s1 + $0xfe0] sm:$0xf]  ;;  %v6230_v4 = vor.u32 %v6977_v56, %v6229_v55  ;;  %v6941_v9 = vld [vmem:[%s10425_s1 + $0xdcc] sm:$0xf0]  ;;  %3297 = vmatpush.bf16.msrb.mxu0 %v5974_v63 }
  0x69   :  { %v5957_v5 = vld [vmem:[%s10425_s1 + $0xcc0] sm:$0xf]  ;;  %v6358_v8 = vor.u32 %v7009_v61, %v6357_v59  ;;  %v6973_v11 = vld [vmem:[%s10425_s1 + $0xecc] sm:$0xf0]  ;;  %3310 = vmatpush.bf16.msrb.mxu1 %v6102_v3 }
  0x6a   :  { %v6085_v7 = vld [vmem:[%s10425_s1 + $0xdc0] sm:$0xf]  ;;  %v7005_v14 = vld [vmem:[%s10425_s1 + $0xfcc] sm:$0xf0]  ;;  %v5958_v18 = vor.u32 %v6909_v6, %v5957_v5  ;;  %3323 = vmatpush.bf16.msrb.mxu2 %v6230_v4 }
  0x6b   :  { %v6213_v10 = vld [vmem:[%s10425_s1 + $0xec0] sm:$0xf]  ;;  %v559_v15 = vld [vmem:[#allocation1 + $0x12] sm:$0xff]  ;;  %v558_v16 = vld [vmem:[#allocation1 + $0x9] sm:$0xff]  ;;  %v6086_v19 = vor.u32 %v6941_v9, %v6085_v7  ;;  %3336 = vmatpush.bf16.msrb.mxu3 %v6358_v8 }
  0x6c   :  { %v557_v12 = vld [vmem:[#allocation1] sm:$0xff]  ;;  %v6214_v20 = vor.u32 %v6973_v11, %v6213_v10  ;;  %v6905_v22 = vld [vmem:[%s10425_s1 + $0xcac] sm:$0xf0]  ;;  %3279 = vmatmul.bf16.vlgmr.msra.gmra.mxu2 %v559_v15  ;;  %3266 = vmatmul.bf16.vlgmr.msra.gmra.mxu1 %v558_v16 }
  0x6d   :  { %v6341_v13 = vld [vmem:[%s10425_s1 + $0xfc0] sm:$0xf]  ;;  %3253 = vmatmul.bf16.vlgmr.msra.gmra.mxu0 %v557_v12  ;;  %v6937_v25 = vld [vmem:[%s10425_s1 + $0xdac] sm:$0xf0]  ;;  %3311 = vmatpush.bf16.msrb.mxu1 %v6086_v19 }
  0x6e   :  { %v560_v17 = vld [vmem:[#allocation1 + $0x1b] sm:$0xff]  ;;  %v6342_v24 = vor.u32 %v7005_v14, %v6341_v13  ;;  %v6969_v30 = vld [vmem:[%s10425_s1 + $0xeac] sm:$0xf0]  ;;  %3298 = vmatpush.bf16.msrb.mxu0 %v5958_v18  ;;  %3324 = vmatpush.bf16.msrb.mxu2 %v6214_v20 }
  0x6f   :  { %v5941_v21 = vld [vmem:[%s10425_s1 + $0xca0] sm:$0xf]  ;;  %v7001_v32 = vld [vmem:[%s10425_s1 + $0xfac] sm:$0xf0]  ;;  %3292 = vmatmul.bf16.vlgmr.msra.gmra.mxu3 %v560_v17 }
  0x70   :  { %v6069_v23 = vld [vmem:[%s10425_s1 + $0xda0] sm:$0xf]  ;;  %v5942_v33 = vor.u32 %v6905_v22, %v5941_v21  ;;  %v6901_v38 = vld [vmem:[%s10425_s1 + $0xc8c] sm:$0xf0]  ;;  %3337 = vmatpush.bf16.msrb.mxu3 %v6342_v24 }
  0x71   :  { %v6197_v26 = vld [vmem:[%s10425_s1 + $0xea0] sm:$0xf]  ;;  %v6070_v36 = vor.u32 %v6937_v25, %v6069_v23  ;;  %v6933_v40 = vld [vmem:[%s10425_s1 + $0xd8c] sm:$0xf0] }
  0x72   :  { %v6325_v31 = vld [vmem:[%s10425_s1 + $0xfa0] sm:$0xf]  ;;  %v6198_v37 = vor.u32 %v6969_v30, %v6197_v26  ;;  %v6965_v43 = vld [vmem:[%s10425_s1 + $0xe8c] sm:$0xf0] }
  0x73   :  { %v5925_v35 = vld [vmem:[%s10425_s1 + $0xc80] sm:$0xf]  ;;  %v6326_v41 = vor.u32 %v7001_v32, %v6325_v31  ;;  %v6997_v45 = vld [vmem:[%s10425_s1 + $0xf8c] sm:$0xf0] }
  0x74   :  { %v6053_v39 = vld [vmem:[%s10425_s1 + $0xd80] sm:$0xf] }
  0x75   :  { %v6181_v42 = vld [vmem:[%s10425_s1 + $0xe80] sm:$0xf] }
  0x76   :  { %v6309_v44 = vld [vmem:[%s10425_s1 + $0xf80] sm:$0xf] }
  0x77   :  { %10 = vsyncpa [#allocation3], 0  ;;  %3299 = vmatpush.bf16.msrb.mxu0 %v5942_v33  ;;  %v5926_v46 = vor.u32 %v6901_v38, %v5925_v35  ;;  %3312 = vmatpush.bf16.msrb.mxu1 %v6070_v36  ;;  %v6054_v47 = vor.u32 %v6933_v40, %v6053_v39  ;;  %v6182_v48 = vor.u32 %v6965_v43, %v6181_v42  ;;  %v5909_v49 = vld [vmem:[%s10425_s1 + $0xc60] sm:$0xf]  ;;  %v6897_v50 = vld [vmem:[%s10425_s1 + $0xc6c] sm:$0xf0] }
  0x78   :  { %3325 = vmatpush.bf16.msrb.mxu2 %v6198_v37  ;;  %v6037_v51 = vld [vmem:[%s10425_s1 + $0xd60] sm:$0xf]  ;;  %3338 = vmatpush.bf16.msrb.mxu3 %v6326_v41  ;;  %v6310_v52 = vor.u32 %v6997_v45, %v6309_v44  ;;  %v6929_v53 = vld [vmem:[%s10425_s1 + $0xd6c] sm:$0xf0]  ;;  %v5910_v58 = vor.u32 %v6897_v50, %v5909_v49  ;;  %v6527_v38 = vld [vmem:[%s10425_s1 + $0xe4] sm:$0xf] }
  0x79   :  { %v6165_v54 = vld [vmem:[%s10425_s1 + $0xe60] sm:$0xf]  ;;  %v6961_v55 = vld [vmem:[%s10425_s1 + $0xe6c] sm:$0xf0]  ;;  %v6038_v59 = vor.u32 %v6929_v53, %v6037_v51  ;;  %v4439_v39 = vld [vmem:[%s10425_s1 + $0xf0] sm:$0xf0] }
  0x7a   :  { %v6293_v56 = vld [vmem:[%s10425_s1 + $0xf60] sm:$0xf]  ;;  %v6993_v57 = vld [vmem:[%s10425_s1 + $0xf6c] sm:$0xf0]  ;;  %v6166_v61 = vor.u32 %v6961_v55, %v6165_v54  ;;  %v6559_v40 = vld [vmem:[%s10425_s1 + $0x1e4] sm:$0xf]  ;;  %v4442_v50 = vor.u32 %v6527_v38, %v4439_v39 }
  0x7b   :  { %3300 = vmatpush.bf16.msrb.mxu0 %v5926_v46  ;;  %3313 = vmatpush.bf16.msrb.mxu1 %v6054_v47  ;;  %v5893_v62 = vld [vmem:[%s10425_s1 + $0xc40] sm:$0xf]  ;;  %v6893_v63 = vld [vmem:[%s10425_s1 + $0xc4c] sm:$0xf0]  ;;  %v6294_v4 = vor.u32 %v6993_v57, %v6293_v56  ;;  %v4567_v42 = vld [vmem:[%s10425_s1 + $0x1f0] sm:$0xf0] }
  0x7c   :  { %3326 = vmatpush.bf16.msrb.mxu2 %v6182_v48  ;;  %v6021_v3 = vld [vmem:[%s10425_s1 + $0xd40] sm:$0xf]  ;;  %3339 = vmatpush.bf16.msrb.mxu3 %v6310_v52  ;;  %v6925_v5 = vld [vmem:[%s10425_s1 + $0xd4c] sm:$0xf0]  ;;  %v5894_v10 = vor.u32 %v6893_v63, %v5893_v62  ;;  %v6591_v43 = vld [vmem:[%s10425_s1 + $0x2e4] sm:$0xf]  ;;  %v4570_v51 = vor.u32 %v6559_v40, %v4567_v42 }
  0x7d   :  { %v6149_v6 = vld [vmem:[%s10425_s1 + $0xe40] sm:$0xf]  ;;  %v6957_v7 = vld [vmem:[%s10425_s1 + $0xe4c] sm:$0xf0]  ;;  %v6022_v11 = vor.u32 %v6925_v5, %v6021_v3  ;;  %v4695_v44 = vld [vmem:[%s10425_s1 + $0x2f0] sm:$0xf0] }
  0x7e   :  { %v6277_v8 = vld [vmem:[%s10425_s1 + $0xf40] sm:$0xf]  ;;  %v6989_v9 = vld [vmem:[%s10425_s1 + $0xf4c] sm:$0xf0]  ;;  %v6150_v12 = vor.u32 %v6957_v7, %v6149_v6  ;;  %v6623_v47 = vld [vmem:[%s10425_s1 + $0x3e4] sm:$0xf]  ;;  %v4698_v52 = vor.u32 %v6591_v43, %v4695_v44 }
  0x7f   :  { %3301 = vmatpush.bf16.msrb.mxu0 %v5910_v58  ;;  %3314 = vmatpush.bf16.msrb.mxu1 %v6038_v59  ;;  %v5877_v13 = vld [vmem:[%s10425_s1 + $0xc20] sm:$0xf]  ;;  %v6889_v14 = vld [vmem:[%s10425_s1 + $0xc2c] sm:$0xf0]  ;;  %v6278_v16 = vor.u32 %v6989_v9, %v6277_v8  ;;  %v4823_v48 = vld [vmem:[%s10425_s1 + $0x3f0] sm:$0xf0] }
  0x80   :  { %3327 = vmatpush.bf16.msrb.mxu2 %v6166_v61  ;;  %v6005_v15 = vld [vmem:[%s10425_s1 + $0xd20] sm:$0xf]  ;;  %3340 = vmatpush.bf16.msrb.mxu3 %v6294_v4  ;;  %v6921_v17 = vld [vmem:[%s10425_s1 + $0xd2c] sm:$0xf0]  ;;  %v5878_v22 = vor.u32 %v6889_v14, %v5877_v13  ;;  %v6523_v53 = vld [vmem:[%s10425_s1 + $0xc4] sm:$0xf]  ;;  %v4826_v56 = vor.u32 %v6623_v47, %v4823_v48 }
  0x81   :  { %v6133_v18 = vld [vmem:[%s10425_s1 + $0xe20] sm:$0xf]  ;;  %v6953_v19 = vld [vmem:[%s10425_s1 + $0xe2c] sm:$0xf0]  ;;  %v6006_v25 = vor.u32 %v6921_v17, %v6005_v15  ;;  %v4423_v54 = vld [vmem:[%s10425_s1 + $0xd0] sm:$0xf0] }
  0x82   :  { %v6261_v20 = vld [vmem:[%s10425_s1 + $0xf20] sm:$0xf]  ;;  %v6985_v21 = vld [vmem:[%s10425_s1 + $0xf2c] sm:$0xf0]  ;;  %v6134_v26 = vor.u32 %v6953_v19, %v6133_v18  ;;  %v6555_v55 = vld [vmem:[%s10425_s1 + $0x1c4] sm:$0xf]  ;;  %v4426_v6 = vor.u32 %v6523_v53, %v4423_v54 }
  0x83   :  { %3302 = vmatpush.bf16.msrb.mxu0 %v5894_v10  ;;  %v5861_v23 = vld [vmem:[%s10425_s1 + $0xc00] sm:$0xf]  ;;  %v6885_v24 = vld [vmem:[%s10425_s1 + $0xc0c] sm:$0xf0]  ;;  %3315 = vmatpush.bf16.msrb.mxu1 %v6022_v11  ;;  %v6262_v33 = vor.u32 %v6985_v21, %v6261_v20  ;;  %v4551_v57 = vld [vmem:[%s10425_s1 + $0x1d0] sm:$0xf0] }
  0x84   :  { %3328 = vmatpush.bf16.msrb.mxu2 %v6150_v12  ;;  %v5989_v30 = vld [vmem:[%s10425_s1 + $0xd00] sm:$0xf]  ;;  %v6917_v31 = vld [vmem:[%s10425_s1 + $0xd0c] sm:$0xf0]  ;;  %3341 = vmatpush.bf16.msrb.mxu3 %v6278_v16  ;;  %v5862_v41 = vor.u32 %v6885_v24, %v5861_v23  ;;  %v6587_v58 = vld [vmem:[%s10425_s1 + $0x2c4] sm:$0xf]  ;;  %v4554_v7 = vor.u32 %v6555_v55, %v4551_v57 }
  0x85   :  { %v6117_v32 = vld [vmem:[%s10425_s1 + $0xe00] sm:$0xf]  ;;  %v6949_v35 = vld [vmem:[%s10425_s1 + $0xe0c] sm:$0xf0]  ;;  %v5990_v45 = vor.u32 %v6917_v31, %v5989_v30  ;;  %v4679_v59 = vld [vmem:[%s10425_s1 + $0x2d0] sm:$0xf0] }
  0x86   :  { %v6245_v36 = vld [vmem:[%s10425_s1 + $0xf00] sm:$0xf]  ;;  %v6981_v37 = vld [vmem:[%s10425_s1 + $0xf0c] sm:$0xf0]  ;;  %v6118_v46 = vor.u32 %v6949_v35, %v6117_v32  ;;  %v561_v61 = vld [vmem:[#allocation1 + $0x24] sm:$0xff]  ;;  %v4682_v8 = vor.u32 %v6587_v58, %v4679_v59  ;;  %vm4293_vm0 = vcmask 74752  }
  0x87   :  { %3303 = vmatpush.bf16.msrb.mxu0 %v5878_v22  ;;  %3316 = vmatpush.bf16.msrb.mxu1 %v6006_v25  ;;  %v6246_v49 = vor.u32 %v6981_v37, %v6245_v36  ;;  %v6619_v62 = vld [vmem:[%s10425_s1 + $0x3c4] sm:$0xf]  ;;  %v4807_v63 = vld [vmem:[%s10425_s1 + $0x3d0] sm:$0xf0]  ;;  %s4314_s29 = sshll.u32 %s10429_s5, 4  ;;  %s4315_s29 = int_to_ptr.hbm [resolvable:$true] %s4314_s29 }
  0x88   :  { %3329 = vmatpush.bf16.msrb.mxu2 %v6134_v26  ;;  %3342 = vmatpush.bf16.msrb.mxu3 %v6262_v33  ;;  %v563_v3 = vld [vmem:[#allocation1 + $0x36] sm:$0xff]  ;;  %v562_v4 = vld [vmem:[#allocation1 + $0x2d] sm:$0xff]  ;;  %v564_v5 = vld [vmem:[#allocation1 + $0x3f] sm:$0xff]  ;;  %v4810_v12 = vor.u32 %v6619_v62, %v4807_v63 }
  0x89   :  { %v6519_v9 = vld [vmem:[%s10425_s1 + $0xa4] sm:$0xf]  ;;  %v4407_v10 = vld [vmem:[%s10425_s1 + $0xb0] sm:$0xf0] }
  0x8a   :  { %v6551_v11 = vld [vmem:[%s10425_s1 + $0x1a4] sm:$0xf]  ;;  %v4535_v13 = vld [vmem:[%s10425_s1 + $0x1b0] sm:$0xf0]  ;;  %v4410_v18 = vor.u32 %v6519_v9, %v4407_v10 }
  0x8b   :  { %3304 = vmatpush.bf16.msrb.mxu0 %v5862_v41  ;;  %3317 = vmatpush.bf16.msrb.mxu1 %v5990_v45  ;;  %v6583_v14 = vld [vmem:[%s10425_s1 + $0x2a4] sm:$0xf]  ;;  %v4663_v15 = vld [vmem:[%s10425_s1 + $0x2b0] sm:$0xf0]  ;;  %v4538_v19 = vor.u32 %v6551_v11, %v4535_v13 }
  0x8c   :  { %3330 = vmatpush.bf16.msrb.mxu2 %v6118_v46  ;;  %3343 = vmatpush.bf16.msrb.mxu3 %v6246_v49  ;;  %v6615_v16 = vld [vmem:[%s10425_s1 + $0x3a4] sm:$0xf]  ;;  %v4791_v17 = vld [vmem:[%s10425_s1 + $0x3b0] sm:$0xf0]  ;;  %v4666_v20 = vor.u32 %v6583_v14, %v4663_v15 }
  0x8d   :  { %v6515_v21 = vld [vmem:[%s10425_s1 + $0x84] sm:$0xf]  ;;  %v4391_v22 = vld [vmem:[%s10425_s1 + $0x90] sm:$0xf0]  ;;  %v4794_v24 = vor.u32 %v6615_v16, %v4791_v17 }
  0x8e   :  { %3305 = vmatmul.bf16.vlgmr.msrb.gmra.mxu0 %v561_v61  ;;  %3318 = vmatmul.bf16.vlgmr.msrb.gmra.mxu1 %v562_v4  ;;  %v6547_v23 = vld [vmem:[%s10425_s1 + $0x184] sm:$0xf]  ;;  %v4519_v25 = vld [vmem:[%s10425_s1 + $0x190] sm:$0xf0]  ;;  %v4394_v33 = vor.u32 %v6515_v21, %v4391_v22 }
  0x8f   :  { %3349 = vmatpush.bf16.msra.mxu0 %v4442_v50  ;;  %3362 = vmatpush.bf16.msra.mxu1 %v4570_v51  ;;  %v6579_v26 = vld [vmem:[%s10425_s1 + $0x284] sm:$0xf]  ;;  %v4647_v30 = vld [vmem:[%s10425_s1 + $0x290] sm:$0xf0]  ;;  %v4522_v35 = vor.u32 %v6547_v23, %v4519_v25 }
  0x90   :  { %3375 = vmatpush.bf16.msra.mxu2 %v4698_v52  ;;  %3388 = vmatpush.bf16.msra.mxu3 %v4826_v56  ;;  %v6611_v31 = vld [vmem:[%s10425_s1 + $0x384] sm:$0xf]  ;;  %v4775_v32 = vld [vmem:[%s10425_s1 + $0x390] sm:$0xf0]  ;;  %v4650_v36 = vor.u32 %v6579_v26, %v4647_v30 }
  0x91   :  { %3331 = vmatmul.bf16.vlgmr.msrb.gmra.mxu2 %v563_v3  ;;  %3344 = vmatmul.bf16.vlgmr.msrb.gmra.mxu3 %v564_v5  ;;  %v6511_v37 = vld [vmem:[%s10425_s1 + $0x64] sm:$0xf]  ;;  %v4375_v38 = vld [vmem:[%s10425_s1 + $0x70] sm:$0xf0]  ;;  %v4778_v40 = vor.u32 %v6611_v31, %v4775_v32 }
  0x92   :  { %v6543_v39 = vld [vmem:[%s10425_s1 + $0x164] sm:$0xf]  ;;  %v4503_v41 = vld [vmem:[%s10425_s1 + $0x170] sm:$0xf0]  ;;  %v4378_v46 = vor.u32 %v6511_v37, %v4375_v38 }
  0x93   :  { %3350 = vmatpush.bf16.msra.mxu0 %v4426_v6  ;;  %3363 = vmatpush.bf16.msra.mxu1 %v4554_v7  ;;  %v6575_v42 = vld [vmem:[%s10425_s1 + $0x264] sm:$0xf]  ;;  %v4631_v43 = vld [vmem:[%s10425_s1 + $0x270] sm:$0xf0]  ;;  %v4506_v47 = vor.u32 %v6543_v39, %v4503_v41 }
  0x94   :  { %3376 = vmatpush.bf16.msra.mxu2 %v4682_v8  ;;  %3389 = vmatpush.bf16.msra.mxu3 %v4810_v12  ;;  %v6607_v44 = vld [vmem:[%s10425_s1 + $0x364] sm:$0xf]  ;;  %v4759_v45 = vld [vmem:[%s10425_s1 + $0x370] sm:$0xf0]  ;;  %v4634_v48 = vor.u32 %v6575_v42, %v4631_v43 }
  0x95   :  { %v6507_v49 = vld [vmem:[%s10425_s1 + $0x44] sm:$0xf]  ;;  %v4359_v50 = vld [vmem:[%s10425_s1 + $0x50] sm:$0xf0]  ;;  %v4762_v52 = vor.u32 %v6607_v44, %v4759_v45 }
  0x96   :  { %v6539_v51 = vld [vmem:[%s10425_s1 + $0x144] sm:$0xf]  ;;  %v4487_v53 = vld [vmem:[%s10425_s1 + $0x150] sm:$0xf0]  ;;  %v4362_v58 = vor.u32 %v6507_v49, %v4359_v50 }
  0x97   :  { %3351 = vmatpush.bf16.msra.mxu0 %v4410_v18  ;;  %3364 = vmatpush.bf16.msra.mxu1 %v4538_v19  ;;  %v6571_v54 = vld [vmem:[%s10425_s1 + $0x244] sm:$0xf]  ;;  %v4615_v55 = vld [vmem:[%s10425_s1 + $0x250] sm:$0xf0]  ;;  %v4490_v59 = vor.u32 %v6539_v51, %v4487_v53 }
  0x98   :  { %3377 = vmatpush.bf16.msra.mxu2 %v4666_v20  ;;  %3390 = vmatpush.bf16.msra.mxu3 %v4794_v24  ;;  %v6603_v56 = vld [vmem:[%s10425_s1 + $0x344] sm:$0xf]  ;;  %v4743_v57 = vld [vmem:[%s10425_s1 + $0x350] sm:$0xf0]  ;;  %v4618_v61 = vor.u32 %v6571_v54, %v4615_v55 }
  0x99   :  { %v6503_v62 = vld [vmem:[%s10425_s1 + $0x24] sm:$0xf]  ;;  %v4343_v63 = vld [vmem:[%s10425_s1 + $0x30] sm:$0xf0]  ;;  %v4746_v4 = vor.u32 %v6603_v56, %v4743_v57 }
  0x9a   :  { %v6535_v3 = vld [vmem:[%s10425_s1 + $0x124] sm:$0xf]  ;;  %v4471_v5 = vld [vmem:[%s10425_s1 + $0x130] sm:$0xf0]  ;;  %v4346_v10 = vor.u32 %v6503_v62, %v4343_v63 }
  0x9b   :  { %3352 = vmatpush.bf16.msra.mxu0 %v4394_v33  ;;  %3365 = vmatpush.bf16.msra.mxu1 %v4522_v35  ;;  %v6567_v6 = vld [vmem:[%s10425_s1 + $0x224] sm:$0xf]  ;;  %v4599_v7 = vld [vmem:[%s10425_s1 + $0x230] sm:$0xf0]  ;;  %v4474_v13 = vor.u32 %v6535_v3, %v4471_v5 }
  0x9c   :  { %3378 = vmatpush.bf16.msra.mxu2 %v4650_v36  ;;  %3391 = vmatpush.bf16.msra.mxu3 %v4778_v40  ;;  %v6599_v8 = vld [vmem:[%s10425_s1 + $0x324] sm:$0xf]  ;;  %v4727_v9 = vld [vmem:[%s10425_s1 + $0x330] sm:$0xf0]  ;;  %v4602_v14 = vor.u32 %v6567_v6, %v4599_v7 }
  0x9d   :  { %v6499_v11 = vld [vmem:[%s10425_s1 + $0x4] sm:$0xf]  ;;  %v4327_v12 = vld [vmem:[%s10425_s1 + $0x10] sm:$0xf0]  ;;  %v4730_v18 = vor.u32 %v6599_v8, %v4727_v9 }
  0x9e   :  { %v6531_v15 = vld [vmem:[%s10425_s1 + $0x104] sm:$0xf]  ;;  %v4455_v16 = vld [vmem:[%s10425_s1 + $0x110] sm:$0xf0]  ;;  %v4330_v25 = vor.u32 %v6499_v11, %v4327_v12 }
  0x9f   :  { %3353 = vmatpush.bf16.msra.mxu0 %v4378_v46  ;;  %3366 = vmatpush.bf16.msra.mxu1 %v4506_v47  ;;  %v6563_v17 = vld [vmem:[%s10425_s1 + $0x204] sm:$0xf]  ;;  %v4583_v19 = vld [vmem:[%s10425_s1 + $0x210] sm:$0xf0]  ;;  %v4458_v32 = vor.u32 %v6531_v15, %v4455_v16 }
  0xa0   :  { %3379 = vmatpush.bf16.msra.mxu2 %v4634_v48  ;;  %3392 = vmatpush.bf16.msra.mxu3 %v4762_v52  ;;  %v6595_v20 = vld [vmem:[%s10425_s1 + $0x304] sm:$0xf]  ;;  %v4711_v21 = vld [vmem:[%s10425_s1 + $0x310] sm:$0xf0]  ;;  %v4586_v33 = vor.u32 %v6563_v17, %v4583_v19 }
  0xa1   :  { %v6655_v22 = vld [vmem:[%s10425_s1 + $0x4e4] sm:$0xf]  ;;  %v4951_v23 = vld [vmem:[%s10425_s1 + $0x4f0] sm:$0xf0]  ;;  %v4714_v37 = vor.u32 %v6595_v20, %v4711_v21 }
  0xa2   :  { %v6687_v24 = vld [vmem:[%s10425_s1 + $0x5e4] sm:$0xf]  ;;  %v5079_v26 = vld [vmem:[%s10425_s1 + $0x5f0] sm:$0xf0]  ;;  %v4954_v38 = vor.u32 %v6655_v22, %v4951_v23 }
  0xa3   :  { %3354 = vmatpush.bf16.msra.mxu0 %v4362_v58  ;;  %3367 = vmatpush.bf16.msra.mxu1 %v4490_v59  ;;  %v6719_v30 = vld [vmem:[%s10425_s1 + $0x6e4] sm:$0xf]  ;;  %v5207_v31 = vld [vmem:[%s10425_s1 + $0x6f0] sm:$0xf0]  ;;  %v5082_v39 = vor.u32 %v6687_v24, %v5079_v26 }
  0xa4   :  { %3380 = vmatpush.bf16.msra.mxu2 %v4618_v61  ;;  %3393 = vmatpush.bf16.msra.mxu3 %v4746_v4  ;;  %v6751_v35 = vld [vmem:[%s10425_s1 + $0x7e4] sm:$0xf]  ;;  %v5335_v36 = vld [vmem:[%s10425_s1 + $0x7f0] sm:$0xf0]  ;;  %v5210_v40 = vor.u32 %v6719_v30, %v5207_v31 }
  0xa5   :  { %v6651_v41 = vld [vmem:[%s10425_s1 + $0x4c4] sm:$0xf]  ;;  %v4935_v42 = vld [vmem:[%s10425_s1 + $0x4d0] sm:$0xf0]  ;;  %v5338_v44 = vor.u32 %v6751_v35, %v5335_v36 }
  0xa6   :  { %v6683_v43 = vld [vmem:[%s10425_s1 + $0x5c4] sm:$0xf]  ;;  %v5063_v45 = vld [vmem:[%s10425_s1 + $0x5d0] sm:$0xf0]  ;;  %v4938_v50 = vor.u32 %v6651_v41, %v4935_v42 }
  0xa7   :  { %3355 = vmatpush.bf16.msra.mxu0 %v4346_v10  ;;  %3368 = vmatpush.bf16.msra.mxu1 %v4474_v13  ;;  %v6715_v46 = vld [vmem:[%s10425_s1 + $0x6c4] sm:$0xf]  ;;  %v5191_v47 = vld [vmem:[%s10425_s1 + $0x6d0] sm:$0xf0]  ;;  %v5066_v51 = vor.u32 %v6683_v43, %v5063_v45 }
  0xa8   :  { %3381 = vmatpush.bf16.msra.mxu2 %v4602_v14  ;;  %3394 = vmatpush.bf16.msra.mxu3 %v4730_v18  ;;  %v6747_v48 = vld [vmem:[%s10425_s1 + $0x7c4] sm:$0xf]  ;;  %v5319_v49 = vld [vmem:[%s10425_s1 + $0x7d0] sm:$0xf0]  ;;  %v5194_v52 = vor.u32 %v6715_v46, %v5191_v47 }
  0xa9   :  { %v6647_v53 = vld [vmem:[%s10425_s1 + $0x4a4] sm:$0xf]  ;;  %v4919_v54 = vld [vmem:[%s10425_s1 + $0x4b0] sm:$0xf0]  ;;  %v5322_v56 = vor.u32 %v6747_v48, %v5319_v49 }
  0xaa   :  { %v6679_v55 = vld [vmem:[%s10425_s1 + $0x5a4] sm:$0xf]  ;;  %v5047_v57 = vld [vmem:[%s10425_s1 + $0x5b0] sm:$0xf0]  ;;  %v4922_v63 = vor.u32 %v6647_v53, %v4919_v54 }
  0xab   :  { %3356 = vmatpush.bf16.msra.mxu0 %v4330_v25  ;;  %3369 = vmatpush.bf16.msra.mxu1 %v4458_v32  ;;  %v6711_v58 = vld [vmem:[%s10425_s1 + $0x6a4] sm:$0xf]  ;;  %v5175_v59 = vld [vmem:[%s10425_s1 + $0x6b0] sm:$0xf0]  ;;  %v5050_v3 = vor.u32 %v6679_v55, %v5047_v57 }
  0xac   :  { %3382 = vmatpush.bf16.msra.mxu2 %v4586_v33  ;;  %3395 = vmatpush.bf16.msra.mxu3 %v4714_v37  ;;  %v6743_v61 = vld [vmem:[%s10425_s1 + $0x7a4] sm:$0xf]  ;;  %v5303_v62 = vld [vmem:[%s10425_s1 + $0x7b0] sm:$0xf0]  ;;  %v5178_v4 = vor.u32 %v6711_v58, %v5175_v59 }
  0xad   :  { %v6643_v5 = vld [vmem:[%s10425_s1 + $0x484] sm:$0xf]  ;;  %v4903_v6 = vld [vmem:[%s10425_s1 + $0x490] sm:$0xf0]  ;;  %v5306_v8 = vor.u32 %v6743_v61, %v5303_v62 }
  0xae   :  { %3357 = vmatmul.bf16.vlgmr.msra.gmra.mxu0 %v7452_v28  ;;  %3370 = vmatmul.bf16.vlgmr.msra.gmra.mxu1 %v7462_v34  ;;  %v6675_v7 = vld [vmem:[%s10425_s1 + $0x584] sm:$0xf]  ;;  %v5031_v9 = vld [vmem:[%s10425_s1 + $0x590] sm:$0xf0]  ;;  %v4906_v14 = vor.u32 %v6643_v5, %v4903_v6 }
  0xaf   :  { %3401 = vmatpush.bf16.msrb.mxu0 %v4954_v38  ;;  %3414 = vmatpush.bf16.msrb.mxu1 %v5082_v39  ;;  %v6707_v10 = vld [vmem:[%s10425_s1 + $0x684] sm:$0xf]  ;;  %v5159_v11 = vld [vmem:[%s10425_s1 + $0x690] sm:$0xf0]  ;;  %v5034_v15 = vor.u32 %v6675_v7, %v5031_v9 }
  0xb0   :  { %3427 = vmatpush.bf16.msrb.mxu2 %v5210_v40  ;;  %3440 = vmatpush.bf16.msrb.mxu3 %v5338_v44  ;;  %v6739_v12 = vld [vmem:[%s10425_s1 + $0x784] sm:$0xf]  ;;  %v5287_v13 = vld [vmem:[%s10425_s1 + $0x790] sm:$0xf0]  ;;  %v5162_v16 = vor.u32 %v6707_v10, %v5159_v11  ;;  %v535_v40 = vld [vmem:[%s10426_s2] sm:$0xf] }
  0xb1   :  { %3383 = vmatmul.bf16.vlgmr.msra.gmra.mxu2 %v7450_v27  ;;  %3396 = vmatmul.bf16.vlgmr.msra.gmra.mxu3 %v7454_v29  ;;  %v6639_v17 = vld [vmem:[%s10425_s1 + $0x464] sm:$0xf]  ;;  %v4887_v18 = vld [vmem:[%s10425_s1 + $0x470] sm:$0xf0]  ;;  %v5290_v20 = vor.u32 %v6739_v12, %v5287_v13  ;;  %v537_v49 = vperm.slane %v535_v40, 0 }
  0xb2   :  { %v6671_v19 = vld [vmem:[%s10425_s1 + $0x564] sm:$0xf]  ;;  %v5015_v21 = vld [vmem:[%s10425_s1 + $0x570] sm:$0xf0]  ;;  %v4890_v26 = vor.u32 %v6639_v17, %v4887_v18 }
  0xb3   :  { %3402 = vmatpush.bf16.msrb.mxu0 %v4938_v50  ;;  %3415 = vmatpush.bf16.msrb.mxu1 %v5066_v51  ;;  %v6703_v22 = vld [vmem:[%s10425_s1 + $0x664] sm:$0xf]  ;;  %v5143_v23 = vld [vmem:[%s10425_s1 + $0x670] sm:$0xf0]  ;;  %v5018_v31 = vor.u32 %v6671_v19, %v5015_v21 }
  0xb4   :  { %3428 = vmatpush.bf16.msrb.mxu2 %v5194_v52  ;;  %3441 = vmatpush.bf16.msrb.mxu3 %v5322_v56  ;;  %v6735_v24 = vld [vmem:[%s10425_s1 + $0x764] sm:$0xf]  ;;  %v5271_v25 = vld [vmem:[%s10425_s1 + $0x770] sm:$0xf0]  ;;  %v5146_v32 = vor.u32 %v6703_v22, %v5143_v23  ;;  %v3163_v6 = vpop.f32.mrf.mxu1 }
  0xb5   :  { %v6635_v30 = vld [vmem:[%s10425_s1 + $0x444] sm:$0xf]  ;;  %v4871_v33 = vld [vmem:[%s10425_s1 + $0x450] sm:$0xf0]  ;;  %v5274_v37 = vor.u32 %v6735_v24, %v5271_v25  ;;  %v3150_v59 = vpop.f32.mrf.mxu0 }
  0xb6   :  { %v6667_v35 = vld [vmem:[%s10425_s1 + $0x544] sm:$0xf]  ;;  %v4999_v36 = vld [vmem:[%s10425_s1 + $0x550] sm:$0xf0]  ;;  %v4874_v43 = vor.u32 %v6635_v30, %v4871_v33  ;;  %v3151_v5 = vadd.f32 %v3150_v59, %v537_v49 }
  0xb7   :  { %3403 = vmatpush.bf16.msrb.mxu0 %v4922_v63  ;;  %3416 = vmatpush.bf16.msrb.mxu1 %v5050_v3  ;;  %v6699_v38 = vld [vmem:[%s10425_s1 + $0x644] sm:$0xf]  ;;  %v5127_v39 = vld [vmem:[%s10425_s1 + $0x650] sm:$0xf0]  ;;  %v5002_v45 = vor.u32 %v6667_v35, %v4999_v36 }
  0xb8   :  { %3429 = vmatpush.bf16.msrb.mxu2 %v5178_v4  ;;  %3442 = vmatpush.bf16.msrb.mxu3 %v5306_v8  ;;  %v6731_v41 = vld [vmem:[%s10425_s1 + $0x744] sm:$0xf]  ;;  %v5255_v42 = vld [vmem:[%s10425_s1 + $0x750] sm:$0xf0]  ;;  %v5130_v46 = vor.u32 %v6699_v38, %v5127_v39 }
  0xb9   :  { %v6631_v44 = vld [vmem:[%s10425_s1 + $0x424] sm:$0xf]  ;;  %v4855_v47 = vld [vmem:[%s10425_s1 + $0x430] sm:$0xf0]  ;;  %v5258_v50 = vor.u32 %v6731_v41, %v5255_v42 }
  0xba   :  { %v6663_v48 = vld [vmem:[%s10425_s1 + $0x524] sm:$0xf]  ;;  %v4983_v51 = vld [vmem:[%s10425_s1 + $0x530] sm:$0xf0]  ;;  %v4858_v56 = vor.u32 %v6631_v44, %v4855_v47  ;;  %v3176_v23 = vpop.f32.mrf.mxu2 }
  0xbb   :  { %3404 = vmatpush.bf16.msrb.mxu0 %v4906_v14  ;;  %3417 = vmatpush.bf16.msrb.mxu1 %v5034_v15  ;;  %v6695_v52 = vld [vmem:[%s10425_s1 + $0x624] sm:$0xf]  ;;  %v5111_v53 = vld [vmem:[%s10425_s1 + $0x630] sm:$0xf0]  ;;  %v4986_v61 = vor.u32 %v6663_v48, %v4983_v51  ;;  %v3164_v14 = vadd.f32 %v3163_v6, %v3151_v5 }
  0xbc   :  { %3430 = vmatpush.bf16.msrb.mxu2 %v5162_v16  ;;  %3443 = vmatpush.bf16.msrb.mxu3 %v5290_v20  ;;  %v6727_v54 = vld [vmem:[%s10425_s1 + $0x724] sm:$0xf]  ;;  %v5239_v55 = vld [vmem:[%s10425_s1 + $0x730] sm:$0xf0]  ;;  %v5114_v62 = vor.u32 %v6695_v52, %v5111_v53  ;;  %v3189_v30 = vpop.f32.mrf.mxu3 }
  0xbd   :  { %v6627_v57 = vld [vmem:[%s10425_s1 + $0x404] sm:$0xf]  ;;  %v4839_v58 = vld [vmem:[%s10425_s1 + $0x410] sm:$0xf0]  ;;  %v5242_v7 = vor.u32 %v6727_v54, %v5239_v55  ;;  %v3152_v42 = vpop.f32.mrf.mxu0 }
  0xbe   :  { %v6659_v63 = vld [vmem:[%s10425_s1 + $0x504] sm:$0xf]  ;;  %v4967_v3 = vld [vmem:[%s10425_s1 + $0x510] sm:$0xf0]  ;;  %v4842_v15 = vor.u32 %v6627_v57, %v4839_v58 }
  0xbf   :  { %3405 = vmatpush.bf16.msrb.mxu0 %v4890_v26  ;;  %3418 = vmatpush.bf16.msrb.mxu1 %v5018_v31  ;;  %v6691_v4 = vld [vmem:[%s10425_s1 + $0x604] sm:$0xf]  ;;  %v5095_v8 = vld [vmem:[%s10425_s1 + $0x610] sm:$0xf0]  ;;  %v4970_v19 = vor.u32 %v6659_v63, %v4967_v3  ;;  %v3177_v26 = vadd.f32 %v3176_v23, %v3164_v14 }
  0xc0   :  { %3431 = vmatpush.bf16.msrb.mxu2 %v5146_v32  ;;  %3444 = vmatpush.bf16.msrb.mxu3 %v5274_v37  ;;  %v6723_v9 = vld [vmem:[%s10425_s1 + $0x704] sm:$0xf]  ;;  %v5223_v10 = vld [vmem:[%s10425_s1 + $0x710] sm:$0xf0]  ;;  %v5098_v20 = vor.u32 %v6691_v4, %v5095_v8 }
  0xc1   :  { %v6783_v11 = vld [vmem:[%s10425_s1 + $0x8e4] sm:$0xf]  ;;  %v5463_v12 = vld [vmem:[%s10425_s1 + $0x8f0] sm:$0xf0]  ;;  %v5226_v24 = vor.u32 %v6723_v9, %v5223_v10  ;;  %v3190_v41 = vadd.f32 %v3189_v30, %v3177_v26 }
  0xc2   :  { %v6815_v13 = vld [vmem:[%s10425_s1 + $0x9e4] sm:$0xf]  ;;  %v5591_v16 = vld [vmem:[%s10425_s1 + $0x9f0] sm:$0xf0]  ;;  %v5466_v25 = vor.u32 %v6783_v11, %v5463_v12  ;;  %v3178_v58 = vpop.f32.mrf.mxu2 }
  0xc3   :  { %3406 = vmatpush.bf16.msrb.mxu0 %v4874_v43  ;;  %3419 = vmatpush.bf16.msrb.mxu1 %v5002_v45  ;;  %v6847_v17 = vld [vmem:[%s10425_s1 + $0xae4] sm:$0xf]  ;;  %v5719_v18 = vld [vmem:[%s10425_s1 + $0xaf0] sm:$0xf0]  ;;  %v5594_v31 = vor.u32 %v6815_v13, %v5591_v16  ;;  %v3165_v45 = vpop.f32.mrf.mxu1 }
  0xc4   :  { %3432 = vmatpush.bf16.msrb.mxu2 %v5130_v46  ;;  %3445 = vmatpush.bf16.msrb.mxu3 %v5258_v50  ;;  %v6879_v21 = vld [vmem:[%s10425_s1 + $0xbe4] sm:$0xf]  ;;  %v5847_v22 = vld [vmem:[%s10425_s1 + $0xbf0] sm:$0xf0]  ;;  %v5722_v32 = vor.u32 %v6847_v17, %v5719_v18 }
  0xc5   :  { %v6779_v33 = vld [vmem:[%s10425_s1 + $0x8c4] sm:$0xf]  ;;  %v5447_v35 = vld [vmem:[%s10425_s1 + $0x8d0] sm:$0xf0]  ;;  %v5850_v37 = vor.u32 %v6879_v21, %v5847_v22 }
  0xc6   :  { %v6811_v36 = vld [vmem:[%s10425_s1 + $0x9c4] sm:$0xf]  ;;  %v5575_v38 = vld [vmem:[%s10425_s1 + $0x9d0] sm:$0xf0]  ;;  %v5450_v46 = vor.u32 %v6779_v33, %v5447_v35  ;;  %v3202_v13 = vpop.f32.mrf.mxu0 }
  0xc7   :  { %3407 = vmatpush.bf16.msrb.mxu0 %v4858_v56  ;;  %3420 = vmatpush.bf16.msrb.mxu1 %v4986_v61  ;;  %v6843_v39 = vld [vmem:[%s10425_s1 + $0xac4] sm:$0xf]  ;;  %v5703_v40 = vld [vmem:[%s10425_s1 + $0xad0] sm:$0xf0]  ;;  %v5578_v47 = vor.u32 %v6811_v36, %v5575_v38  ;;  %v3191_v61 = vpop.f32.mrf.mxu3 }
  0xc8   :  { %3433 = vmatpush.bf16.msrb.mxu2 %v5114_v62  ;;  %3446 = vmatpush.bf16.msrb.mxu3 %v5242_v7  ;;  %v6875_v43 = vld [vmem:[%s10425_s1 + $0xbc4] sm:$0xf]  ;;  %v5831_v44 = vld [vmem:[%s10425_s1 + $0xbd0] sm:$0xf0]  ;;  %v5706_v48 = vor.u32 %v6843_v39, %v5703_v40 }
  0xc9   :  { %v6775_v49 = vld [vmem:[%s10425_s1 + $0x8a4] sm:$0xf]  ;;  %v5431_v50 = vld [vmem:[%s10425_s1 + $0x8b0] sm:$0xf0]  ;;  %v5834_v52 = vor.u32 %v6875_v43, %v5831_v44 }
  0xca   :  { %v6807_v51 = vld [vmem:[%s10425_s1 + $0x9a4] sm:$0xf]  ;;  %v5559_v53 = vld [vmem:[%s10425_s1 + $0x9b0] sm:$0xf0]  ;;  %v5434_v59 = vor.u32 %v6775_v49, %v5431_v50 }
  0xcb   :  { %3408 = vmatpush.bf16.msrb.mxu0 %v4842_v15  ;;  %3421 = vmatpush.bf16.msrb.mxu1 %v4970_v19  ;;  %v6839_v54 = vld [vmem:[%s10425_s1 + $0xaa4] sm:$0xf]  ;;  %v5687_v55 = vld [vmem:[%s10425_s1 + $0xab0] sm:$0xf0]  ;;  %v5562_v62 = vor.u32 %v6807_v51, %v5559_v53  ;;  %v3203_v19 = vadd.f32 %v3202_v13, %v3190_v41  ;;  %v3228_v38 = vpop.f32.mrf.mxu2 }
  0xcc   :  { %3434 = vmatpush.bf16.msrb.mxu2 %v5098_v20  ;;  %3447 = vmatpush.bf16.msrb.mxu3 %v5226_v24  ;;  %v6871_v56 = vld [vmem:[%s10425_s1 + $0xba4] sm:$0xf]  ;;  %v5815_v57 = vld [vmem:[%s10425_s1 + $0xbb0] sm:$0xf0]  ;;  %v5690_v63 = vor.u32 %v6839_v54, %v5687_v55  ;;  %v3215_v20 = vpop.f32.mrf.mxu1 }
  0xcd   :  { %v6771_v3 = vld [vmem:[%s10425_s1 + $0x884] sm:$0xf]  ;;  %v5415_v4 = vld [vmem:[%s10425_s1 + $0x890] sm:$0xf0]  ;;  %v5818_v6 = vor.u32 %v6871_v56, %v5815_v57  ;;  %v3216_v30 = vadd.f32 %v3215_v20, %v3203_v19 }
  0xce   :  { %3409 = vmatmul.bf16.vlgmr.msrb.gmra.mxu0 %v7530_v0  ;;  %3422 = vmatmul.bf16.vlgmr.msrb.gmra.mxu1 %v7534_v2  ;;  %v6803_v5 = vld [vmem:[%s10425_s1 + $0x984] sm:$0xf]  ;;  %v5543_v7 = vld [vmem:[%s10425_s1 + $0x990] sm:$0xf0]  ;;  %v5418_v12 = vor.u32 %v6771_v3, %v5415_v4  ;;  %v3204_v49 = vpop.f32.mrf.mxu0 }
  0xcf   :  { %3453 = vmatpush.bf16.msra.mxu0 %v5466_v25  ;;  %3466 = vmatpush.bf16.msra.mxu1 %v5594_v31  ;;  %v6835_v8 = vld [vmem:[%s10425_s1 + $0xa84] sm:$0xf]  ;;  %v5671_v9 = vld [vmem:[%s10425_s1 + $0xa90] sm:$0xf0]  ;;  %v5546_v14 = vor.u32 %v6803_v5, %v5543_v7  ;;  %v3229_v43 = vadd.f32 %v3228_v38, %v3216_v30  ;;  %v3241_v44 = vpop.f32.mrf.mxu3 }
  0xd0   :  { %3479 = vmatpush.bf16.msra.mxu2 %v5722_v32  ;;  %3492 = vmatpush.bf16.msra.mxu3 %v5850_v37  ;;  %v6867_v10 = vld [vmem:[%s10425_s1 + $0xb84] sm:$0xf]  ;;  %v5799_v11 = vld [vmem:[%s10425_s1 + $0xb90] sm:$0xf0]  ;;  %v5674_v15 = vor.u32 %v6835_v8, %v5671_v9 }
  0xd1   :  { %3435 = vmatmul.bf16.vlgmr.msrb.gmra.mxu2 %v7525_v60  ;;  %3448 = vmatmul.bf16.vlgmr.msrb.gmra.mxu3 %v7532_v1  ;;  %v6767_v16 = vld [vmem:[%s10425_s1 + $0x864] sm:$0xf]  ;;  %v5399_v17 = vld [vmem:[%s10425_s1 + $0x870] sm:$0xf0]  ;;  %v5802_v21 = vor.u32 %v6867_v10, %v5799_v11 }
  0xd2   :  { %v6799_v18 = vld [vmem:[%s10425_s1 + $0x964] sm:$0xf]  ;;  %v5527_v22 = vld [vmem:[%s10425_s1 + $0x970] sm:$0xf0]  ;;  %v5402_v31 = vor.u32 %v6767_v16, %v5399_v17 }
  0xd3   :  { %3454 = vmatpush.bf16.msra.mxu0 %v5450_v46  ;;  %3467 = vmatpush.bf16.msra.mxu1 %v5578_v47  ;;  %v6831_v23 = vld [vmem:[%s10425_s1 + $0xa64] sm:$0xf]  ;;  %v5655_v24 = vld [vmem:[%s10425_s1 + $0xa70] sm:$0xf0]  ;;  %v5530_v32 = vor.u32 %v6799_v18, %v5527_v22  ;;  %v3230_v10 = vpop.f32.mrf.mxu2 }
  0xd4   :  { %3480 = vmatpush.bf16.msra.mxu2 %v5706_v48  ;;  %3493 = vmatpush.bf16.msra.mxu3 %v5834_v52  ;;  %v6863_v25 = vld [vmem:[%s10425_s1 + $0xb64] sm:$0xf]  ;;  %v5783_v26 = vld [vmem:[%s10425_s1 + $0xb70] sm:$0xf0]  ;;  %v5658_v33 = vor.u32 %v6831_v23, %v5655_v24  ;;  %v8469_v48 = vadd.f32 %v3241_v44, %v3229_v43  ;;  %v3217_v55 = vpop.f32.mrf.mxu1 }
  0xd5   :  { %v6763_v35 = vld [vmem:[%s10425_s1 + $0x844] sm:$0xf]  ;;  %v5383_v36 = vld [vmem:[%s10425_s1 + $0x850] sm:$0xf0]  ;;  %v5786_v39 = vor.u32 %v6863_v25, %v5783_v26 }
  0xd6   :  { %v6795_v37 = vld [vmem:[%s10425_s1 + $0x944] sm:$0xf]  ;;  %v5511_v40 = vld [vmem:[%s10425_s1 + $0x950] sm:$0xf0]  ;;  %v5386_v47 = vor.u32 %v6763_v35, %v5383_v36 }
  0xd7   :  { %3455 = vmatpush.bf16.msra.mxu0 %v5434_v59  ;;  %3468 = vmatpush.bf16.msra.mxu1 %v5562_v62  ;;  %v6827_v41 = vld [vmem:[%s10425_s1 + $0xa44] sm:$0xf]  ;;  %v5639_v42 = vld [vmem:[%s10425_s1 + $0xa50] sm:$0xf0]  ;;  %v5514_v50 = vor.u32 %v6795_v37, %v5511_v40 }
  0xd8   :  { %3481 = vmatpush.bf16.msra.mxu2 %v5690_v63  ;;  %3494 = vmatpush.bf16.msra.mxu3 %v5818_v6  ;;  %v6859_v45 = vld [vmem:[%s10425_s1 + $0xb44] sm:$0xf]  ;;  %v5767_v46 = vld [vmem:[%s10425_s1 + $0xb50] sm:$0xf0]  ;;  %v5642_v51 = vor.u32 %v6827_v41, %v5639_v42 }
  0xd9   :  { %v6759_v52 = vld [vmem:[%s10425_s1 + $0x824] sm:$0xf]  ;;  %v5367_v53 = vld [vmem:[%s10425_s1 + $0x830] sm:$0xf0]  ;;  %v5770_v56 = vor.u32 %v6859_v45, %v5767_v46 }
  0xda   :  { %v6791_v54 = vld [vmem:[%s10425_s1 + $0x924] sm:$0xf]  ;;  %v5495_v57 = vld [vmem:[%s10425_s1 + $0x930] sm:$0xf0]  ;;  %v5370_v63 = vor.u32 %v6759_v52, %v5367_v53 }
  0xdb   :  { %3456 = vmatpush.bf16.msra.mxu0 %v5418_v12  ;;  %3469 = vmatpush.bf16.msra.mxu1 %v5546_v14  ;;  %v6823_v58 = vld [vmem:[%s10425_s1 + $0xa24] sm:$0xf]  ;;  %v5623_v59 = vld [vmem:[%s10425_s1 + $0xa30] sm:$0xf0]  ;;  %v5498_v5 = vor.u32 %v6791_v54, %v5495_v57  ;;  %v7051_v57 = vld [vmem:[#allocation1 + $0x9] sm:$0xff] }
  0xdc   :  { %3482 = vmatpush.bf16.msra.mxu2 %v5674_v15  ;;  %3495 = vmatpush.bf16.msra.mxu3 %v5802_v21  ;;  %v6855_v61 = vld [vmem:[%s10425_s1 + $0xb24] sm:$0xf]  ;;  %v5751_v62 = vld [vmem:[%s10425_s1 + $0xb30] sm:$0xf0]  ;;  %v5626_v6 = vor.u32 %v6823_v58, %v5623_v59  ;;  %v3243_v15 = vpop.f32.mrf.mxu3 }
  0xdd   :  { %v6755_v3 = vld [vmem:[%s10425_s1 + $0x804] sm:$0xf]  ;;  %v5351_v4 = vld [vmem:[%s10425_s1 + $0x810] sm:$0xf0]  ;;  %v5754_v11 = vor.u32 %v6855_v61, %v5751_v62  ;;  %v7052_v61 = vld [vmem:[#allocation1 + $0x1b] sm:$0xff] }
  0xde   :  { %v6787_v7 = vld [vmem:[%s10425_s1 + $0x904] sm:$0xf]  ;;  %v5479_v8 = vld [vmem:[%s10425_s1 + $0x910] sm:$0xf0]  ;;  %v5354_v19 = vor.u32 %v6755_v3, %v5351_v4 }
  0xdf   :  { %3457 = vmatpush.bf16.msra.mxu0 %v5402_v31  ;;  %3470 = vmatpush.bf16.msra.mxu1 %v5530_v32  ;;  %v6819_v9 = vld [vmem:[%s10425_s1 + $0xa04] sm:$0xf]  ;;  %v5607_v12 = vld [vmem:[%s10425_s1 + $0xa10] sm:$0xf0]  ;;  %v5482_v23 = vor.u32 %v6787_v7, %v5479_v8 }
  0xe0   :  { %3483 = vmatpush.bf16.msra.mxu2 %v5658_v33  ;;  %3496 = vmatpush.bf16.msra.mxu3 %v5786_v39  ;;  %v6851_v13 = vld [vmem:[%s10425_s1 + $0xb04] sm:$0xf]  ;;  %v5735_v14 = vld [vmem:[%s10425_s1 + $0xb10] sm:$0xf0]  ;;  %v5610_v24 = vor.u32 %v6819_v9, %v5607_v12 }
  0xe1   :  { %v6911_v16 = vld [vmem:[%s10425_s1 + $0xce4] sm:$0xf]  ;;  %v5975_v17 = vld [vmem:[%s10425_s1 + $0xcf0] sm:$0xf0]  ;;  %v5738_v30 = vor.u32 %v6851_v13, %v5735_v14 }
  0xe2   :  { %v6943_v18 = vld [vmem:[%s10425_s1 + $0xde4] sm:$0xf]  ;;  %v6103_v20 = vld [vmem:[%s10425_s1 + $0xdf0] sm:$0xf0]  ;;  %v5978_v31 = vor.u32 %v6911_v16, %v5975_v17 }
  0xe3   :  { %3458 = vmatpush.bf16.msra.mxu0 %v5386_v47  ;;  %3471 = vmatpush.bf16.msra.mxu1 %v5514_v50  ;;  %v6975_v21 = vld [vmem:[%s10425_s1 + $0xee4] sm:$0xf]  ;;  %v6231_v22 = vld [vmem:[%s10425_s1 + $0xef0] sm:$0xf0]  ;;  %v6106_v32 = vor.u32 %v6943_v18, %v6103_v20 }
  0xe4   :  { %3484 = vmatpush.bf16.msra.mxu2 %v5642_v51  ;;  %3497 = vmatpush.bf16.msra.mxu3 %v5770_v56  ;;  %v7007_v25 = vld [vmem:[%s10425_s1 + $0xfe4] sm:$0xf]  ;;  %v6359_v26 = vld [vmem:[%s10425_s1 + $0xff0] sm:$0xf0]  ;;  %v6234_v33 = vor.u32 %v6975_v21, %v6231_v22 }
  0xe5   :  { %v6907_v35 = vld [vmem:[%s10425_s1 + $0xcc4] sm:$0xf]  ;;  %v5959_v36 = vld [vmem:[%s10425_s1 + $0xcd0] sm:$0xf0]  ;;  %v6362_v38 = vor.u32 %v7007_v25, %v6359_v26 }
  0xe6   :  { %v6939_v37 = vld [vmem:[%s10425_s1 + $0xdc4] sm:$0xf]  ;;  %v6087_v39 = vld [vmem:[%s10425_s1 + $0xdd0] sm:$0xf0]  ;;  %v5962_v44 = vor.u32 %v6907_v35, %v5959_v36 }
  0xe7   :  { %3459 = vmatpush.bf16.msra.mxu0 %v5370_v63  ;;  %3472 = vmatpush.bf16.msra.mxu1 %v5498_v5  ;;  %v6971_v40 = vld [vmem:[%s10425_s1 + $0xec4] sm:$0xf]  ;;  %v6215_v41 = vld [vmem:[%s10425_s1 + $0xed0] sm:$0xf0]  ;;  %v6090_v45 = vor.u32 %v6939_v37, %v6087_v39 }
  0xe8   :  { %3485 = vmatpush.bf16.msra.mxu2 %v5626_v6  ;;  %3498 = vmatpush.bf16.msra.mxu3 %v5754_v11  ;;  %v7003_v42 = vld [vmem:[%s10425_s1 + $0xfc4] sm:$0xf]  ;;  %v6343_v43 = vld [vmem:[%s10425_s1 + $0xfd0] sm:$0xf0]  ;;  %v6218_v46 = vor.u32 %v6971_v40, %v6215_v41 }
  0xe9   :  { %v6903_v47 = vld [vmem:[%s10425_s1 + $0xca4] sm:$0xf]  ;;  %v5943_v49 = vld [vmem:[%s10425_s1 + $0xcb0] sm:$0xf0]  ;;  %v6346_v52 = vor.u32 %v7003_v42, %v6343_v43  ;;  %v3267_v16 = vpop.f32.mrf.mxu1 }
  0xea   :  { %v6935_v50 = vld [vmem:[%s10425_s1 + $0xda4] sm:$0xf]  ;;  %v6071_v53 = vld [vmem:[%s10425_s1 + $0xdb0] sm:$0xf0]  ;;  %v5946_v62 = vor.u32 %v6903_v47, %v5943_v49  ;;  %v3254_v11 = vpop.f32.mrf.mxu0 }
  0xeb   :  { %3460 = vmatpush.bf16.msra.mxu0 %v5354_v19  ;;  %3473 = vmatpush.bf16.msra.mxu1 %v5482_v23  ;;  %v7049_v51 = vld [vmem:[#allocation1] sm:$0xff]  ;;  %v6199_v55 = vld [vmem:[%s10425_s1 + $0xeb0] sm:$0xf0]  ;;  %v6074_v63 = vor.u32 %v6935_v50, %v6071_v53  ;;  %v3255_v14 = vadd.f32 %v3254_v11, %v8469_v48 }
  0xec   :  { %3486 = vmatpush.bf16.msra.mxu2 %v5610_v24  ;;  %3499 = vmatpush.bf16.msra.mxu3 %v5738_v30  ;;  %v6967_v54 = vld [vmem:[%s10425_s1 + $0xea4] sm:$0xf]  ;;  %v7050_v56 = vld [vmem:[#allocation1 + $0x12] sm:$0xff] }
  0xed   :  { %v6999_v58 = vld [vmem:[%s10425_s1 + $0xfa4] sm:$0xf]  ;;  %v6327_v59 = vld [vmem:[%s10425_s1 + $0xfb0] sm:$0xf0]  ;;  %v6202_v3 = vor.u32 %v6967_v54, %v6199_v55  ;;  %v3268_v22 = vadd.f32 %v3267_v16, %v3255_v14  ;;  %v4445_v16 = vld [vmem:[%s10425_s1 + $0xe8] sm:$0xf] }
  0xee   :  { %3461 = vmatmul.bf16.vlgmr.msra.gmra.mxu0 %v7049_v51  ;;  %3474 = vmatmul.bf16.vlgmr.msra.gmra.mxu1 %v7051_v57  ;;  %v6899_v4 = vld [vmem:[%s10425_s1 + $0xc84] sm:$0xf]  ;;  %v5927_v5 = vld [vmem:[%s10425_s1 + $0xc90] sm:$0xf0]  ;;  %v6330_v7 = vor.u32 %v6999_v58, %v6327_v59 }
  0xef   :  { %3505 = vmatpush.bf16.msrb.mxu0 %v5978_v31  ;;  %3518 = vmatpush.bf16.msrb.mxu1 %v6106_v32  ;;  %v6931_v6 = vld [vmem:[%s10425_s1 + $0xd84] sm:$0xf]  ;;  %v6055_v8 = vld [vmem:[%s10425_s1 + $0xd90] sm:$0xf0]  ;;  %v5930_v15 = vor.u32 %v6899_v4, %v5927_v5  ;;  %v3280_v39 = vpop.f32.mrf.mxu2 }
  0xf0   :  { %3531 = vmatpush.bf16.msrb.mxu2 %v6234_v33  ;;  %3544 = vmatpush.bf16.msrb.mxu3 %v6362_v38  ;;  %v6963_v9 = vld [vmem:[%s10425_s1 + $0xe84] sm:$0xf]  ;;  %v6183_v10 = vld [vmem:[%s10425_s1 + $0xe90] sm:$0xf0]  ;;  %v6058_v17 = vor.u32 %v6931_v6, %v6055_v8  ;;  %v3281_v43 = vadd.f32 %v3280_v39, %v3268_v22  ;;  %v6594_v22 = vld [vmem:[%s10425_s1 + $0x2f4] sm:$0xf0] }
  0xf1   :  { %3487 = vmatmul.bf16.vlgmr.msra.gmra.mxu2 %v7050_v56  ;;  %3500 = vmatmul.bf16.vlgmr.msra.gmra.mxu3 %v7052_v61  ;;  %v6995_v12 = vld [vmem:[%s10425_s1 + $0xf84] sm:$0xf]  ;;  %v6311_v13 = vld [vmem:[%s10425_s1 + $0xf90] sm:$0xf0]  ;;  %v6186_v18 = vor.u32 %v6963_v9, %v6183_v10  ;;  %v3269_v50 = vpop.f32.mrf.mxu1  ;;  %v6558_v39 = vld [vmem:[%s10425_s1 + $0x1d4] sm:$0xf0] }
  0xf2   :  { %v6895_v19 = vld [vmem:[%s10425_s1 + $0xc64] sm:$0xf]  ;;  %v5911_v20 = vld [vmem:[%s10425_s1 + $0xc70] sm:$0xf0]  ;;  %v6314_v48 = vor.u32 %v6995_v12, %v6311_v13  ;;  %v3256_v47 = vpop.f32.mrf.mxu0  ;;  %v4541_v50 = vld [vmem:[%s10425_s1 + $0x1a8] sm:$0xf] }
  0xf3   :  { %3506 = vmatpush.bf16.msrb.mxu0 %v5962_v44  ;;  %3519 = vmatpush.bf16.msrb.mxu1 %v6090_v45  ;;  %v6927_v21 = vld [vmem:[%s10425_s1 + $0xd64] sm:$0xf]  ;;  %v6039_v23 = vld [vmem:[%s10425_s1 + $0xd70] sm:$0xf0]  ;;  %v5914_v31 = vor.u32 %v6895_v19, %v5911_v20  ;;  %v3293_v44 = vpop.f32.mrf.mxu3  ;;  %v4413_v47 = vld [vmem:[%s10425_s1 + $0xa8] sm:$0xf] }
  0xf4   :  { %3532 = vmatpush.bf16.msrb.mxu2 %v6218_v46  ;;  %3545 = vmatpush.bf16.msrb.mxu3 %v6346_v52  ;;  %v6959_v24 = vld [vmem:[%s10425_s1 + $0xe64] sm:$0xf]  ;;  %v6167_v25 = vld [vmem:[%s10425_s1 + $0xe70] sm:$0xf0]  ;;  %v6042_v32 = vor.u32 %v6927_v21, %v6039_v23  ;;  %v8664_v51 = vadd.f32 %v3293_v44, %v3281_v43  ;;  %v6562_v21 = vld [vmem:[%s10425_s1 + $0x1f4] sm:$0xf0] }
  0xf5   :  { %v6991_v26 = vld [vmem:[%s10425_s1 + $0xf64] sm:$0xf]  ;;  %v6295_v30 = vld [vmem:[%s10425_s1 + $0xf70] sm:$0xf0]  ;;  %v6170_v33 = vor.u32 %v6959_v24, %v6167_v25  ;;  %v4829_v25 = vld [vmem:[%s10425_s1 + $0x3e8] sm:$0xf] }
  0xf6   :  { %v6891_v35 = vld [vmem:[%s10425_s1 + $0xc44] sm:$0xf]  ;;  %v5895_v36 = vld [vmem:[%s10425_s1 + $0xc50] sm:$0xf0]  ;;  %v6298_v38 = vor.u32 %v6991_v26, %v6295_v30  ;;  %v6626_v26 = vld [vmem:[%s10425_s1 + $0x3f4] sm:$0xf0] }
  0xf7   :  { %3507 = vmatpush.bf16.msrb.mxu0 %v5946_v62  ;;  %3520 = vmatpush.bf16.msrb.mxu1 %v6074_v63  ;;  %v6923_v37 = vld [vmem:[%s10425_s1 + $0xd44] sm:$0xf]  ;;  %v6023_v40 = vld [vmem:[%s10425_s1 + $0xd50] sm:$0xf0]  ;;  %v5898_v49 = vor.u32 %v6891_v35, %v5895_v36  ;;  %v4429_v35 = vld [vmem:[%s10425_s1 + $0xc8] sm:$0xf] }
  0xf8   :  { %3533 = vmatpush.bf16.msrb.mxu2 %v6202_v3  ;;  %3546 = vmatpush.bf16.msrb.mxu3 %v6330_v7  ;;  %v6955_v41 = vld [vmem:[%s10425_s1 + $0xe44] sm:$0xf]  ;;  %v6151_v42 = vld [vmem:[%s10425_s1 + $0xe50] sm:$0xf0]  ;;  %v6026_v52 = vor.u32 %v6923_v37, %v6023_v40  ;;  %v6526_v36 = vld [vmem:[%s10425_s1 + $0xd4] sm:$0xf0] }
  0xf9   :  { %v6987_v45 = vld [vmem:[%s10425_s1 + $0xf44] sm:$0xf]  ;;  %v6279_v46 = vld [vmem:[%s10425_s1 + $0xf50] sm:$0xf0]  ;;  %v6154_v53 = vor.u32 %v6955_v41, %v6151_v42  ;;  %v4557_v37 = vld [vmem:[%s10425_s1 + $0x1c8] sm:$0xf]  ;;  %v4430_v44 = vor.u32 %v6526_v36, %v4429_v35 }
  0xfa   :  { %v6887_v54 = vld [vmem:[%s10425_s1 + $0xc24] sm:$0xf]  ;;  %v5879_v55 = vld [vmem:[%s10425_s1 + $0xc30] sm:$0xf0]  ;;  %v6282_v57 = vor.u32 %v6987_v45, %v6279_v46  ;;  %v4685_v40 = vld [vmem:[%s10425_s1 + $0x2c8] sm:$0xf]  ;;  %v4558_v45 = vor.u32 %v6558_v39, %v4557_v37 }
  0xfb   :  { %3508 = vmatpush.bf16.msrb.mxu0 %v5930_v15  ;;  %3521 = vmatpush.bf16.msrb.mxu1 %v6058_v17  ;;  %v6919_v56 = vld [vmem:[%s10425_s1 + $0xd24] sm:$0xf]  ;;  %v6007_v58 = vld [vmem:[%s10425_s1 + $0xd30] sm:$0xf0]  ;;  %v5882_v3 = vor.u32 %v6887_v54, %v5879_v55  ;;  %v3282_v15 = vpop.f32.mrf.mxu2  ;;  %v6530_v17 = vld [vmem:[%s10425_s1 + $0xf4] sm:$0xf0]  ;;  %v3295_v19 = vpop.f32.mrf.mxu3 }
  0xfc   :  { %3534 = vmatpush.bf16.msrb.mxu2 %v6186_v18  ;;  %3547 = vmatpush.bf16.msrb.mxu3 %v6314_v48  ;;  %v6951_v59 = vld [vmem:[%s10425_s1 + $0xe24] sm:$0xf]  ;;  %v6135_v61 = vld [vmem:[%s10425_s1 + $0xe30] sm:$0xf0]  ;;  %v6010_v6 = vor.u32 %v6919_v56, %v6007_v58  ;;  %v4573_v18 = vld [vmem:[%s10425_s1 + $0x1e8] sm:$0xf] }
  0xfd   :  { %v6983_v62 = vld [vmem:[%s10425_s1 + $0xf24] sm:$0xf]  ;;  %v6263_v63 = vld [vmem:[%s10425_s1 + $0xf30] sm:$0xf0]  ;;  %v6138_v7 = vor.u32 %v6951_v59, %v6135_v61  ;;  %v4701_v48 = vld [vmem:[%s10425_s1 + $0x2e8] sm:$0xf] }
  0xfe   :  { %v6883_v4 = vld [vmem:[%s10425_s1 + $0xc04] sm:$0xf]  ;;  %v5863_v5 = vld [vmem:[%s10425_s1 + $0xc10] sm:$0xf0]  ;;  %v6266_v11 = vor.u32 %v6983_v62, %v6263_v63  ;;  %v6590_v41 = vld [vmem:[%s10425_s1 + $0x2d4] sm:$0xf0] }
  0xff   :  { %3509 = vmatpush.bf16.msrb.mxu0 %v5914_v31  ;;  %3522 = vmatpush.bf16.msrb.mxu1 %v6042_v32  ;;  %v6915_v8 = vld [vmem:[%s10425_s1 + $0xd04] sm:$0xf]  ;;  %v5991_v9 = vld [vmem:[%s10425_s1 + $0xd10] sm:$0xf0]  ;;  %v5866_v20 = vor.u32 %v6883_v4, %v5863_v5  ;;  %v4446_v31 = vor.u32 %v6530_v17, %v4445_v16  ;;  %v4574_v32 = vor.u32 %v6562_v21, %v4573_v18  ;;  %v4813_v42 = vld [vmem:[%s10425_s1 + $0x3c8] sm:$0xf] }
 0x100   :  { %3535 = vmatpush.bf16.msrb.mxu2 %v6170_v33  ;;  %3548 = vmatpush.bf16.msrb.mxu3 %v6298_v38  ;;  %v6947_v10 = vld [vmem:[%s10425_s1 + $0xe04] sm:$0xf]  ;;  %v6119_v12 = vld [vmem:[%s10425_s1 + $0xe10] sm:$0xf0]  ;;  %v5994_v23 = vor.u32 %v6915_v8, %v5991_v9  ;;  %v4702_v33 = vor.u32 %v6594_v22, %v4701_v48  ;;  %v4830_v38 = vor.u32 %v6626_v26, %v4829_v25  ;;  %v6622_v43 = vld [vmem:[%s10425_s1 + $0x3d4] sm:$0xf0] }
 0x101   :  { %v6979_v13 = vld [vmem:[%s10425_s1 + $0xf04] sm:$0xf]  ;;  %v6247_v14 = vld [vmem:[%s10425_s1 + $0xf10] sm:$0xf0]  ;;  %v6122_v24 = vor.u32 %v6947_v10, %v6119_v12  ;;  %v4686_v46 = vor.u32 %v6590_v41, %v4685_v40  ;;  %v6554_v54 = vld [vmem:[%s10425_s1 + $0x1b4] sm:$0xf0] }
 0x102   :  { %v6250_v30 = vor.u32 %v6979_v13, %v6247_v14  ;;  %v4669_v55 = vld [vmem:[%s10425_s1 + $0x2a8] sm:$0xf]  ;;  %v6586_v56 = vld [vmem:[%s10425_s1 + $0x2b4] sm:$0xf0]  ;;  %v7055_v58 = vld [vmem:[#allocation1 + $0x2d] sm:$0xff] }
 0x103   :  { %3510 = vmatpush.bf16.msrb.mxu0 %v5898_v49  ;;  %3523 = vmatpush.bf16.msrb.mxu1 %v6026_v52  ;;  %v6522_v49 = vld [vmem:[%s10425_s1 + $0xb4] sm:$0xf0]  ;;  %v7053_v52 = vld [vmem:[#allocation1 + $0x24] sm:$0xff]  ;;  %v4670_v4 = vor.u32 %v6586_v56, %v4669_v55 }
 0x104   :  { %3536 = vmatpush.bf16.msrb.mxu2 %v6154_v53  ;;  %3549 = vmatpush.bf16.msrb.mxu3 %v6282_v57  ;;  %v4814_v53 = vor.u32 %v6622_v43, %v4813_v42  ;;  %v7054_v57 = vld [vmem:[#allocation1 + $0x36] sm:$0xff]  ;;  %v4797_v59 = vld [vmem:[%s10425_s1 + $0x3a8] sm:$0xf]  ;;  %v7056_v62 = vld [vmem:[#allocation1 + $0x3f] sm:$0xff]  ;;  %v4414_v63 = vor.u32 %v6522_v49, %v4413_v47 }
 0x105   :  { %v6618_v61 = vld [vmem:[%s10425_s1 + $0x3b4] sm:$0xf0]  ;;  %v4397_v5 = vld [vmem:[%s10425_s1 + $0x88] sm:$0xf] }
 0x106   :  { %v4798_v8 = vor.u32 %v6618_v61, %v4797_v59  ;;  %v6550_v9 = vld [vmem:[%s10425_s1 + $0x194] sm:$0xf0]  ;;  %v4653_v10 = vld [vmem:[%s10425_s1 + $0x288] sm:$0xf] }
 0x107   :  { %3511 = vmatpush.bf16.msrb.mxu0 %v5882_v3  ;;  %3524 = vmatpush.bf16.msrb.mxu1 %v6010_v6  ;;  %v4542_v3 = vor.u32 %v6554_v54, %v4541_v50  ;;  %v6518_v6 = vld [vmem:[%s10425_s1 + $0x94] sm:$0xf0]  ;;  %v4781_v13 = vld [vmem:[%s10425_s1 + $0x388] sm:$0xf] }
 0x108   :  { %3537 = vmatpush.bf16.msrb.mxu2 %v6138_v7  ;;  %3550 = vmatpush.bf16.msrb.mxu3 %v6266_v11  ;;  %v4525_v7 = vld [vmem:[%s10425_s1 + $0x188] sm:$0xf]  ;;  %v6582_v11 = vld [vmem:[%s10425_s1 + $0x294] sm:$0xf0]  ;;  %v4398_v16 = vor.u32 %v6518_v6, %v4397_v5 }
 0x109   :  { %v6614_v14 = vld [vmem:[%s10425_s1 + $0x394] sm:$0xf0]  ;;  %v4526_v18 = vor.u32 %v6550_v9, %v4525_v7  ;;  %v4654_v19 = vor.u32 %v6582_v11, %v4653_v10  ;;  %v4509_v48 = vld [vmem:[%s10425_s1 + $0x168] sm:$0xf] }
 0x10a   :  { %v6514_v21 = vld [vmem:[%s10425_s1 + $0x74] sm:$0xf0]  ;;  %v4765_v26 = vld [vmem:[%s10425_s1 + $0x368] sm:$0xf] }
 0x10b   :  { %3512 = vmatpush.bf16.msrb.mxu0 %v5866_v20  ;;  %3525 = vmatpush.bf16.msrb.mxu1 %v5994_v23  ;;  %v3306_v12 = vpop.f32.mrf.mxu0  ;;  %v3319_v17 = vpop.f32.mrf.mxu1  ;;  %v4381_v20 = vld [vmem:[%s10425_s1 + $0x68] sm:$0xf]  ;;  %v6546_v23 = vld [vmem:[%s10425_s1 + $0x174] sm:$0xf0] }
 0x10c   :  { %3538 = vmatpush.bf16.msrb.mxu2 %v6122_v24  ;;  %3551 = vmatpush.bf16.msrb.mxu3 %v6250_v30  ;;  %v3307_v15 = vadd.f32 %v3306_v12, %v8664_v51  ;;  %v4782_v51 = vor.u32 %v6614_v14, %v4781_v13  ;;  %v4637_v24 = vld [vmem:[%s10425_s1 + $0x268] sm:$0xf]  ;;  %v6578_v25 = vld [vmem:[%s10425_s1 + $0x274] sm:$0xf0] }
 0x10d   :  { %v6610_v30 = vld [vmem:[%s10425_s1 + $0x374] sm:$0xf0]  ;;  %v4365_v35 = vld [vmem:[%s10425_s1 + $0x48] sm:$0xf] }
 0x10e   :  { %3513 = vmatmul.bf16.vlgmr.msrb.gmra.mxu0 %v7053_v52  ;;  %3526 = vmatmul.bf16.vlgmr.msrb.gmra.mxu1 %v7055_v58  ;;  %v3320_v22 = vadd.f32 %v3319_v17, %v3307_v15  ;;  %v6510_v36 = vld [vmem:[%s10425_s1 + $0x54] sm:$0xf0]  ;;  %v4493_v37 = vld [vmem:[%s10425_s1 + $0x148] sm:$0xf] }
 0x10f   :  { %3557 = vmatpush.bf16.msra.mxu0 %v4446_v31  ;;  %3570 = vmatpush.bf16.msra.mxu1 %v4574_v32  ;;  %v4382_v31 = vor.u32 %v6514_v21, %v4381_v20  ;;  %v4510_v32 = vor.u32 %v6546_v23, %v4509_v48  ;;  %v6542_v40 = vld [vmem:[%s10425_s1 + $0x154] sm:$0xf0]  ;;  %v4621_v41 = vld [vmem:[%s10425_s1 + $0x248] sm:$0xf]  ;;  %v4366_v49 = vor.u32 %v6510_v36, %v4365_v35 }
 0x110   :  { %3583 = vmatpush.bf16.msra.mxu2 %v4702_v33  ;;  %3596 = vmatpush.bf16.msra.mxu3 %v4830_v38  ;;  %v4638_v33 = vor.u32 %v6578_v25, %v4637_v24  ;;  %v4766_v38 = vor.u32 %v6610_v30, %v4765_v26  ;;  %v6574_v42 = vld [vmem:[%s10425_s1 + $0x254] sm:$0xf0]  ;;  %v4349_v55 = vld [vmem:[%s10425_s1 + $0x28] sm:$0xf] }
 0x111   :  { %3539 = vmatmul.bf16.vlgmr.msrb.gmra.mxu2 %v7054_v57  ;;  %3552 = vmatmul.bf16.vlgmr.msrb.gmra.mxu3 %v7056_v62  ;;  %v4622_v54 = vor.u32 %v6574_v42, %v4621_v41  ;;  %v6506_v56 = vld [vmem:[%s10425_s1 + $0x34] sm:$0xf0]  ;;  %v4477_v57 = vld [vmem:[%s10425_s1 + $0x128] sm:$0xf] }
 0x112   :  { %v6538_v59 = vld [vmem:[%s10425_s1 + $0x134] sm:$0xf0]  ;;  %v4605_v61 = vld [vmem:[%s10425_s1 + $0x228] sm:$0xf] }
 0x113   :  { %3558 = vmatpush.bf16.msra.mxu0 %v4430_v44  ;;  %3571 = vmatpush.bf16.msra.mxu1 %v4558_v45  ;;  %v4749_v45 = vld [vmem:[%s10425_s1 + $0x348] sm:$0xf]  ;;  %v3308_v47 = vpop.f32.mrf.mxu0  ;;  %v3321_v50 = vpop.f32.mrf.mxu1  ;;  %v6570_v62 = vld [vmem:[%s10425_s1 + $0x234] sm:$0xf0]  ;;  %v4478_v7 = vor.u32 %v6538_v59, %v4477_v57 }
 0x114   :  { %3584 = vmatpush.bf16.msra.mxu2 %v4686_v46  ;;  %3597 = vmatpush.bf16.msra.mxu3 %v4814_v53  ;;  %v3332_v39 = vpop.f32.mrf.mxu2  ;;  %v3345_v44 = vpop.f32.mrf.mxu3  ;;  %v6606_v46 = vld [vmem:[%s10425_s1 + $0x354] sm:$0xf0]  ;;  %v4494_v53 = vor.u32 %v6542_v40, %v4493_v37  ;;  %v4333_v5 = vld [vmem:[%s10425_s1 + $0x8] sm:$0xf] }
 0x115   :  { %v3333_v43 = vadd.f32 %v3332_v39, %v3320_v22  ;;  %v4750_v58 = vor.u32 %v6606_v46, %v4749_v45  ;;  %v6502_v6 = vld [vmem:[%s10425_s1 + $0x14] sm:$0xf0]  ;;  %v4461_v9 = vld [vmem:[%s10425_s1 + $0x108] sm:$0xf] }
 0x116   :  { %v6534_v10 = vld [vmem:[%s10425_s1 + $0x114] sm:$0xf0]  ;;  %v4589_v11 = vld [vmem:[%s10425_s1 + $0x208] sm:$0xf]  ;;  %v4334_v21 = vor.u32 %v6502_v6, %v4333_v5  ;;  %v7057_v5 = vld [vmem:[%s10426_s2] sm:$0xf] }
 0x117   :  { %3559 = vmatpush.bf16.msra.mxu0 %v4414_v63  ;;  %3572 = vmatpush.bf16.msra.mxu1 %v4542_v3  ;;  %v8859_v52 = vadd.f32 %v3345_v44, %v3333_v43  ;;  %v4733_v63 = vld [vmem:[%s10425_s1 + $0x328] sm:$0xf]  ;;  %v6602_v3 = vld [vmem:[%s10425_s1 + $0x334] sm:$0xf0]  ;;  %v4462_v23 = vor.u32 %v6534_v10, %v4461_v9  ;;  %v538_v6 = vperm.slane %v7057_v5, 1 }
 0x118   :  { %3585 = vmatpush.bf16.msra.mxu2 %v4670_v4  ;;  %3598 = vmatpush.bf16.msra.mxu3 %v4798_v8  ;;  %v4350_v4 = vor.u32 %v6506_v56, %v4349_v55  ;;  %v4606_v8 = vor.u32 %v6570_v62, %v4605_v61  ;;  %v4734_v12 = vor.u32 %v6602_v3, %v4733_v63  ;;  %v6566_v13 = vld [vmem:[%s10425_s1 + $0x214] sm:$0xf0]  ;;  %v4717_v14 = vld [vmem:[%s10425_s1 + $0x308] sm:$0xf] }
 0x119   :  { %v6598_v15 = vld [vmem:[%s10425_s1 + $0x314] sm:$0xf0]  ;;  %v4957_v17 = vld [vmem:[%s10425_s1 + $0x4e8] sm:$0xf]  ;;  %v4590_v24 = vor.u32 %v6566_v13, %v4589_v11 }
 0x11a   :  { %v6690_v48 = vld [vmem:[%s10425_s1 + $0x5f4] sm:$0xf0]  ;;  %v5341_v25 = vld [vmem:[%s10425_s1 + $0x7e8] sm:$0xf]  ;;  %v4718_v30 = vor.u32 %v6598_v15, %v4717_v14 }
 0x11b   :  { %3560 = vmatpush.bf16.msra.mxu0 %v4398_v16  ;;  %3573 = vmatpush.bf16.msra.mxu1 %v4526_v18  ;;  %v6658_v18 = vld [vmem:[%s10425_s1 + $0x4f4] sm:$0xf0]  ;;  %v4941_v35 = vld [vmem:[%s10425_s1 + $0x4c8] sm:$0xf] }
 0x11c   :  { %3586 = vmatpush.bf16.msra.mxu2 %v4654_v19  ;;  %3599 = vmatpush.bf16.msra.mxu3 %v4782_v51  ;;  %v3334_v16 = vpop.f32.mrf.mxu2  ;;  %v5085_v19 = vld [vmem:[%s10425_s1 + $0x5e8] sm:$0xf]  ;;  %v3347_v20 = vpop.f32.mrf.mxu3  ;;  %v6722_v22 = vld [vmem:[%s10425_s1 + $0x6f4] sm:$0xf0] }
 0x11d   :  { %v5213_v51 = vld [vmem:[%s10425_s1 + $0x6e8] sm:$0xf]  ;;  %v6754_v26 = vld [vmem:[%s10425_s1 + $0x7f4] sm:$0xf0] }
 0x11e   :  { %v6654_v36 = vld [vmem:[%s10425_s1 + $0x4d4] sm:$0xf0]  ;;  %v5069_v37 = vld [vmem:[%s10425_s1 + $0x5c8] sm:$0xf] }
 0x11f   :  { %3561 = vmatpush.bf16.msra.mxu0 %v4382_v31  ;;  %3574 = vmatpush.bf16.msra.mxu1 %v4510_v32  ;;  %v4958_v31 = vor.u32 %v6658_v18, %v4957_v17  ;;  %v5086_v32 = vor.u32 %v6690_v48, %v5085_v19  ;;  %v6686_v39 = vld [vmem:[%s10425_s1 + $0x5d4] sm:$0xf0]  ;;  %v5197_v40 = vld [vmem:[%s10425_s1 + $0x6c8] sm:$0xf]  ;;  %v4942_v44 = vor.u32 %v6654_v36, %v4941_v35 }
 0x120   :  { %3587 = vmatpush.bf16.msra.mxu2 %v4638_v33  ;;  %3600 = vmatpush.bf16.msra.mxu3 %v4766_v38  ;;  %v5214_v33 = vor.u32 %v6722_v22, %v5213_v51  ;;  %v5342_v38 = vor.u32 %v6754_v26, %v5341_v25  ;;  %v6718_v41 = vld [vmem:[%s10425_s1 + $0x6d4] sm:$0xf0]  ;;  %v5325_v42 = vld [vmem:[%s10425_s1 + $0x7c8] sm:$0xf]  ;;  %v5070_v45 = vor.u32 %v6686_v39, %v5069_v37 }
 0x121   :  { %v6750_v43 = vld [vmem:[%s10425_s1 + $0x7d4] sm:$0xf0]  ;;  %v5198_v46 = vor.u32 %v6718_v41, %v5197_v40  ;;  %v4925_v47 = vld [vmem:[%s10425_s1 + $0x4a8] sm:$0xf] }
 0x122   :  { %v5053_v50 = vld [vmem:[%s10425_s1 + $0x5a8] sm:$0xf]  ;;  %v6714_v56 = vld [vmem:[%s10425_s1 + $0x6b4] sm:$0xf0] }
 0x123   :  { %3562 = vmatpush.bf16.msra.mxu0 %v4366_v49  ;;  %3575 = vmatpush.bf16.msra.mxu1 %v4494_v53  ;;  %v6650_v49 = vld [vmem:[%s10425_s1 + $0x4b4] sm:$0xf0]  ;;  %v5326_v53 = vor.u32 %v6750_v43, %v5325_v42  ;;  %v5181_v55 = vld [vmem:[%s10425_s1 + $0x6a8] sm:$0xf] }
 0x124   :  { %3588 = vmatpush.bf16.msra.mxu2 %v4622_v54  ;;  %3601 = vmatpush.bf16.msra.mxu3 %v4750_v58  ;;  %v6682_v54 = vld [vmem:[%s10425_s1 + $0x5b4] sm:$0xf0]  ;;  %v5309_v57 = vld [vmem:[%s10425_s1 + $0x7a8] sm:$0xf]  ;;  %v4926_v59 = vor.u32 %v6650_v49, %v4925_v47  ;;  %v5182_v63 = vor.u32 %v6714_v56, %v5181_v55 }
 0x125   :  { %v6746_v58 = vld [vmem:[%s10425_s1 + $0x7b4] sm:$0xf0]  ;;  %v4909_v61 = vld [vmem:[%s10425_s1 + $0x488] sm:$0xf]  ;;  %v5054_v62 = vor.u32 %v6682_v54, %v5053_v50 }
 0x126   :  { %v6646_v3 = vld [vmem:[%s10425_s1 + $0x494] sm:$0xf0]  ;;  %v5165_v9 = vld [vmem:[%s10425_s1 + $0x688] sm:$0xf] }
 0x127   :  { %3563 = vmatpush.bf16.msra.mxu0 %v4350_v4  ;;  %3576 = vmatpush.bf16.msra.mxu1 %v4478_v7  ;;  %v5037_v4 = vld [vmem:[%s10425_s1 + $0x588] sm:$0xf]  ;;  %v5310_v7 = vor.u32 %v6746_v58, %v5309_v57  ;;  %v6710_v10 = vld [vmem:[%s10425_s1 + $0x694] sm:$0xf0]  ;;  %v4910_v13 = vor.u32 %v6646_v3, %v4909_v61 }
 0x128   :  { %3589 = vmatpush.bf16.msra.mxu2 %v4606_v8  ;;  %3602 = vmatpush.bf16.msra.mxu3 %v4734_v12  ;;  %v6678_v8 = vld [vmem:[%s10425_s1 + $0x594] sm:$0xf0]  ;;  %v5293_v11 = vld [vmem:[%s10425_s1 + $0x788] sm:$0xf]  ;;  %v5166_v16 = vor.u32 %v6710_v10, %v5165_v9 }
 0x129   :  { %v6742_v12 = vld [vmem:[%s10425_s1 + $0x794] sm:$0xf0]  ;;  %v5038_v15 = vor.u32 %v6678_v8, %v5037_v4  ;;  %v4893_v17 = vld [vmem:[%s10425_s1 + $0x468] sm:$0xf] }
 0x12a   :  { %v6642_v18 = vld [vmem:[%s10425_s1 + $0x474] sm:$0xf0]  ;;  %v5021_v19 = vld [vmem:[%s10425_s1 + $0x568] sm:$0xf]  ;;  %v5294_v48 = vor.u32 %v6742_v12, %v5293_v11 }
 0x12b   :  { %3564 = vmatpush.bf16.msra.mxu0 %v4334_v21  ;;  %3577 = vmatpush.bf16.msra.mxu1 %v4462_v23  ;;  %v3358_v14 = vpop.f32.mrf.mxu0  ;;  %v3371_v21 = vpop.f32.mrf.mxu1  ;;  %v6674_v51 = vld [vmem:[%s10425_s1 + $0x574] sm:$0xf0]  ;;  %v5149_v22 = vld [vmem:[%s10425_s1 + $0x668] sm:$0xf] }
 0x12c   :  { %3590 = vmatpush.bf16.msra.mxu2 %v4590_v24  ;;  %3603 = vmatpush.bf16.msra.mxu3 %v4718_v30  ;;  %v3359_v20 = vadd.f32 %v3358_v14, %v538_v6  ;;  %v6706_v23 = vld [vmem:[%s10425_s1 + $0x674] sm:$0xf0]  ;;  %v5277_v24 = vld [vmem:[%s10425_s1 + $0x768] sm:$0xf]  ;;  %v4894_v30 = vor.u32 %v6642_v18, %v4893_v17 }
 0x12d   :  { %v6738_v25 = vld [vmem:[%s10425_s1 + $0x774] sm:$0xf0]  ;;  %v5005_v36 = vld [vmem:[%s10425_s1 + $0x548] sm:$0xf] }
 0x12e   :  { %3565 = vmatmul.bf16.vlgmr.msra.gmra.mxu0 %v7452_v28  ;;  %3578 = vmatmul.bf16.vlgmr.msra.gmra.mxu1 %v7462_v34  ;;  %v3372_v26 = vadd.f32 %v3371_v21, %v3359_v20  ;;  %v6638_v35 = vld [vmem:[%s10425_s1 + $0x454] sm:$0xf0]  ;;  %v5133_v40 = vld [vmem:[%s10425_s1 + $0x648] sm:$0xf] }
 0x12f   :  { %3609 = vmatpush.bf16.msrb.mxu0 %v4958_v31  ;;  %3622 = vmatpush.bf16.msrb.mxu1 %v5086_v32  ;;  %v5022_v31 = vor.u32 %v6674_v51, %v5021_v19  ;;  %v5150_v32 = vor.u32 %v6706_v23, %v5149_v22  ;;  %v6670_v39 = vld [vmem:[%s10425_s1 + $0x554] sm:$0xf0]  ;;  %v4861_v54 = vld [vmem:[%s10425_s1 + $0x428] sm:$0xf] }
 0x130   :  { %3635 = vmatpush.bf16.msrb.mxu2 %v5214_v33  ;;  %3648 = vmatpush.bf16.msrb.mxu3 %v5342_v38  ;;  %v4877_v33 = vld [vmem:[%s10425_s1 + $0x448] sm:$0xf]  ;;  %v5278_v38 = vor.u32 %v6738_v25, %v5277_v24  ;;  %v6702_v41 = vld [vmem:[%s10425_s1 + $0x654] sm:$0xf0]  ;;  %v5006_v50 = vor.u32 %v6670_v39, %v5005_v36 }
 0x131   :  { %3591 = vmatmul.bf16.vlgmr.msra.gmra.mxu2 %v7450_v27  ;;  %3604 = vmatmul.bf16.vlgmr.msra.gmra.mxu3 %v7454_v29  ;;  %v6634_v55 = vld [vmem:[%s10425_s1 + $0x434] sm:$0xf0]  ;;  %v4989_v56 = vld [vmem:[%s10425_s1 + $0x528] sm:$0xf] }
 0x132   :  { %v5117_v61 = vld [vmem:[%s10425_s1 + $0x628] sm:$0xf]  ;;  %v6730_v3 = vld [vmem:[%s10425_s1 + $0x734] sm:$0xf0]  ;;  %v4862_v4 = vor.u32 %v6634_v55, %v4861_v54 }
 0x133   :  { %3610 = vmatpush.bf16.msrb.mxu0 %v4942_v44  ;;  %3623 = vmatpush.bf16.msrb.mxu1 %v5070_v45  ;;  %v5261_v44 = vld [vmem:[%s10425_s1 + $0x748] sm:$0xf]  ;;  %v6734_v45 = vld [vmem:[%s10425_s1 + $0x754] sm:$0xf0]  ;;  %v3360_v49 = vpop.f32.mrf.mxu0  ;;  %v3373_v57 = vpop.f32.mrf.mxu1 }
 0x134   :  { %3636 = vmatpush.bf16.msrb.mxu2 %v5198_v46  ;;  %3649 = vmatpush.bf16.msrb.mxu3 %v5326_v53  ;;  %v3384_v37 = vpop.f32.mrf.mxu2  ;;  %v3397_v43 = vpop.f32.mrf.mxu3  ;;  %v4878_v46 = vor.u32 %v6638_v35, %v4877_v33  ;;  %v5134_v53 = vor.u32 %v6702_v41, %v5133_v40  ;;  %v5262_v58 = vor.u32 %v6734_v45, %v5261_v44  ;;  %v4845_v5 = vld [vmem:[%s10425_s1 + $0x408] sm:$0xf]  ;;  %v6630_v6 = vld [vmem:[%s10425_s1 + $0x414] sm:$0xf0] }
 0x135   :  { %v3385_v42 = vadd.f32 %v3384_v37, %v3372_v26  ;;  %v4973_v9 = vld [vmem:[%s10425_s1 + $0x508] sm:$0xf]  ;;  %v6662_v10 = vld [vmem:[%s10425_s1 + $0x514] sm:$0xf0]  ;;  %v4846_v21 = vor.u32 %v6630_v6, %v4845_v5 }
 0x136   :  { %v5101_v11 = vld [vmem:[%s10425_s1 + $0x608] sm:$0xf]  ;;  %v6694_v14 = vld [vmem:[%s10425_s1 + $0x614] sm:$0xf0]  ;;  %v4974_v23 = vor.u32 %v6662_v10, %v4973_v9 }
 0x137   :  { %3611 = vmatpush.bf16.msrb.mxu0 %v4926_v59  ;;  %3624 = vmatpush.bf16.msrb.mxu1 %v5054_v62  ;;  %v9060_v47 = vadd.f32 %v3397_v43, %v3385_v42  ;;  %v6666_v59 = vld [vmem:[%s10425_s1 + $0x534] sm:$0xf0]  ;;  %v5469_v18 = vld [vmem:[%s10425_s1 + $0x8e8] sm:$0xf]  ;;  %v5102_v24 = vor.u32 %v6694_v14, %v5101_v11 }
 0x138   :  { %3637 = vmatpush.bf16.msrb.mxu2 %v5182_v63  ;;  %3650 = vmatpush.bf16.msrb.mxu3 %v5310_v7  ;;  %v6698_v62 = vld [vmem:[%s10425_s1 + $0x634] sm:$0xf0]  ;;  %v5245_v63 = vld [vmem:[%s10425_s1 + $0x728] sm:$0xf]  ;;  %v4990_v7 = vor.u32 %v6666_v59, %v4989_v56 }
 0x139   :  { %v5118_v8 = vor.u32 %v6698_v62, %v5117_v61  ;;  %v6786_v19 = vld [vmem:[%s10425_s1 + $0x8f4] sm:$0xf0]  ;;  %v5597_v20 = vld [vmem:[%s10425_s1 + $0x9e8] sm:$0xf] }
 0x13a   :  { %v5725_v51 = vld [vmem:[%s10425_s1 + $0xae8] sm:$0xf]  ;;  %v6850_v22 = vld [vmem:[%s10425_s1 + $0xaf4] sm:$0xf0] }
 0x13b   :  { %3612 = vmatpush.bf16.msrb.mxu0 %v4910_v13  ;;  %3625 = vmatpush.bf16.msrb.mxu1 %v5038_v15  ;;  %v5246_v13 = vor.u32 %v6730_v3, %v5245_v63  ;;  %v5229_v15 = vld [vmem:[%s10425_s1 + $0x708] sm:$0xf]  ;;  %v6882_v26 = vld [vmem:[%s10425_s1 + $0xbf4] sm:$0xf0]  ;;  %v5726_v33 = vor.u32 %v6850_v22, %v5725_v51 }
 0x13c   :  { %3638 = vmatpush.bf16.msrb.mxu2 %v5166_v16  ;;  %3651 = vmatpush.bf16.msrb.mxu3 %v5294_v48  ;;  %v3386_v12 = vpop.f32.mrf.mxu2  ;;  %v6726_v16 = vld [vmem:[%s10425_s1 + $0x714] sm:$0xf0]  ;;  %v3399_v17 = vpop.f32.mrf.mxu3  ;;  %v5853_v25 = vld [vmem:[%s10425_s1 + $0xbe8] sm:$0xf] }
 0x13d   :  { %v6818_v48 = vld [vmem:[%s10425_s1 + $0x9f4] sm:$0xf0]  ;;  %v5453_v35 = vld [vmem:[%s10425_s1 + $0x8c8] sm:$0xf] }
 0x13e   :  { %v6782_v36 = vld [vmem:[%s10425_s1 + $0x8d4] sm:$0xf0]  ;;  %v5581_v37 = vld [vmem:[%s10425_s1 + $0x9c8] sm:$0xf] }
 0x13f   :  { %3613 = vmatpush.bf16.msrb.mxu0 %v4894_v30  ;;  %3626 = vmatpush.bf16.msrb.mxu1 %v5022_v31  ;;  %v5230_v30 = vor.u32 %v6726_v16, %v5229_v15  ;;  %v5470_v31 = vor.u32 %v6786_v19, %v5469_v18  ;;  %v6814_v39 = vld [vmem:[%s10425_s1 + $0x9d4] sm:$0xf0]  ;;  %v5709_v40 = vld [vmem:[%s10425_s1 + $0xac8] sm:$0xf]  ;;  %v5454_v44 = vor.u32 %v6782_v36, %v5453_v35 }
 0x140   :  { %3639 = vmatpush.bf16.msrb.mxu2 %v5150_v32  ;;  %3652 = vmatpush.bf16.msrb.mxu3 %v5278_v38  ;;  %v5598_v32 = vor.u32 %v6818_v48, %v5597_v20  ;;  %v5854_v38 = vor.u32 %v6882_v26, %v5853_v25  ;;  %v6846_v41 = vld [vmem:[%s10425_s1 + $0xad4] sm:$0xf0]  ;;  %v5837_v42 = vld [vmem:[%s10425_s1 + $0xbc8] sm:$0xf]  ;;  %v5582_v45 = vor.u32 %v6814_v39, %v5581_v37 }
 0x141   :  { %v6878_v43 = vld [vmem:[%s10425_s1 + $0xbd4] sm:$0xf0]  ;;  %v5437_v49 = vld [vmem:[%s10425_s1 + $0x8a8] sm:$0xf] }
 0x142   :  { %v5838_v54 = vor.u32 %v6878_v43, %v5837_v42  ;;  %v6810_v55 = vld [vmem:[%s10425_s1 + $0x9b4] sm:$0xf0]  ;;  %v5693_v56 = vld [vmem:[%s10425_s1 + $0xaa8] sm:$0xf] }
 0x143   :  { %3614 = vmatpush.bf16.msrb.mxu0 %v4878_v46  ;;  %3627 = vmatpush.bf16.msrb.mxu1 %v5006_v50  ;;  %v5710_v46 = vor.u32 %v6846_v41, %v5709_v40  ;;  %v6778_v50 = vld [vmem:[%s10425_s1 + $0x8b4] sm:$0xf0]  ;;  %v5421_v3 = vld [vmem:[%s10425_s1 + $0x888] sm:$0xf] }
 0x144   :  { %3640 = vmatpush.bf16.msrb.mxu2 %v5134_v53  ;;  %3653 = vmatpush.bf16.msrb.mxu3 %v5262_v58  ;;  %v5565_v53 = vld [vmem:[%s10425_s1 + $0x9a8] sm:$0xf]  ;;  %v6842_v57 = vld [vmem:[%s10425_s1 + $0xab4] sm:$0xf0]  ;;  %v5438_v61 = vor.u32 %v6778_v50, %v5437_v49 }
 0x145   :  { %v5821_v58 = vld [vmem:[%s10425_s1 + $0xba8] sm:$0xf]  ;;  %v6874_v59 = vld [vmem:[%s10425_s1 + $0xbb4] sm:$0xf0]  ;;  %v5566_v62 = vor.u32 %v6810_v55, %v5565_v53  ;;  %v5694_v63 = vor.u32 %v6842_v57, %v5693_v56 }
 0x146   :  { %v5549_v5 = vld [vmem:[%s10425_s1 + $0x988] sm:$0xf]  ;;  %v5822_v6 = vor.u32 %v6874_v59, %v5821_v58  ;;  %v6838_v9 = vld [vmem:[%s10425_s1 + $0xa94] sm:$0xf0] }
 0x147   :  { %3615 = vmatpush.bf16.msrb.mxu0 %v4862_v4  ;;  %3628 = vmatpush.bf16.msrb.mxu1 %v4990_v7  ;;  %v6774_v4 = vld [vmem:[%s10425_s1 + $0x894] sm:$0xf0]  ;;  %v5805_v10 = vld [vmem:[%s10425_s1 + $0xb88] sm:$0xf] }
 0x148   :  { %3641 = vmatpush.bf16.msrb.mxu2 %v5118_v8  ;;  %3654 = vmatpush.bf16.msrb.mxu3 %v5246_v13  ;;  %v6806_v7 = vld [vmem:[%s10425_s1 + $0x994] sm:$0xf0]  ;;  %v5677_v8 = vld [vmem:[%s10425_s1 + $0xa88] sm:$0xf]  ;;  %v5422_v12 = vor.u32 %v6774_v4, %v5421_v3 }
 0x149   :  { %v6870_v11 = vld [vmem:[%s10425_s1 + $0xb94] sm:$0xf0]  ;;  %v5550_v14 = vor.u32 %v6806_v7, %v5549_v5  ;;  %v5678_v15 = vor.u32 %v6838_v9, %v5677_v8  ;;  %v5405_v16 = vld [vmem:[%s10425_s1 + $0x868] sm:$0xf] }
 0x14a   :  { %v6770_v17 = vld [vmem:[%s10425_s1 + $0x874] sm:$0xf0]  ;;  %v5533_v18 = vld [vmem:[%s10425_s1 + $0x968] sm:$0xf] }
 0x14b   :  { %3616 = vmatpush.bf16.msrb.mxu0 %v4846_v21  ;;  %3629 = vmatpush.bf16.msrb.mxu1 %v4974_v23  ;;  %v3410_v13 = vpop.f32.mrf.mxu0  ;;  %v3423_v20 = vpop.f32.mrf.mxu1  ;;  %v5806_v21 = vor.u32 %v6870_v11, %v5805_v10  ;;  %v6802_v48 = vld [vmem:[%s10425_s1 + $0x974] sm:$0xf0]  ;;  %v5661_v51 = vld [vmem:[%s10425_s1 + $0xa68] sm:$0xf]  ;;  %v5406_v25 = vor.u32 %v6770_v17, %v5405_v16 }
 0x14c   :  { %3642 = vmatpush.bf16.msrb.mxu2 %v5102_v24  ;;  %3655 = vmatpush.bf16.msrb.mxu3 %v5230_v30  ;;  %v3411_v19 = vadd.f32 %v3410_v13, %v9060_v47  ;;  %v6834_v22 = vld [vmem:[%s10425_s1 + $0xa74] sm:$0xf0]  ;;  %v5789_v23 = vld [vmem:[%s10425_s1 + $0xb68] sm:$0xf]  ;;  %v5534_v26 = vor.u32 %v6802_v48, %v5533_v18 }
 0x14d   :  { %v6866_v47 = vld [vmem:[%s10425_s1 + $0xb74] sm:$0xf0]  ;;  %v5662_v30 = vor.u32 %v6834_v22, %v5661_v51  ;;  %v5773_v42 = vld [vmem:[%s10425_s1 + $0xb48] sm:$0xf] }
 0x14e   :  { %3617 = vmatmul.bf16.vlgmr.msrb.gmra.mxu0 %v7530_v0  ;;  %3630 = vmatmul.bf16.vlgmr.msrb.gmra.mxu1 %v7534_v2  ;;  %v3424_v24 = vadd.f32 %v3423_v20, %v3411_v19  ;;  %v5790_v36 = vor.u32 %v6866_v47, %v5789_v23  ;;  %v6798_v37 = vld [vmem:[%s10425_s1 + $0x954] sm:$0xf0]  ;;  %v5373_v53 = vld [vmem:[%s10425_s1 + $0x828] sm:$0xf] }
 0x14f   :  { %3661 = vmatpush.bf16.msra.mxu0 %v5470_v31  ;;  %3674 = vmatpush.bf16.msra.mxu1 %v5598_v32  ;;  %v5389_v31 = vld [vmem:[%s10425_s1 + $0x848] sm:$0xf]  ;;  %v6766_v32 = vld [vmem:[%s10425_s1 + $0x854] sm:$0xf0] }
 0x150   :  { %3687 = vmatpush.bf16.msra.mxu2 %v5726_v33  ;;  %3700 = vmatpush.bf16.msra.mxu3 %v5854_v38  ;;  %v5517_v33 = vld [vmem:[%s10425_s1 + $0x948] sm:$0xf]  ;;  %v6830_v39 = vld [vmem:[%s10425_s1 + $0xa54] sm:$0xf0] }
 0x151   :  { %3643 = vmatmul.bf16.vlgmr.msrb.gmra.mxu2 %v7525_v60  ;;  %3656 = vmatmul.bf16.vlgmr.msrb.gmra.mxu3 %v7532_v1  ;;  %v5645_v38 = vld [vmem:[%s10425_s1 + $0xa48] sm:$0xf]  ;;  %v6862_v43 = vld [vmem:[%s10425_s1 + $0xb54] sm:$0xf0]  ;;  %v5518_v49 = vor.u32 %v6798_v37, %v5517_v33 }
 0x152   :  { %v5646_v50 = vor.u32 %v6830_v39, %v5645_v38  ;;  %v5501_v55 = vld [vmem:[%s10425_s1 + $0x928] sm:$0xf]  ;;  %v5774_v57 = vor.u32 %v6862_v43, %v5773_v42  ;;  %v6794_v58 = vld [vmem:[%s10425_s1 + $0x934] sm:$0xf0] }
 0x153   :  { %3662 = vmatpush.bf16.msra.mxu0 %v5454_v44  ;;  %3675 = vmatpush.bf16.msra.mxu1 %v5582_v45  ;;  %v5390_v44 = vor.u32 %v6766_v32, %v5389_v31  ;;  %v3425_v56 = vpop.f32.mrf.mxu1  ;;  %v5629_v59 = vld [vmem:[%s10425_s1 + $0xa28] sm:$0xf]  ;;  %v6758_v5 = vld [vmem:[%s10425_s1 + $0x814] sm:$0xf0] }
 0x154   :  { %3688 = vmatpush.bf16.msra.mxu2 %v5710_v46  ;;  %3701 = vmatpush.bf16.msra.mxu3 %v5838_v54  ;;  %v3436_v35 = vpop.f32.mrf.mxu2  ;;  %v3449_v41 = vpop.f32.mrf.mxu3  ;;  %v6762_v54 = vld [vmem:[%s10425_s1 + $0x834] sm:$0xf0]  ;;  %v5357_v4 = vld [vmem:[%s10425_s1 + $0x808] sm:$0xf] }
 0x155   :  { %v3437_v40 = vadd.f32 %v3436_v35, %v3424_v24  ;;  %v3412_v46 = vpop.f32.mrf.mxu0  ;;  %v5374_v3 = vor.u32 %v6762_v54, %v5373_v53  ;;  %v5485_v8 = vld [vmem:[%s10425_s1 + $0x908] sm:$0xf]  ;;  %v6790_v9 = vld [vmem:[%s10425_s1 + $0x914] sm:$0xf0]  ;;  %v5358_v20 = vor.u32 %v6758_v5, %v5357_v4  ;;  %v7058_v53 = vld [vmem:[#allocation1] sm:$0xff] }
 0x156   :  { %v5613_v10 = vld [vmem:[%s10425_s1 + $0xa08] sm:$0xf]  ;;  %v6822_v13 = vld [vmem:[%s10425_s1 + $0xa14] sm:$0xf0]  ;;  %v5486_v22 = vor.u32 %v6790_v9, %v5485_v8 }
 0x157   :  { %3663 = vmatpush.bf16.msra.mxu0 %v5438_v61  ;;  %3676 = vmatpush.bf16.msra.mxu1 %v5566_v62  ;;  %v9259_v45 = vadd.f32 %v3449_v41, %v3437_v40  ;;  %v6826_v61 = vld [vmem:[%s10425_s1 + $0xa34] sm:$0xf0]  ;;  %v5757_v62 = vld [vmem:[%s10425_s1 + $0xb28] sm:$0xf]  ;;  %v5614_v23 = vor.u32 %v6822_v13, %v5613_v10 }
 0x158   :  { %3689 = vmatpush.bf16.msra.mxu2 %v5694_v63  ;;  %3702 = vmatpush.bf16.msra.mxu3 %v5822_v6  ;;  %v6858_v63 = vld [vmem:[%s10425_s1 + $0xb34] sm:$0xf0]  ;;  %v5502_v6 = vor.u32 %v6794_v58, %v5501_v55  ;;  %v5630_v7 = vor.u32 %v6826_v61, %v5629_v59  ;;  %v5981_v17 = vld [vmem:[%s10425_s1 + $0xce8] sm:$0xf] }
 0x159   :  { %v6914_v18 = vld [vmem:[%s10425_s1 + $0xcf4] sm:$0xf0]  ;;  %v6109_v19 = vld [vmem:[%s10425_s1 + $0xde8] sm:$0xf] }
 0x15a   :  { %v6237_v48 = vld [vmem:[%s10425_s1 + $0xee8] sm:$0xf]  ;;  %v6978_v51 = vld [vmem:[%s10425_s1 + $0xef4] sm:$0xf0] }
 0x15b   :  { %3664 = vmatpush.bf16.msra.mxu0 %v5422_v12  ;;  %3677 = vmatpush.bf16.msra.mxu1 %v5550_v14  ;;  %v5758_v12 = vor.u32 %v6858_v63, %v5757_v62  ;;  %v5741_v14 = vld [vmem:[%s10425_s1 + $0xb08] sm:$0xf]  ;;  %v7010_v24 = vld [vmem:[%s10425_s1 + $0xff4] sm:$0xf0]  ;;  %v6238_v31 = vor.u32 %v6978_v51, %v6237_v48 }
 0x15c   :  { %3690 = vmatpush.bf16.msra.mxu2 %v5678_v15  ;;  %3703 = vmatpush.bf16.msra.mxu3 %v5806_v21  ;;  %v3438_v11 = vpop.f32.mrf.mxu2  ;;  %v6854_v15 = vld [vmem:[%s10425_s1 + $0xb14] sm:$0xf0]  ;;  %v3451_v16 = vpop.f32.mrf.mxu3  ;;  %v6365_v47 = vld [vmem:[%s10425_s1 + $0xfe8] sm:$0xf] }
 0x15d   :  { %v6946_v21 = vld [vmem:[%s10425_s1 + $0xdf4] sm:$0xf0]  ;;  %v5965_v32 = vld [vmem:[%s10425_s1 + $0xcc8] sm:$0xf] }
 0x15e   :  { %v6910_v33 = vld [vmem:[%s10425_s1 + $0xcd4] sm:$0xf0]  ;;  %v6093_v35 = vld [vmem:[%s10425_s1 + $0xdc8] sm:$0xf] }
 0x15f   :  { %3665 = vmatpush.bf16.msra.mxu0 %v5406_v25  ;;  %3678 = vmatpush.bf16.msra.mxu1 %v5534_v26  ;;  %v5742_v25 = vor.u32 %v6854_v15, %v5741_v14  ;;  %v5982_v26 = vor.u32 %v6914_v18, %v5981_v17  ;;  %v6942_v37 = vld [vmem:[%s10425_s1 + $0xdd4] sm:$0xf0]  ;;  %v6221_v38 = vld [vmem:[%s10425_s1 + $0xec8] sm:$0xf]  ;;  %v5966_v42 = vor.u32 %v6910_v33, %v5965_v32 }
 0x160   :  { %3691 = vmatpush.bf16.msra.mxu2 %v5662_v30  ;;  %3704 = vmatpush.bf16.msra.mxu3 %v5790_v36  ;;  %v6110_v30 = vor.u32 %v6946_v21, %v6109_v19  ;;  %v6366_v36 = vor.u32 %v7010_v24, %v6365_v47  ;;  %v6974_v39 = vld [vmem:[%s10425_s1 + $0xed4] sm:$0xf0]  ;;  %v6349_v40 = vld [vmem:[%s10425_s1 + $0xfc8] sm:$0xf]  ;;  %v6094_v43 = vor.u32 %v6942_v37, %v6093_v35 }
 0x161   :  { %v7006_v41 = vld [vmem:[%s10425_s1 + $0xfd4] sm:$0xf0]  ;;  %v5949_v46 = vld [vmem:[%s10425_s1 + $0xca8] sm:$0xf] }
 0x162   :  { %v6350_v54 = vor.u32 %v7006_v41, %v6349_v40  ;;  %v6938_v55 = vld [vmem:[%s10425_s1 + $0xdb4] sm:$0xf0]  ;;  %v6205_v56 = vld [vmem:[%s10425_s1 + $0xea8] sm:$0xf] }
 0x163   :  { %3666 = vmatpush.bf16.msra.mxu0 %v5390_v44  ;;  %3679 = vmatpush.bf16.msra.mxu1 %v5518_v49  ;;  %v6222_v44 = vor.u32 %v6974_v39, %v6221_v38  ;;  %v6906_v49 = vld [vmem:[%s10425_s1 + $0xcb4] sm:$0xf0]  ;;  %v7060_v59 = vld [vmem:[#allocation1 + $0x9] sm:$0xff] }
 0x164   :  { %3692 = vmatpush.bf16.msra.mxu2 %v5646_v50  ;;  %3705 = vmatpush.bf16.msra.mxu3 %v5774_v57  ;;  %v6077_v50 = vld [vmem:[%s10425_s1 + $0xda8] sm:$0xf]  ;;  %v6970_v57 = vld [vmem:[%s10425_s1 + $0xeb4] sm:$0xf0] }
 0x165   :  { %v7059_v58 = vld [vmem:[#allocation1 + $0x12] sm:$0xff]  ;;  %v6333_v61 = vld [vmem:[%s10425_s1 + $0xfa8] sm:$0xf]  ;;  %v7061_v63 = vld [vmem:[#allocation1 + $0x1b] sm:$0xff]  ;;  %v6078_v4 = vor.u32 %v6938_v55, %v6077_v50  ;;  %v6206_v5 = vor.u32 %v6970_v57, %v6205_v56 }
 0x166   :  { %v7002_v62 = vld [vmem:[%s10425_s1 + $0xfb4] sm:$0xf0]  ;;  %v6061_v8 = vld [vmem:[%s10425_s1 + $0xd88] sm:$0xf] }
 0x167   :  { %3667 = vmatpush.bf16.msra.mxu0 %v5374_v3  ;;  %3680 = vmatpush.bf16.msra.mxu1 %v5502_v6  ;;  %v5950_v3 = vor.u32 %v6906_v49, %v5949_v46  ;;  %v5933_v6 = vld [vmem:[%s10425_s1 + $0xc88] sm:$0xf]  ;;  %v6334_v9 = vor.u32 %v7002_v62, %v6333_v61  ;;  %v6934_v10 = vld [vmem:[%s10425_s1 + $0xd94] sm:$0xf0] }
 0x168   :  { %3693 = vmatpush.bf16.msra.mxu2 %v5630_v7  ;;  %3706 = vmatpush.bf16.msra.mxu3 %v5758_v12  ;;  %v6902_v7 = vld [vmem:[%s10425_s1 + $0xc94] sm:$0xf0]  ;;  %v6189_v11 = vld [vmem:[%s10425_s1 + $0xe88] sm:$0xf]  ;;  %v6062_v19 = vor.u32 %v6934_v10, %v6061_v8 }
 0x169   :  { %v6966_v12 = vld [vmem:[%s10425_s1 + $0xe94] sm:$0xf0]  ;;  %v6317_v14 = vld [vmem:[%s10425_s1 + $0xf88] sm:$0xf]  ;;  %v5934_v17 = vor.u32 %v6902_v7, %v5933_v6 }
 0x16a   :  { %v6998_v15 = vld [vmem:[%s10425_s1 + $0xf94] sm:$0xf0]  ;;  %v5917_v21 = vld [vmem:[%s10425_s1 + $0xc68] sm:$0xf] }
 0x16b   :  { %3668 = vmatpush.bf16.msra.mxu0 %v5358_v20  ;;  %3681 = vmatpush.bf16.msra.mxu1 %v5486_v22  ;;  %v3462_v13 = vpop.f32.mrf.mxu0  ;;  %v3475_v18 = vpop.f32.mrf.mxu1  ;;  %v6190_v20 = vor.u32 %v6966_v12, %v6189_v11  ;;  %v6898_v48 = vld [vmem:[%s10425_s1 + $0xc74] sm:$0xf0]  ;;  %v6045_v51 = vld [vmem:[%s10425_s1 + $0xd68] sm:$0xf] }
 0x16c   :  { %3694 = vmatpush.bf16.msra.mxu2 %v5614_v23  ;;  %3707 = vmatpush.bf16.msra.mxu3 %v5742_v25  ;;  %v3463_v16 = vadd.f32 %v3462_v13, %v9259_v45  ;;  %v6318_v45 = vor.u32 %v6998_v15, %v6317_v14  ;;  %v6930_v23 = vld [vmem:[%s10425_s1 + $0xd74] sm:$0xf0]  ;;  %v6173_v47 = vld [vmem:[%s10425_s1 + $0xe68] sm:$0xf] }
 0x16d   :  { %v6962_v24 = vld [vmem:[%s10425_s1 + $0xe74] sm:$0xf0]  ;;  %v6301_v25 = vld [vmem:[%s10425_s1 + $0xf68] sm:$0xf] }
 0x16e   :  { %3669 = vmatmul.bf16.vlgmr.msra.gmra.mxu0 %v7058_v53  ;;  %3682 = vmatmul.bf16.vlgmr.msra.gmra.mxu1 %v7060_v59  ;;  %v3476_v22 = vadd.f32 %v3475_v18, %v3463_v16  ;;  %v6174_v32 = vor.u32 %v6962_v24, %v6173_v47  ;;  %v5901_v33 = vld [vmem:[%s10425_s1 + $0xc48] sm:$0xf]  ;;  %v6894_v35 = vld [vmem:[%s10425_s1 + $0xc54] sm:$0xf0] }
 0x16f   :  { %3713 = vmatpush.bf16.msrb.mxu0 %v5982_v26  ;;  %3726 = vmatpush.bf16.msrb.mxu1 %v6110_v30  ;;  %v6994_v26 = vld [vmem:[%s10425_s1 + $0xf74] sm:$0xf0]  ;;  %v5918_v30 = vor.u32 %v6898_v48, %v5917_v21  ;;  %v6157_v40 = vld [vmem:[%s10425_s1 + $0xe48] sm:$0xf]  ;;  %v5902_v50 = vor.u32 %v6894_v35, %v5901_v33  ;;  %v6560_v21 = vld [vmem:[%s10425_s1 + $0x1ec] sm:$0xf] }
 0x170   :  { %3739 = vmatpush.bf16.msrb.mxu2 %v6238_v31  ;;  %3752 = vmatpush.bf16.msrb.mxu3 %v6366_v36  ;;  %v6046_v31 = vor.u32 %v6930_v23, %v6045_v51  ;;  %v6029_v36 = vld [vmem:[%s10425_s1 + $0xd48] sm:$0xf]  ;;  %v6302_v37 = vor.u32 %v6994_v26, %v6301_v25  ;;  %v6926_v39 = vld [vmem:[%s10425_s1 + $0xd54] sm:$0xf0]  ;;  %v4703_v23 = vld [vmem:[%s10425_s1 + $0x2f8] sm:$0xf0] }
 0x171   :  { %3695 = vmatmul.bf16.vlgmr.msra.gmra.mxu2 %v7059_v58  ;;  %3708 = vmatmul.bf16.vlgmr.msra.gmra.mxu3 %v7061_v63  ;;  %v6958_v41 = vld [vmem:[%s10425_s1 + $0xe54] sm:$0xf0]  ;;  %v6030_v55 = vor.u32 %v6926_v39, %v6029_v36  ;;  %v5885_v57 = vld [vmem:[%s10425_s1 + $0xc28] sm:$0xf]  ;;  %v6624_v25 = vld [vmem:[%s10425_s1 + $0x3ec] sm:$0xf] }
 0x172   :  { %v6990_v46 = vld [vmem:[%s10425_s1 + $0xf54] sm:$0xf0]  ;;  %v6158_v56 = vor.u32 %v6958_v41, %v6157_v40  ;;  %v6013_v59 = vld [vmem:[%s10425_s1 + $0xd28] sm:$0xf]  ;;  %v4831_v26 = vld [vmem:[%s10425_s1 + $0x3f8] sm:$0xf0] }
 0x173   :  { %3714 = vmatpush.bf16.msrb.mxu0 %v5966_v42  ;;  %3727 = vmatpush.bf16.msrb.mxu1 %v6094_v43  ;;  %v3464_v49 = vpop.f32.mrf.mxu0  ;;  %v3477_v53 = vpop.f32.mrf.mxu1  ;;  %v6890_v58 = vld [vmem:[%s10425_s1 + $0xc34] sm:$0xf0]  ;;  %v6141_v63 = vld [vmem:[%s10425_s1 + $0xe28] sm:$0xf]  ;;  %v6524_v35 = vld [vmem:[%s10425_s1 + $0xcc] sm:$0xf] }
 0x174   :  { %3740 = vmatpush.bf16.msrb.mxu2 %v6222_v44  ;;  %3753 = vmatpush.bf16.msrb.mxu3 %v6350_v54  ;;  %v3488_v38 = vpop.f32.mrf.mxu2  ;;  %v3501_v43 = vpop.f32.mrf.mxu3  ;;  %v6285_v44 = vld [vmem:[%s10425_s1 + $0xf48] sm:$0xf]  ;;  %v6922_v62 = vld [vmem:[%s10425_s1 + $0xd34] sm:$0xf0]  ;;  %v5886_v6 = vor.u32 %v6890_v58, %v5885_v57  ;;  %v4431_v36 = vld [vmem:[%s10425_s1 + $0xd8] sm:$0xf0] }
 0x175   :  { %v3489_v42 = vadd.f32 %v3488_v38, %v3476_v22  ;;  %v6286_v61 = vor.u32 %v6990_v46, %v6285_v44  ;;  %v5869_v7 = vld [vmem:[%s10425_s1 + $0xc08] sm:$0xf]  ;;  %v6886_v8 = vld [vmem:[%s10425_s1 + $0xc14] sm:$0xf0]  ;;  %v6592_v22 = vld [vmem:[%s10425_s1 + $0x2ec] sm:$0xf]  ;;  %v4834_v38 = vor.u32 %v6624_v25, %v4831_v26  ;;  %v4434_v44 = vor.u32 %v6524_v35, %v4431_v36 }
 0x176   :  { %v5997_v11 = vld [vmem:[%s10425_s1 + $0xd08] sm:$0xf]  ;;  %v6918_v12 = vld [vmem:[%s10425_s1 + $0xd14] sm:$0xf0]  ;;  %v5870_v51 = vor.u32 %v6886_v8, %v5869_v7  ;;  %v4706_v33 = vor.u32 %v6592_v22, %v4703_v23  ;;  %v4559_v39 = vld [vmem:[%s10425_s1 + $0x1d8] sm:$0xf0] }
 0x177   :  { %3715 = vmatpush.bf16.msrb.mxu0 %v5950_v3  ;;  %3728 = vmatpush.bf16.msrb.mxu1 %v6078_v4  ;;  %v9454_v54 = vadd.f32 %v3501_v43, %v3489_v42  ;;  %v6954_v3 = vld [vmem:[%s10425_s1 + $0xe34] sm:$0xf0]  ;;  %v6269_v4 = vld [vmem:[%s10425_s1 + $0xf28] sm:$0xf]  ;;  %v5998_v47 = vor.u32 %v6918_v12, %v5997_v11  ;;  %v6588_v40 = vld [vmem:[%s10425_s1 + $0x2cc] sm:$0xf] }
 0x178   :  { %3741 = vmatpush.bf16.msrb.mxu2 %v6206_v5  ;;  %3754 = vmatpush.bf16.msrb.mxu3 %v6334_v9  ;;  %v6986_v5 = vld [vmem:[%s10425_s1 + $0xf34] sm:$0xf0]  ;;  %v6014_v9 = vor.u32 %v6922_v62, %v6013_v59  ;;  %v6142_v10 = vor.u32 %v6954_v3, %v6141_v63  ;;  %v6125_v13 = vld [vmem:[%s10425_s1 + $0xe08] sm:$0xf]  ;;  %v4687_v41 = vld [vmem:[%s10425_s1 + $0x2d8] sm:$0xf0] }
 0x179   :  { %v6270_v14 = vor.u32 %v6986_v5, %v6269_v4  ;;  %v6950_v15 = vld [vmem:[%s10425_s1 + $0xe14] sm:$0xf0]  ;;  %v6253_v16 = vld [vmem:[%s10425_s1 + $0xf08] sm:$0xf]  ;;  %v6620_v42 = vld [vmem:[%s10425_s1 + $0x3cc] sm:$0xf]  ;;  %v4690_v49 = vor.u32 %v6588_v40, %v4687_v41 }
 0x17a   :  { %v6126_v24 = vor.u32 %v6950_v15, %v6125_v13  ;;  %v4815_v43 = vld [vmem:[%s10425_s1 + $0x3d8] sm:$0xf0]  ;;  %v6584_v59 = vld [vmem:[%s10425_s1 + $0x2ac] sm:$0xf] }
 0x17b   :  { %3716 = vmatpush.bf16.msrb.mxu0 %v5934_v17  ;;  %3729 = vmatpush.bf16.msrb.mxu1 %v6062_v19  ;;  %v6982_v17 = vld [vmem:[%s10425_s1 + $0xf14] sm:$0xf0]  ;;  %v6528_v19 = vld [vmem:[%s10425_s1 + $0xec] sm:$0xf]  ;;  %v4415_v53 = vld [vmem:[%s10425_s1 + $0xb8] sm:$0xf0]  ;;  %v4818_v57 = vor.u32 %v6620_v42, %v4815_v43 }
 0x17c   :  { %3742 = vmatpush.bf16.msrb.mxu2 %v6190_v20  ;;  %3755 = vmatpush.bf16.msrb.mxu3 %v6318_v45  ;;  %v3490_v18 = vpop.f32.mrf.mxu2  ;;  %v4447_v20 = vld [vmem:[%s10425_s1 + $0xf8] sm:$0xf0]  ;;  %v3503_v48 = vpop.f32.mrf.mxu3  ;;  %v7064_v63 = vld [vmem:[#allocation1 + $0x2d] sm:$0xff] }
 0x17d   :  { %v4575_v45 = vld [vmem:[%s10425_s1 + $0x1f8] sm:$0xf0]  ;;  %v6616_v3 = vld [vmem:[%s10425_s1 + $0x3ac] sm:$0xf] }
 0x17e   :  { %v4543_v58 = vld [vmem:[%s10425_s1 + $0x1b8] sm:$0xf0]  ;;  %v6548_v11 = vld [vmem:[%s10425_s1 + $0x18c] sm:$0xf] }
 0x17f   :  { %3717 = vmatpush.bf16.msrb.mxu0 %v5918_v30  ;;  %3730 = vmatpush.bf16.msrb.mxu1 %v6046_v31  ;;  %v6254_v30 = vor.u32 %v6982_v17, %v6253_v16  ;;  %v4450_v31 = vor.u32 %v6528_v19, %v4447_v20  ;;  %v7063_v62 = vld [vmem:[#allocation1 + $0x36] sm:$0xff]  ;;  %v7065_v5 = vld [vmem:[#allocation1 + $0x3f] sm:$0xff]  ;;  %v6612_v17 = vld [vmem:[%s10425_s1 + $0x38c] sm:$0xf] }
 0x180   :  { %3743 = vmatpush.bf16.msrb.mxu2 %v6174_v32  ;;  %3756 = vmatpush.bf16.msrb.mxu3 %v6302_v37  ;;  %v4578_v32 = vor.u32 %v6560_v21, %v4575_v45  ;;  %v6556_v37 = vld [vmem:[%s10425_s1 + $0x1cc] sm:$0xf]  ;;  %v4799_v4 = vld [vmem:[%s10425_s1 + $0x3b8] sm:$0xf0] }
 0x181   :  { %v4562_v46 = vor.u32 %v6556_v37, %v4559_v39  ;;  %v4802_v12 = vor.u32 %v6616_v3, %v4799_v4  ;;  %v4527_v13 = vld [vmem:[%s10425_s1 + $0x198] sm:$0xf0]  ;;  %v6512_v45 = vld [vmem:[%s10425_s1 + $0x6c] sm:$0xf] }
 0x182   :  { %v4655_v15 = vld [vmem:[%s10425_s1 + $0x298] sm:$0xf0]  ;;  %v4530_v48 = vor.u32 %v6548_v11, %v4527_v13  ;;  %v6544_v23 = vld [vmem:[%s10425_s1 + $0x16c] sm:$0xf] }
 0x183   :  { %3718 = vmatpush.bf16.msrb.mxu0 %v5902_v50  ;;  %3731 = vmatpush.bf16.msrb.mxu1 %v6030_v55  ;;  %v6520_v50 = vld [vmem:[%s10425_s1 + $0xac] sm:$0xf]  ;;  %v4783_v18 = vld [vmem:[%s10425_s1 + $0x398] sm:$0xf0] }
 0x184   :  { %3744 = vmatpush.bf16.msrb.mxu2 %v6158_v56  ;;  %3757 = vmatpush.bf16.msrb.mxu3 %v6286_v61  ;;  %v6552_v55 = vld [vmem:[%s10425_s1 + $0x1ac] sm:$0xf]  ;;  %v7062_v56 = vld [vmem:[#allocation1 + $0x24] sm:$0xff]  ;;  %v4671_v61 = vld [vmem:[%s10425_s1 + $0x2b8] sm:$0xf0] }
 0x185   :  { %v4546_v7 = vor.u32 %v6552_v55, %v4543_v58  ;;  %v4674_v8 = vor.u32 %v6584_v59, %v4671_v61  ;;  %v4383_v22 = vld [vmem:[%s10425_s1 + $0x78] sm:$0xf0]  ;;  %v6576_v25 = vld [vmem:[%s10425_s1 + $0x26c] sm:$0xf] }
 0x186   :  { %v4639_v26 = vld [vmem:[%s10425_s1 + $0x278] sm:$0xf0]  ;;  %v6508_v36 = vld [vmem:[%s10425_s1 + $0x4c] sm:$0xf] }
 0x187   :  { %3719 = vmatpush.bf16.msrb.mxu0 %v5886_v6  ;;  %3732 = vmatpush.bf16.msrb.mxu1 %v6014_v9  ;;  %v4418_v6 = vor.u32 %v6520_v50, %v4415_v53  ;;  %v6516_v9 = vld [vmem:[%s10425_s1 + $0x8c] sm:$0xf]  ;;  %v4642_v35 = vor.u32 %v6576_v25, %v4639_v26  ;;  %v4367_v37 = vld [vmem:[%s10425_s1 + $0x58] sm:$0xf0] }
 0x188   :  { %3745 = vmatpush.bf16.msrb.mxu2 %v6142_v10  ;;  %3758 = vmatpush.bf16.msrb.mxu3 %v6270_v14  ;;  %v4399_v10 = vld [vmem:[%s10425_s1 + $0x98] sm:$0xf0]  ;;  %v6580_v14 = vld [vmem:[%s10425_s1 + $0x28c] sm:$0xf]  ;;  %v4370_v55 = vor.u32 %v6508_v36, %v4367_v37 }
 0x189   :  { %v4402_v20 = vor.u32 %v6516_v9, %v4399_v10  ;;  %v4495_v41 = vld [vmem:[%s10425_s1 + $0x158] sm:$0xf0]  ;;  %v6572_v42 = vld [vmem:[%s10425_s1 + $0x24c] sm:$0xf] }
 0x18a   :  { %v4623_v43 = vld [vmem:[%s10425_s1 + $0x258] sm:$0xf0]  ;;  %v6504_v61 = vld [vmem:[%s10425_s1 + $0x2c] sm:$0xf] }
 0x18b   :  { %3720 = vmatpush.bf16.msrb.mxu0 %v5870_v51  ;;  %3733 = vmatpush.bf16.msrb.mxu1 %v5998_v47  ;;  %v3514_v16 = vpop.f32.mrf.mxu0  ;;  %v3527_v21 = vpop.f32.mrf.mxu1  ;;  %v4658_v51 = vor.u32 %v6580_v14, %v4655_v15  ;;  %v4751_v50 = vld [vmem:[%s10425_s1 + $0x358] sm:$0xf0]  ;;  %v4626_v59 = vor.u32 %v6572_v42, %v4623_v43  ;;  %v6500_v10 = vld [vmem:[%s10425_s1 + $0xc] sm:$0xf] }
 0x18c   :  { %3746 = vmatpush.bf16.msrb.mxu2 %v6126_v24  ;;  %3759 = vmatpush.bf16.msrb.mxu3 %v6254_v30  ;;  %v3515_v19 = vadd.f32 %v3514_v16, %v9454_v54  ;;  %v4786_v54 = vor.u32 %v6612_v17, %v4783_v18  ;;  %v4511_v24 = vld [vmem:[%s10425_s1 + $0x178] sm:$0xf0]  ;;  %v6608_v30 = vld [vmem:[%s10425_s1 + $0x36c] sm:$0xf] }
 0x18d   :  { %v4479_v4 = vld [vmem:[%s10425_s1 + $0x138] sm:$0xf0]  ;;  %v6532_v14 = vld [vmem:[%s10425_s1 + $0x10c] sm:$0xf] }
 0x18e   :  { %3721 = vmatmul.bf16.vlgmr.msrb.gmra.mxu0 %v7062_v56  ;;  %3734 = vmatmul.bf16.vlgmr.msrb.gmra.mxu1 %v7064_v63  ;;  %v3528_v47 = vadd.f32 %v3527_v21, %v3515_v19  ;;  %v6536_v63 = vld [vmem:[%s10425_s1 + $0x12c] sm:$0xf]  ;;  %v4335_v11 = vld [vmem:[%s10425_s1 + $0x18] sm:$0xf0] }
 0x18f   :  { %3765 = vmatpush.bf16.msra.mxu0 %v4450_v31  ;;  %3778 = vmatpush.bf16.msra.mxu1 %v4578_v32  ;;  %v4767_v31 = vld [vmem:[%s10425_s1 + $0x378] sm:$0xf0]  ;;  %v4386_v32 = vor.u32 %v6512_v45, %v4383_v22  ;;  %v6564_v16 = vld [vmem:[%s10425_s1 + $0x20c] sm:$0xf] }
 0x190   :  { %3791 = vmatpush.bf16.msra.mxu2 %v4706_v33  ;;  %3804 = vmatpush.bf16.msra.mxu3 %v4834_v38  ;;  %v4514_v33 = vor.u32 %v6544_v23, %v4511_v24  ;;  %v6540_v38 = vld [vmem:[%s10425_s1 + $0x14c] sm:$0xf]  ;;  %v4770_v39 = vor.u32 %v6608_v30, %v4767_v31  ;;  %v4463_v15 = vld [vmem:[%s10425_s1 + $0x118] sm:$0xf0]  ;;  %v4338_v23 = vor.u32 %v6500_v10, %v4335_v11 }
 0x191   :  { %3747 = vmatmul.bf16.vlgmr.msrb.gmra.mxu2 %v7063_v62  ;;  %3760 = vmatmul.bf16.vlgmr.msrb.gmra.mxu3 %v7065_v5  ;;  %v4498_v58 = vor.u32 %v6540_v38, %v4495_v41  ;;  %v4351_v62 = vld [vmem:[%s10425_s1 + $0x38] sm:$0xf0]  ;;  %v6568_v5 = vld [vmem:[%s10425_s1 + $0x22c] sm:$0xf]  ;;  %v4466_v25 = vor.u32 %v6532_v14, %v4463_v15 }
 0x192   :  { %v4354_v9 = vor.u32 %v6504_v61, %v4351_v62  ;;  %v4591_v18 = vld [vmem:[%s10425_s1 + $0x218] sm:$0xf0]  ;;  %v6596_v19 = vld [vmem:[%s10425_s1 + $0x30c] sm:$0xf] }
 0x193   :  { %3766 = vmatpush.bf16.msra.mxu0 %v4434_v44  ;;  %3779 = vmatpush.bf16.msra.mxu1 %v4562_v46  ;;  %v3516_v53 = vpop.f32.mrf.mxu0  ;;  %v3529_v56 = vpop.f32.mrf.mxu1  ;;  %v6688_v45 = vld [vmem:[%s10425_s1 + $0x5ec] sm:$0xf]  ;;  %v5215_v24 = vld [vmem:[%s10425_s1 + $0x6f8] sm:$0xf0]  ;;  %v4594_v26 = vor.u32 %v6564_v16, %v4591_v18 }
 0x194   :  { %3792 = vmatpush.bf16.msra.mxu2 %v4690_v49  ;;  %3805 = vmatpush.bf16.msra.mxu3 %v4818_v57  ;;  %v3540_v40 = vpop.f32.mrf.mxu2  ;;  %v3553_v46 = vpop.f32.mrf.mxu3  ;;  %v6604_v49 = vld [vmem:[%s10425_s1 + $0x34c] sm:$0xf]  ;;  %v5343_v31 = vld [vmem:[%s10425_s1 + $0x7f8] sm:$0xf0] }
 0x195   :  { %v3541_v44 = vadd.f32 %v3540_v40, %v3528_v47  ;;  %v4754_v3 = vor.u32 %v6604_v49, %v4751_v50  ;;  %v6720_v47 = vld [vmem:[%s10425_s1 + $0x6ec] sm:$0xf]  ;;  %v4943_v38 = vld [vmem:[%s10425_s1 + $0x4d8] sm:$0xf0] }
 0x196   :  { %v6752_v30 = vld [vmem:[%s10425_s1 + $0x7ec] sm:$0xf]  ;;  %v5218_v36 = vor.u32 %v6720_v47, %v5215_v24  ;;  %v5071_v41 = vld [vmem:[%s10425_s1 + $0x5d8] sm:$0xf0] }
 0x197   :  { %3767 = vmatpush.bf16.msra.mxu0 %v4418_v6  ;;  %3780 = vmatpush.bf16.msra.mxu1 %v4546_v7  ;;  %v9649_v57 = vadd.f32 %v3553_v46, %v3541_v44  ;;  %v4607_v6 = vld [vmem:[%s10425_s1 + $0x238] sm:$0xf0]  ;;  %v6600_v7 = vld [vmem:[%s10425_s1 + $0x32c] sm:$0xf]  ;;  %v5346_v40 = vor.u32 %v6752_v30, %v5343_v31 }
 0x198   :  { %3793 = vmatpush.bf16.msra.mxu2 %v4674_v8  ;;  %3806 = vmatpush.bf16.msra.mxu3 %v4802_v12  ;;  %v4735_v8 = vld [vmem:[%s10425_s1 + $0x338] sm:$0xf0]  ;;  %v4482_v12 = vor.u32 %v6536_v63, %v4479_v4  ;;  %v4610_v13 = vor.u32 %v6568_v5, %v4607_v6  ;;  %v6652_v37 = vld [vmem:[%s10425_s1 + $0x4cc] sm:$0xf] }
 0x199   :  { %v4738_v17 = vor.u32 %v6600_v7, %v4735_v8  ;;  %v6716_v42 = vld [vmem:[%s10425_s1 + $0x6cc] sm:$0xf]  ;;  %v5199_v43 = vld [vmem:[%s10425_s1 + $0x6d8] sm:$0xf0]  ;;  %v4946_v49 = vor.u32 %v6652_v37, %v4943_v38 }
 0x19a   :  { %v6748_v44 = vld [vmem:[%s10425_s1 + $0x7cc] sm:$0xf]  ;;  %v5327_v46 = vld [vmem:[%s10425_s1 + $0x7d8] sm:$0xf0]  ;;  %v5202_v53 = vor.u32 %v6716_v42, %v5199_v43 }
 0x19b   :  { %3768 = vmatpush.bf16.msra.mxu0 %v4402_v20  ;;  %3781 = vmatpush.bf16.msra.mxu1 %v4530_v48  ;;  %v4719_v20 = vld [vmem:[%s10425_s1 + $0x318] sm:$0xf0]  ;;  %v6656_v48 = vld [vmem:[%s10425_s1 + $0x4ec] sm:$0xf] }
 0x19c   :  { %3794 = vmatpush.bf16.msra.mxu2 %v4658_v51  ;;  %3807 = vmatpush.bf16.msra.mxu3 %v4786_v54  ;;  %v3542_v21 = vpop.f32.mrf.mxu2  ;;  %v4959_v51 = vld [vmem:[%s10425_s1 + $0x4f8] sm:$0xf0]  ;;  %v3555_v22 = vpop.f32.mrf.mxu3  ;;  %v6712_v62 = vld [vmem:[%s10425_s1 + $0x6ac] sm:$0xf] }
 0x19d   :  { %v5087_v54 = vld [vmem:[%s10425_s1 + $0x5f8] sm:$0xf0]  ;;  %v6644_v6 = vld [vmem:[%s10425_s1 + $0x48c] sm:$0xf] }
 0x19e   :  { %v4927_v56 = vld [vmem:[%s10425_s1 + $0x4b8] sm:$0xf0]  ;;  %v6708_v11 = vld [vmem:[%s10425_s1 + $0x68c] sm:$0xf] }
 0x19f   :  { %3769 = vmatpush.bf16.msra.mxu0 %v4386_v32  ;;  %3782 = vmatpush.bf16.msra.mxu1 %v4514_v33  ;;  %v4722_v32 = vor.u32 %v6596_v19, %v4719_v20  ;;  %v4962_v33 = vor.u32 %v6656_v48, %v4959_v51  ;;  %v5055_v61 = vld [vmem:[%s10425_s1 + $0x5b8] sm:$0xf0]  ;;  %v6640_v19 = vld [vmem:[%s10425_s1 + $0x46c] sm:$0xf] }
 0x1a0   :  { %3795 = vmatpush.bf16.msra.mxu2 %v4642_v35  ;;  %3808 = vmatpush.bf16.msra.mxu3 %v4770_v39  ;;  %v5090_v35 = vor.u32 %v6688_v45, %v5087_v54  ;;  %v6684_v39 = vld [vmem:[%s10425_s1 + $0x5cc] sm:$0xf]  ;;  %v5183_v63 = vld [vmem:[%s10425_s1 + $0x6b8] sm:$0xf0] }
 0x1a1   :  { %v5074_v50 = vor.u32 %v6684_v39, %v5071_v41  ;;  %v5311_v4 = vld [vmem:[%s10425_s1 + $0x7b8] sm:$0xf0]  ;;  %v5186_v7 = vor.u32 %v6712_v62, %v5183_v63  ;;  %v6672_v21 = vld [vmem:[%s10425_s1 + $0x56c] sm:$0xf] }
 0x1a2   :  { %v4911_v8 = vld [vmem:[%s10425_s1 + $0x498] sm:$0xf0]  ;;  %v6736_v47 = vld [vmem:[%s10425_s1 + $0x76c] sm:$0xf] }
 0x1a3   :  { %3770 = vmatpush.bf16.msra.mxu0 %v4370_v55  ;;  %3783 = vmatpush.bf16.msra.mxu1 %v4498_v58  ;;  %v6648_v55 = vld [vmem:[%s10425_s1 + $0x4ac] sm:$0xf]  ;;  %v5039_v10 = vld [vmem:[%s10425_s1 + $0x598] sm:$0xf0]  ;;  %v4914_v15 = vor.u32 %v6644_v6, %v4911_v8 }
 0x1a4   :  { %3796 = vmatpush.bf16.msra.mxu2 %v4626_v59  ;;  %3809 = vmatpush.bf16.msra.mxu3 %v4754_v3  ;;  %v6680_v58 = vld [vmem:[%s10425_s1 + $0x5ac] sm:$0xf]  ;;  %v5330_v59 = vor.u32 %v6748_v44, %v5327_v46  ;;  %v4930_v5 = vor.u32 %v6648_v55, %v4927_v56  ;;  %v5295_v14 = vld [vmem:[%s10425_s1 + $0x798] sm:$0xf0] }
 0x1a5   :  { %v6744_v3 = vld [vmem:[%s10425_s1 + $0x7ac] sm:$0xf]  ;;  %v4895_v20 = vld [vmem:[%s10425_s1 + $0x478] sm:$0xf0] }
 0x1a6   :  { %v5023_v22 = vld [vmem:[%s10425_s1 + $0x578] sm:$0xf0]  ;;  %v6700_v39 = vld [vmem:[%s10425_s1 + $0x64c] sm:$0xf] }
 0x1a7   :  { %3771 = vmatpush.bf16.msra.mxu0 %v4354_v9  ;;  %3784 = vmatpush.bf16.msra.mxu1 %v4482_v12  ;;  %v5167_v12 = vld [vmem:[%s10425_s1 + $0x698] sm:$0xf0]  ;;  %v5026_v30 = vor.u32 %v6672_v21, %v5023_v22  ;;  %v6732_v43 = vld [vmem:[%s10425_s1 + $0x74c] sm:$0xf] }
 0x1a8   :  { %3797 = vmatpush.bf16.msra.mxu2 %v4610_v13  ;;  %3810 = vmatpush.bf16.msra.mxu3 %v4738_v17  ;;  %v6740_v13 = vld [vmem:[%s10425_s1 + $0x78c] sm:$0xf]  ;;  %v5170_v18 = vor.u32 %v6708_v11, %v5167_v12  ;;  %v5151_v54 = vld [vmem:[%s10425_s1 + $0x678] sm:$0xf0] }
 0x1a9   :  { %v5298_v45 = vor.u32 %v6740_v13, %v5295_v14  ;;  %v5279_v24 = vld [vmem:[%s10425_s1 + $0x778] sm:$0xf0]  ;;  %v6632_v56 = vld [vmem:[%s10425_s1 + $0x42c] sm:$0xf] }
 0x1aa   :  { %v5282_v37 = vor.u32 %v6736_v47, %v5279_v24  ;;  %v5007_v38 = vld [vmem:[%s10425_s1 + $0x558] sm:$0xf0]  ;;  %v6692_v11 = vld [vmem:[%s10425_s1 + $0x60c] sm:$0xf] }
 0x1ab   :  { %3772 = vmatpush.bf16.msra.mxu0 %v4338_v23  ;;  %3785 = vmatpush.bf16.msra.mxu1 %v4466_v25  ;;  %v3566_v16 = vpop.f32.mrf.mxu0  ;;  %v3579_v51 = vpop.f32.mrf.mxu1  ;;  %v6704_v23 = vld [vmem:[%s10425_s1 + $0x66c] sm:$0xf]  ;;  %v5263_v44 = vld [vmem:[%s10425_s1 + $0x758] sm:$0xf0] }
 0x1ac   :  { %3798 = vmatpush.bf16.msra.mxu2 %v4594_v26  ;;  %3811 = vmatpush.bf16.msra.mxu3 %v4722_v32  ;;  %v4898_v26 = vor.u32 %v6640_v19, %v4895_v20  ;;  %v5154_v31 = vor.u32 %v6704_v23, %v5151_v54  ;;  %v6636_v32 = vld [vmem:[%s10425_s1 + $0x44c] sm:$0xf]  ;;  %v5266_v62 = vor.u32 %v6732_v43, %v5263_v44  ;;  %v4991_v63 = vld [vmem:[%s10425_s1 + $0x538] sm:$0xf0] }
 0x1ad   :  { %v5247_v6 = vld [vmem:[%s10425_s1 + $0x738] sm:$0xf0]  ;;  %v6816_v20 = vld [vmem:[%s10425_s1 + $0x9ec] sm:$0xf] }
 0x1ae   :  { %3773 = vmatmul.bf16.vlgmr.msra.gmra.mxu0 %v7452_v28  ;;  %3786 = vmatmul.bf16.vlgmr.msra.gmra.mxu1 %v7462_v34  ;;  %v6676_v28 = vld [vmem:[%s10425_s1 + $0x58c] sm:$0xf]  ;;  %v5314_v34 = vor.u32 %v6744_v3, %v5311_v4  ;;  %v5119_v4 = vld [vmem:[%s10425_s1 + $0x638] sm:$0xf0] }
 0x1af   :  { %3817 = vmatpush.bf16.msrb.mxu0 %v4962_v33  ;;  %3830 = vmatpush.bf16.msrb.mxu1 %v5090_v35  ;;  %v5042_v17 = vor.u32 %v6676_v28, %v5039_v10  ;;  %v4879_v33 = vld [vmem:[%s10425_s1 + $0x458] sm:$0xf0]  ;;  %v6668_v35 = vld [vmem:[%s10425_s1 + $0x54c] sm:$0xf] }
 0x1b0   :  { %3843 = vmatpush.bf16.msrb.mxu2 %v5218_v36  ;;  %3856 = vmatpush.bf16.msrb.mxu3 %v5346_v40  ;;  %v5135_v40 = vld [vmem:[%s10425_s1 + $0x658] sm:$0xf0]  ;;  %v4882_v46 = vor.u32 %v6636_v32, %v4879_v33  ;;  %v6696_v3 = vld [vmem:[%s10425_s1 + $0x62c] sm:$0xf] }
 0x1b1   :  { %3799 = vmatmul.bf16.vlgmr.msra.gmra.mxu2 %v7450_v27  ;;  %3812 = vmatmul.bf16.vlgmr.msra.gmra.mxu3 %v7454_v29  ;;  %v5058_v27 = vor.u32 %v6680_v58, %v5055_v61  ;;  %v9787_v29 = vld [vmem:[%s10426_s2] sm:$0xf]  ;;  %v5138_v55 = vor.u32 %v6700_v39, %v5135_v40  ;;  %v4863_v58 = vld [vmem:[%s10425_s1 + $0x438] sm:$0xf0]  ;;  %v6880_v54 = vld [vmem:[%s10425_s1 + $0xbec] sm:$0xf] }
 0x1b2   :  { %v539_v9 = vperm.slane %v9787_v29, 2  ;;  %v4847_v8 = vld [vmem:[%s10425_s1 + $0x418] sm:$0xf0]  ;;  %v6812_v33 = vld [vmem:[%s10425_s1 + $0x9cc] sm:$0xf] }
 0x1b3   :  { %3818 = vmatpush.bf16.msrb.mxu0 %v4946_v49  ;;  %3831 = vmatpush.bf16.msrb.mxu1 %v5074_v50  ;;  %v3568_v50 = vpop.f32.mrf.mxu0  ;;  %v3581_v61 = vpop.f32.mrf.mxu1  ;;  %v4975_v10 = vld [vmem:[%s10425_s1 + $0x518] sm:$0xf0]  ;;  %v6876_v39 = vld [vmem:[%s10425_s1 + $0xbcc] sm:$0xf] }
 0x1b4   :  { %3844 = vmatpush.bf16.msrb.mxu2 %v5202_v53  ;;  %3857 = vmatpush.bf16.msrb.mxu3 %v5330_v59  ;;  %v3567_v48 = vadd.f32 %v3566_v16, %v539_v9  ;;  %v3592_v36 = vpop.f32.mrf.mxu2  ;;  %v3605_v42 = vpop.f32.mrf.mxu3  ;;  %v5010_v53 = vor.u32 %v6668_v35, %v5007_v38  ;;  %v6664_v59 = vld [vmem:[%s10425_s1 + $0x52c] sm:$0xf]  ;;  %v5122_v9 = vor.u32 %v6696_v3, %v5119_v4  ;;  %v5103_v14 = vld [vmem:[%s10425_s1 + $0x618] sm:$0xf0] }
 0x1b5   :  { %v4994_v28 = vor.u32 %v6664_v59, %v4991_v63  ;;  %v5231_v16 = vld [vmem:[%s10425_s1 + $0x718] sm:$0xf0]  ;;  %v5106_v23 = vor.u32 %v6692_v11, %v5103_v14  ;;  %v6776_v44 = vld [vmem:[%s10425_s1 + $0x8ac] sm:$0xf] }
 0x1b6   :  { %v3580_v25 = vadd.f32 %v3579_v51, %v3567_v48  ;;  %v5471_v19 = vld [vmem:[%s10425_s1 + $0x8f8] sm:$0xf0]  ;;  %v6848_v51 = vld [vmem:[%s10425_s1 + $0xaec] sm:$0xf] }
 0x1b7   :  { %3819 = vmatpush.bf16.msrb.mxu0 %v4930_v5  ;;  %3832 = vmatpush.bf16.msrb.mxu1 %v5058_v27  ;;  %v6728_v5 = vld [vmem:[%s10425_s1 + $0x72c] sm:$0xf]  ;;  %v4866_v27 = vor.u32 %v6632_v56, %v4863_v58  ;;  %v5599_v48 = vld [vmem:[%s10425_s1 + $0x9f8] sm:$0xf0] }
 0x1b8   :  { %3845 = vmatpush.bf16.msrb.mxu2 %v5186_v7  ;;  %3858 = vmatpush.bf16.msrb.mxu3 %v5314_v34  ;;  %v3593_v41 = vadd.f32 %v3592_v36, %v3580_v25  ;;  %v6628_v7 = vld [vmem:[%s10425_s1 + $0x40c] sm:$0xf]  ;;  %v5250_v13 = vor.u32 %v6728_v5, %v5247_v6  ;;  %v5855_v47 = vld [vmem:[%s10425_s1 + $0xbf8] sm:$0xf0] }
 0x1b9   :  { %v6660_v34 = vld [vmem:[%s10425_s1 + $0x50c] sm:$0xf]  ;;  %v4850_v21 = vor.u32 %v6628_v7, %v4847_v8  ;;  %v5455_v32 = vld [vmem:[%s10425_s1 + $0x8d8] sm:$0xf0]  ;;  %v5858_v35 = vor.u32 %v6880_v54, %v5855_v47 }
 0x1ba   :  { %v9853_v49 = vadd.f32 %v3605_v42, %v3593_v41  ;;  %v4978_v22 = vor.u32 %v6660_v34, %v4975_v10  ;;  %v5583_v36 = vld [vmem:[%s10425_s1 + $0x9d8] sm:$0xf0]  ;;  %v6808_v50 = vld [vmem:[%s10425_s1 + $0x9ac] sm:$0xf] }
 0x1bb   :  { %3820 = vmatpush.bf16.msrb.mxu0 %v4914_v15  ;;  %3833 = vmatpush.bf16.msrb.mxu1 %v5042_v17  ;;  %v6724_v15 = vld [vmem:[%s10425_s1 + $0x70c] sm:$0xf]  ;;  %v5711_v38 = vld [vmem:[%s10425_s1 + $0xad8] sm:$0xf0]  ;;  %v5586_v42 = vor.u32 %v6812_v33, %v5583_v36 }
 0x1bc   :  { %3846 = vmatpush.bf16.msrb.mxu2 %v5170_v18  ;;  %3859 = vmatpush.bf16.msrb.mxu3 %v5298_v45  ;;  %v3594_v12 = vpop.f32.mrf.mxu2  ;;  %v3607_v17 = vpop.f32.mrf.mxu3  ;;  %v6784_v18 = vld [vmem:[%s10425_s1 + $0x8ec] sm:$0xf]  ;;  %v5727_v45 = vld [vmem:[%s10425_s1 + $0xaf8] sm:$0xf0]  ;;  %v5234_v24 = vor.u32 %v6724_v15, %v5231_v16 }
 0x1bd   :  { %v5474_v25 = vor.u32 %v6784_v18, %v5471_v19  ;;  %v5839_v40 = vld [vmem:[%s10425_s1 + $0xbd8] sm:$0xf0]  ;;  %v6840_v56 = vld [vmem:[%s10425_s1 + $0xaac] sm:$0xf] }
 0x1be   :  { %v5695_v58 = vld [vmem:[%s10425_s1 + $0xab8] sm:$0xf0]  ;;  %v6872_v59 = vld [vmem:[%s10425_s1 + $0xbac] sm:$0xf] }
 0x1bf   :  { %3821 = vmatpush.bf16.msrb.mxu0 %v4898_v26  ;;  %3834 = vmatpush.bf16.msrb.mxu1 %v5026_v30  ;;  %v5602_v26 = vor.u32 %v6816_v20, %v5599_v48  ;;  %v5730_v30 = vor.u32 %v6848_v51, %v5727_v45  ;;  %v5698_v63 = vor.u32 %v6840_v56, %v5695_v58  ;;  %v6772_v3 = vld [vmem:[%s10425_s1 + $0x88c] sm:$0xf]  ;;  %v5423_v4 = vld [vmem:[%s10425_s1 + $0x898] sm:$0xf0] }
 0x1c0   :  { %3847 = vmatpush.bf16.msrb.mxu2 %v5154_v31  ;;  %3860 = vmatpush.bf16.msrb.mxu3 %v5282_v37  ;;  %v6780_v31 = vld [vmem:[%s10425_s1 + $0x8cc] sm:$0xf]  ;;  %v5679_v6 = vld [vmem:[%s10425_s1 + $0xa98] sm:$0xf0]  ;;  %v5426_v8 = vor.u32 %v6772_v3, %v5423_v4 }
 0x1c1   :  { %v6844_v37 = vld [vmem:[%s10425_s1 + $0xacc] sm:$0xf]  ;;  %v5458_v41 = vor.u32 %v6780_v31, %v5455_v32  ;;  %v5807_v7 = vld [vmem:[%s10425_s1 + $0xb98] sm:$0xf0] }
 0x1c2   :  { %v5714_v43 = vor.u32 %v6844_v37, %v5711_v38  ;;  %v6836_v5 = vld [vmem:[%s10425_s1 + $0xa8c] sm:$0xf]  ;;  %v5407_v11 = vld [vmem:[%s10425_s1 + $0x878] sm:$0xf0] }
 0x1c3   :  { %3822 = vmatpush.bf16.msrb.mxu0 %v4882_v46  ;;  %3835 = vmatpush.bf16.msrb.mxu1 %v5010_v53  ;;  %v5439_v46 = vld [vmem:[%s10425_s1 + $0x8b8] sm:$0xf0]  ;;  %v5842_v53 = vor.u32 %v6876_v39, %v5839_v40  ;;  %v5682_v34 = vor.u32 %v6836_v5, %v5679_v6  ;;  %v6768_v10 = vld [vmem:[%s10425_s1 + $0x86c] sm:$0xf] }
 0x1c4   :  { %3848 = vmatpush.bf16.msrb.mxu2 %v5138_v55  ;;  %3861 = vmatpush.bf16.msrb.mxu3 %v5266_v62  ;;  %v5567_v55 = vld [vmem:[%s10425_s1 + $0x9b8] sm:$0xf0]  ;;  %v5442_v61 = vor.u32 %v6776_v44, %v5439_v46  ;;  %v6800_v12 = vld [vmem:[%s10425_s1 + $0x96c] sm:$0xf]  ;;  %v5410_v20 = vor.u32 %v6768_v10, %v5407_v11 }
 0x1c5   :  { %v5570_v62 = vor.u32 %v6808_v50, %v5567_v55  ;;  %v5535_v15 = vld [vmem:[%s10425_s1 + $0x978] sm:$0xf0]  ;;  %v6832_v16 = vld [vmem:[%s10425_s1 + $0xa6c] sm:$0xf] }
 0x1c6   :  { %v5663_v17 = vld [vmem:[%s10425_s1 + $0xa78] sm:$0xf0]  ;;  %v6864_v18 = vld [vmem:[%s10425_s1 + $0xb6c] sm:$0xf] }
 0x1c7   :  { %3823 = vmatpush.bf16.msrb.mxu0 %v4866_v27  ;;  %3836 = vmatpush.bf16.msrb.mxu1 %v4994_v28  ;;  %v6868_v27 = vld [vmem:[%s10425_s1 + $0xb8c] sm:$0xf]  ;;  %v5791_v19 = vld [vmem:[%s10425_s1 + $0xb78] sm:$0xf0]  ;;  %v5666_v48 = vor.u32 %v6832_v16, %v5663_v17 }
 0x1c8   :  { %3849 = vmatpush.bf16.msrb.mxu2 %v5122_v9  ;;  %3862 = vmatpush.bf16.msrb.mxu3 %v5250_v13  ;;  %v5810_v14 = vor.u32 %v6868_v27, %v5807_v7  ;;  %v6764_v51 = vld [vmem:[%s10425_s1 + $0x84c] sm:$0xf]  ;;  %v5391_v45 = vld [vmem:[%s10425_s1 + $0x858] sm:$0xf0]  ;;  %v5794_v54 = vor.u32 %v6864_v18, %v5791_v19 }
 0x1c9   :  { %v5519_v47 = vld [vmem:[%s10425_s1 + $0x958] sm:$0xf0]  ;;  %v5394_v32 = vor.u32 %v6764_v51, %v5391_v45  ;;  %v6760_v37 = vld [vmem:[%s10425_s1 + $0x82c] sm:$0xf] }
 0x1ca   :  { %v5775_v31 = vld [vmem:[%s10425_s1 + $0xb58] sm:$0xf0]  ;;  %v6792_v39 = vld [vmem:[%s10425_s1 + $0x92c] sm:$0xf] }
 0x1cb   :  { %3824 = vmatpush.bf16.msrb.mxu0 %v4850_v21  ;;  %3837 = vmatpush.bf16.msrb.mxu1 %v4978_v22  ;;  %v10003_v28 = vpop.f32.mrf.mxu0  ;;  %v10014_v13 = vpop.f32.mrf.mxu1  ;;  %v5538_v21 = vor.u32 %v6800_v12, %v5535_v15  ;;  %v6796_v22 = vld [vmem:[%s10425_s1 + $0x94c] sm:$0xf]  ;;  %v5375_v38 = vld [vmem:[%s10425_s1 + $0x838] sm:$0xf0] }
 0x1cc   :  { %3850 = vmatpush.bf16.msrb.mxu2 %v5106_v23  ;;  %3863 = vmatpush.bf16.msrb.mxu3 %v5234_v24  ;;  %v6828_v24 = vld [vmem:[%s10425_s1 + $0xa4c] sm:$0xf]  ;;  %v5631_v44 = vld [vmem:[%s10425_s1 + $0xa38] sm:$0xf0] }
 0x1cd   :  { %v6856_v46 = vld [vmem:[%s10425_s1 + $0xb2c] sm:$0xf]  ;;  %v5759_v50 = vld [vmem:[%s10425_s1 + $0xb38] sm:$0xf0] }
 0x1ce   :  { %3825 = vmatmul.bf16.vlgmr.msrb.gmra.mxu0 %v7530_v0  ;;  %3838 = vmatmul.bf16.vlgmr.msrb.gmra.mxu1 %v7534_v2  ;;  %v6804_v0 = vld [vmem:[%s10425_s1 + $0x98c] sm:$0xf]  ;;  %v5551_v2 = vld [vmem:[%s10425_s1 + $0x998] sm:$0xf0]  ;;  %v5762_v3 = vor.u32 %v6856_v46, %v5759_v50 }
 0x1cf   :  { %3869 = vmatpush.bf16.msra.mxu0 %v5474_v25  ;;  %3882 = vmatpush.bf16.msra.mxu1 %v5602_v26  ;;  %v5554_v9 = vor.u32 %v6804_v0, %v5551_v2  ;;  %v5647_v25 = vld [vmem:[%s10425_s1 + $0xa58] sm:$0xf0]  ;;  %v6756_v55 = vld [vmem:[%s10425_s1 + $0x80c] sm:$0xf] }
 0x1d0   :  { %3895 = vmatpush.bf16.msra.mxu2 %v5730_v30  ;;  %3908 = vmatpush.bf16.msra.mxu3 %v5858_v35  ;;  %v6860_v30 = vld [vmem:[%s10425_s1 + $0xb4c] sm:$0xf]  ;;  %v5522_v35 = vor.u32 %v6796_v22, %v5519_v47  ;;  %v5650_v36 = vor.u32 %v6828_v24, %v5647_v25  ;;  %v5359_v56 = vld [vmem:[%s10425_s1 + $0x818] sm:$0xf0] }
 0x1d1   :  { %3851 = vmatmul.bf16.vlgmr.msrb.gmra.mxu2 %v7525_v60  ;;  %v5823_v60 = vld [vmem:[%s10425_s1 + $0xbb8] sm:$0xf0]  ;;  %3864 = vmatmul.bf16.vlgmr.msrb.gmra.mxu3 %v7532_v1  ;;  %v6852_v0 = vld [vmem:[%s10425_s1 + $0xb0c] sm:$0xf]  ;;  %v5362_v7 = vor.u32 %v6756_v55, %v5359_v56 }
 0x1d2   :  { %v5826_v1 = vor.u32 %v6872_v59, %v5823_v60  ;;  %v6788_v60 = vld [vmem:[%s10425_s1 + $0x90c] sm:$0xf]  ;;  %v5615_v4 = vld [vmem:[%s10425_s1 + $0xa18] sm:$0xf0] }
 0x1d3   :  { %3870 = vmatpush.bf16.msra.mxu0 %v5458_v41  ;;  %3883 = vmatpush.bf16.msra.mxu1 %v5586_v42  ;;  %v3620_v33 = vpop.f32.mrf.mxu0  ;;  %v3633_v40 = vpop.f32.mrf.mxu1  ;;  %v5778_v41 = vor.u32 %v6860_v30, %v5775_v31  ;;  %v5503_v42 = vld [vmem:[%s10425_s1 + $0x938] sm:$0xf0]  ;;  %v6912_v5 = vld [vmem:[%s10425_s1 + $0xcec] sm:$0xf] }
 0x1d4   :  { %3896 = vmatpush.bf16.msra.mxu2 %v5714_v43  ;;  %3909 = vmatpush.bf16.msra.mxu3 %v5842_v53  ;;  %v10040_v23 = vpop.f32.mrf.mxu2  ;;  %v10051_v26 = vpop.f32.mrf.mxu3  ;;  %v6824_v43 = vld [vmem:[%s10425_s1 + $0xa2c] sm:$0xf]  ;;  %v5378_v53 = vor.u32 %v6760_v37, %v5375_v38  ;;  %v5506_v58 = vor.u32 %v6792_v39, %v5503_v42  ;;  %v5983_v6 = vld [vmem:[%s10425_s1 + $0xcf8] sm:$0xf0]  ;;  %v7068_v40 = vld [vmem:[#allocation1 + $0x12] sm:$0xff] }
 0x1d5   :  { %v5634_v59 = vor.u32 %v6824_v43, %v5631_v44  ;;  %v6944_v27 = vld [vmem:[%s10425_s1 + $0xdec] sm:$0xf]  ;;  %v5986_v16 = vor.u32 %v6912_v5, %v5983_v6  ;;  %v6095_v51 = vld [vmem:[%s10425_s1 + $0xdd8] sm:$0xf0] }
 0x1d6   :  { %v7008_v12 = vld [vmem:[%s10425_s1 + $0xfec] sm:$0xf]  ;;  %v6223_v22 = vld [vmem:[%s10425_s1 + $0xed8] sm:$0xf0] }
 0x1d7   :  { %3871 = vmatpush.bf16.msra.mxu0 %v5442_v61  ;;  %3884 = vmatpush.bf16.msra.mxu1 %v5570_v62  ;;  %v5487_v61 = vld [vmem:[%s10425_s1 + $0x918] sm:$0xf0]  ;;  %v6820_v62 = vld [vmem:[%s10425_s1 + $0xa0c] sm:$0xf] }
 0x1d8   :  { %3897 = vmatpush.bf16.msra.mxu2 %v5698_v63  ;;  %3910 = vmatpush.bf16.msra.mxu3 %v5826_v1  ;;  %v5743_v1 = vld [vmem:[%s10425_s1 + $0xb18] sm:$0xf0]  ;;  %v5490_v10 = vor.u32 %v6788_v60, %v5487_v61  ;;  %v5618_v11 = vor.u32 %v6820_v62, %v5615_v4  ;;  %v6908_v19 = vld [vmem:[%s10425_s1 + $0xccc] sm:$0xf] }
 0x1d9   :  { %v5746_v15 = vor.u32 %v6852_v0, %v5743_v1  ;;  %v6972_v45 = vld [vmem:[%s10425_s1 + $0xecc] sm:$0xf]  ;;  %v6351_v47 = vld [vmem:[%s10425_s1 + $0xfd8] sm:$0xf0] }
 0x1da   :  { %v6226_v30 = vor.u32 %v6972_v45, %v6223_v22  ;;  %v6904_v31 = vld [vmem:[%s10425_s1 + $0xcac] sm:$0xf]  ;;  %v6079_v37 = vld [vmem:[%s10425_s1 + $0xdb8] sm:$0xf0] }
 0x1db   :  { %3872 = vmatpush.bf16.msra.mxu0 %v5426_v8  ;;  %3885 = vmatpush.bf16.msra.mxu1 %v5554_v9  ;;  %v6111_v8 = vld [vmem:[%s10425_s1 + $0xdf8] sm:$0xf0]  ;;  %v6976_v9 = vld [vmem:[%s10425_s1 + $0xeec] sm:$0xf] }
 0x1dc   :  { %3898 = vmatpush.bf16.msra.mxu2 %v5682_v34  ;;  %3911 = vmatpush.bf16.msra.mxu3 %v5810_v14  ;;  %v3646_v63 = vpop.f32.mrf.mxu2  ;;  %v3659_v2 = vpop.f32.mrf.mxu3  ;;  %v6239_v34 = vld [vmem:[%s10425_s1 + $0xef8] sm:$0xf0]  ;;  %v6114_v17 = vor.u32 %v6944_v27, %v6111_v8  ;;  %v6936_v33 = vld [vmem:[%s10425_s1 + $0xdac] sm:$0xf] }
 0x1dd   :  { %v6367_v14 = vld [vmem:[%s10425_s1 + $0xff8] sm:$0xf0]  ;;  %v6242_v18 = vor.u32 %v6976_v9, %v6239_v34  ;;  %v6968_v38 = vld [vmem:[%s10425_s1 + $0xeac] sm:$0xf]  ;;  %v6082_v50 = vor.u32 %v6936_v33, %v6079_v37 }
 0x1de   :  { %v6207_v39 = vld [vmem:[%s10425_s1 + $0xeb8] sm:$0xf0]  ;;  %v7000_v42 = vld [vmem:[%s10425_s1 + $0xfac] sm:$0xf] }
 0x1df   :  { %3873 = vmatpush.bf16.msra.mxu0 %v5410_v20  ;;  %3886 = vmatpush.bf16.msra.mxu1 %v5538_v21  ;;  %v5967_v20 = vld [vmem:[%s10425_s1 + $0xcd8] sm:$0xf0]  ;;  %v6940_v21 = vld [vmem:[%s10425_s1 + $0xdcc] sm:$0xf] }
 0x1e0   :  { %3899 = vmatpush.bf16.msra.mxu2 %v5666_v48  ;;  %3912 = vmatpush.bf16.msra.mxu3 %v5794_v54  ;;  %v6370_v48 = vor.u32 %v7008_v12, %v6367_v14  ;;  %v7004_v54 = vld [vmem:[%s10425_s1 + $0xfcc] sm:$0xf]  ;;  %v5970_v24 = vor.u32 %v6908_v19, %v5967_v20  ;;  %v6098_v25 = vor.u32 %v6940_v21, %v6095_v51  ;;  %v6335_v43 = vld [vmem:[%s10425_s1 + $0xfb8] sm:$0xf0] }
 0x1e1   :  { %v7070_v44 = vld [vmem:[#allocation1 + $0x1b] sm:$0xff]  ;;  %v6900_v55 = vld [vmem:[%s10425_s1 + $0xc8c] sm:$0xf] }
 0x1e2   :  { %v5935_v56 = vld [vmem:[%s10425_s1 + $0xc98] sm:$0xf0]  ;;  %v6964_v61 = vld [vmem:[%s10425_s1 + $0xe8c] sm:$0xf] }
 0x1e3   :  { %3874 = vmatpush.bf16.msra.mxu0 %v5394_v32  ;;  %3887 = vmatpush.bf16.msra.mxu1 %v5522_v35  ;;  %v5951_v32 = vld [vmem:[%s10425_s1 + $0xcb8] sm:$0xf0]  ;;  %v7067_v35 = vld [vmem:[#allocation1] sm:$0xff]  ;;  %v5938_v0 = vor.u32 %v6900_v55, %v5935_v56  ;;  %v6896_v6 = vld [vmem:[%s10425_s1 + $0xc6c] sm:$0xf] }
 0x1e4   :  { %3900 = vmatpush.bf16.msra.mxu2 %v5650_v36  ;;  %3913 = vmatpush.bf16.msra.mxu3 %v5778_v41  ;;  %v6354_v36 = vor.u32 %v7004_v54, %v6351_v47  ;;  %v7069_v41 = vld [vmem:[#allocation1 + $0x9] sm:$0xff]  ;;  %v5954_v46 = vor.u32 %v6904_v31, %v5951_v32  ;;  %v6063_v60 = vld [vmem:[%s10425_s1 + $0xd98] sm:$0xf0] }
 0x1e5   :  { %v6191_v62 = vld [vmem:[%s10425_s1 + $0xe98] sm:$0xf0]  ;;  %v6960_v34 = vld [vmem:[%s10425_s1 + $0xe6c] sm:$0xf] }
 0x1e6   :  { %v6319_v4 = vld [vmem:[%s10425_s1 + $0xf98] sm:$0xf0]  ;;  %v6194_v5 = vor.u32 %v6964_v61, %v6191_v62  ;;  %v6924_v19 = vld [vmem:[%s10425_s1 + $0xd4c] sm:$0xf] }
 0x1e7   :  { %3875 = vmatpush.bf16.msra.mxu0 %v5378_v53  ;;  %3888 = vmatpush.bf16.msra.mxu1 %v5506_v58  ;;  %v6210_v53 = vor.u32 %v6968_v38, %v6207_v39  ;;  %v6932_v58 = vld [vmem:[%s10425_s1 + $0xd8c] sm:$0xf]  ;;  %v5919_v27 = vld [vmem:[%s10425_s1 + $0xc78] sm:$0xf0] }
 0x1e8   :  { %3901 = vmatpush.bf16.msra.mxu2 %v5634_v59  ;;  %3914 = vmatpush.bf16.msra.mxu3 %v5762_v3  ;;  %v6338_v59 = vor.u32 %v7000_v42, %v6335_v43  ;;  %v6996_v3 = vld [vmem:[%s10425_s1 + $0xf8c] sm:$0xf]  ;;  %v6066_v2 = vor.u32 %v6932_v58, %v6063_v60  ;;  %v6047_v9 = vld [vmem:[%s10425_s1 + $0xd78] sm:$0xf0]  ;;  %v5922_v14 = vor.u32 %v6896_v6, %v5919_v27 }
 0x1e9   :  { %v6322_v8 = vor.u32 %v6996_v3, %v6319_v4  ;;  %v6303_v12 = vld [vmem:[%s10425_s1 + $0xf78] sm:$0xf0]  ;;  %v6956_v51 = vld [vmem:[%s10425_s1 + $0xe4c] sm:$0xf] }
 0x1ea   :  { %v6159_v45 = vld [vmem:[%s10425_s1 + $0xe58] sm:$0xf0]  ;;  %v6988_v54 = vld [vmem:[%s10425_s1 + $0xf4c] sm:$0xf] }
 0x1eb   :  { %3876 = vmatpush.bf16.msra.mxu0 %v5362_v7  ;;  %3889 = vmatpush.bf16.msra.mxu1 %v5490_v10  ;;  %v10197_v63 = vpop.f32.mrf.mxu0  ;;  %v10205_v1 = vpop.f32.mrf.mxu1  ;;  %v6928_v7 = vld [vmem:[%s10425_s1 + $0xd6c] sm:$0xf]  ;;  %v6175_v10 = vld [vmem:[%s10425_s1 + $0xe78] sm:$0xf0]  ;;  %v6162_v33 = vor.u32 %v6956_v51, %v6159_v45  ;;  %v7023_v51 = vld [vmem:[%s10427_s3 + $0x60] sm:$0xff] }
 0x1ec   :  { %3902 = vmatpush.bf16.msra.mxu2 %v5618_v11  ;;  %3915 = vmatpush.bf16.msra.mxu3 %v5746_v15  ;;  %v6992_v11 = vld [vmem:[%s10425_s1 + $0xf6c] sm:$0xf]  ;;  %v6050_v15 = vor.u32 %v6928_v7, %v6047_v9  ;;  %v6287_v47 = vld [vmem:[%s10425_s1 + $0xf58] sm:$0xf0]  ;;  %v7031_v45 = vld [vmem:[%s10427_s3 + $0xa0] sm:$0xff] }
 0x1ed   :  { %v6306_v20 = vor.u32 %v6992_v11, %v6303_v12  ;;  %v6920_v37 = vld [vmem:[%s10425_s1 + $0xd2c] sm:$0xf]  ;;  %v6143_v39 = vld [vmem:[%s10425_s1 + $0xe38] sm:$0xf0]  ;;  %v7071_v11 = vld [vmem:[#allocation1 + $0x24] sm:$0xff] }
 0x1ee   :  { %3877 = vmatmul.bf16.vlgmr.msra.gmra.mxu0 %v7067_v35  ;;  %3890 = vmatmul.bf16.vlgmr.msra.gmra.mxu1 %v7069_v41  ;;  %v6888_v35 = vld [vmem:[%s10425_s1 + $0xc2c] sm:$0xf]  ;;  %v6271_v41 = vld [vmem:[%s10425_s1 + $0xf38] sm:$0xf0] }
 0x1ef   :  { %3921 = vmatpush.bf16.msrb.mxu0 %v5986_v16  ;;  %3934 = vmatpush.bf16.msrb.mxu1 %v6114_v17  ;;  %v6178_v16 = vor.u32 %v6960_v34, %v6175_v10  ;;  %v6892_v17 = vld [vmem:[%s10425_s1 + $0xc4c] sm:$0xf]  ;;  %v5999_v56 = vld [vmem:[%s10425_s1 + $0xd18] sm:$0xf0]  ;;  %v7017_v34 = vld [vmem:[%s10427_s3 + $0x30] sm:$0xff] }
 0x1f0   :  { %3947 = vmatpush.bf16.msrb.mxu2 %v6242_v18  ;;  %3960 = vmatpush.bf16.msrb.mxu3 %v6370_v48  ;;  %v5903_v18 = vld [vmem:[%s10425_s1 + $0xc58] sm:$0xf0]  ;;  %v6952_v38 = vld [vmem:[%s10425_s1 + $0xe2c] sm:$0xf]  ;;  %v7025_v10 = vld [vmem:[%s10427_s3 + $0x70] sm:$0xff] }
 0x1f1   :  { %3903 = vmatmul.bf16.vlgmr.msra.gmra.mxu2 %v7068_v40  ;;  %3916 = vmatmul.bf16.vlgmr.msra.gmra.mxu3 %v7070_v44  ;;  %v6031_v48 = vld [vmem:[%s10425_s1 + $0xd58] sm:$0xf0]  ;;  %v6984_v40 = vld [vmem:[%s10425_s1 + $0xf2c] sm:$0xf] }
 0x1f2   :  { %v6034_v32 = vor.u32 %v6924_v19, %v6031_v48  ;;  %v6916_v55 = vld [vmem:[%s10425_s1 + $0xd0c] sm:$0xf]  ;;  %v6255_v62 = vld [vmem:[%s10425_s1 + $0xf18] sm:$0xf0] }
 0x1f3   :  { %3922 = vmatpush.bf16.msrb.mxu0 %v5970_v24  ;;  %3935 = vmatpush.bf16.msrb.mxu1 %v6098_v25  ;;  %v3672_v24 = vpop.f32.mrf.mxu0  ;;  %v3619_v25 = vadd.f32 %v10003_v28, %v9853_v49  ;;  %v3685_v31 = vpop.f32.mrf.mxu1  ;;  %v6290_v49 = vor.u32 %v6988_v54, %v6287_v47  ;;  %v6015_v28 = vld [vmem:[%s10425_s1 + $0xd38] sm:$0xf0]  ;;  %v6948_v58 = vld [vmem:[%s10425_s1 + $0xe0c] sm:$0xf] }
 0x1f4   :  { %3948 = vmatpush.bf16.msrb.mxu2 %v6226_v30  ;;  %3961 = vmatpush.bf16.msrb.mxu3 %v6354_v36  ;;  %v10240_v21 = vpop.f32.mrf.mxu2  ;;  %v10251_v22 = vpop.f32.mrf.mxu3  ;;  %v5906_v30 = vor.u32 %v6892_v17, %v5903_v18  ;;  %v5887_v36 = vld [vmem:[%s10425_s1 + $0xc38] sm:$0xf0]  ;;  %v6018_v44 = vor.u32 %v6920_v37, %v6015_v28  ;;  %v6980_v61 = vld [vmem:[%s10425_s1 + $0xf0c] sm:$0xf]  ;;  %v7029_v37 = vld [vmem:[%s10427_s3 + $0x90] sm:$0xff] }
 0x1f5   :  { %v3632_v42 = vadd.f32 %v10014_v13, %v3619_v25  ;;  %v5890_v43 = vor.u32 %v6888_v35, %v5887_v36  ;;  %v6274_v13 = vor.u32 %v6984_v40, %v6271_v41  ;;  %v6258_v6 = vor.u32 %v6980_v61, %v6255_v62  ;;  %v7018_v27 = vld [vmem:[%s10427_s3 + $0x38] sm:$0xff]  ;;  %v7072_v12 = vld [vmem:[#allocation1 + $0x2d] sm:$0xff] }
 0x1f6   :  { %v7026_v7 = vld [vmem:[%s10427_s3 + $0x78] sm:$0xff]  ;;  %v7024_v17 = vld [vmem:[%s10427_s3 + $0x68] sm:$0xff]  ;;  %v7021_v36 = vld [vmem:[%s10427_s3 + $0x50] sm:$0xff] }
 0x1f7   :  { %3923 = vmatpush.bf16.msrb.mxu0 %v5954_v46  ;;  %3936 = vmatpush.bf16.msrb.mxu1 %v6082_v50  ;;  %v6146_v46 = vor.u32 %v6952_v38, %v6143_v39  ;;  %v6884_v50 = vld [vmem:[%s10425_s1 + $0xc0c] sm:$0xf]  ;;  %v3645_v4 = vadd.f32 %v10040_v23, %v3632_v42  ;;  %v7034_v23 = vld [vmem:[%s10427_s3 + $0xb8] sm:$0xff] }
 0x1f8   :  { %3949 = vmatpush.bf16.msrb.mxu2 %v6210_v53  ;;  %3962 = vmatpush.bf16.msrb.mxu3 %v6338_v59  ;;  %v5871_v53 = vld [vmem:[%s10425_s1 + $0xc18] sm:$0xf0]  ;;  %v7032_v18 = vld [vmem:[%s10427_s3 + $0xa8] sm:$0xff] }
 0x1f9   :  { %v6127_v59 = vld [vmem:[%s10425_s1 + $0xe18] sm:$0xf0]  ;;  %v7012_v28 = vld [vmem:[%s10427_s3 + $0x8] sm:$0xff] }
 0x1fa   :  { %v7014_v47 = vld [vmem:[%s10427_s3 + $0x18] sm:$0xff]  ;;  %v7020_v38 = vld [vmem:[%s10427_s3 + $0x48] sm:$0xff] }
 0x1fb   :  { %3924 = vmatpush.bf16.msrb.mxu0 %v5938_v0  ;;  %3937 = vmatpush.bf16.msrb.mxu1 %v6066_v2  ;;  %v5874_v0 = vor.u32 %v6884_v50, %v5871_v53  ;;  %v6002_v2 = vor.u32 %v6916_v55, %v5999_v56  ;;  %v7022_v24 = vld [vmem:[%s10427_s3 + $0x58] sm:$0xff]  ;;  %v7028_v39 = vld [vmem:[%s10427_s3 + $0x88] sm:$0xff]  ;;  %v7027_v50 = vld [vmem:[%s10427_s3 + $0x80] sm:$0xff]  ;;  %v3974_v53 = vmax.f32 %v9649_v57, 0.0 }
 0x1fc   :  { %3950 = vmatpush.bf16.msrb.mxu2 %v6194_v5  ;;  %3963 = vmatpush.bf16.msrb.mxu3 %v6322_v8  ;;  %v3698_v60 = vpop.f32.mrf.mxu2  ;;  %v3711_v3 = vpop.f32.mrf.mxu3  ;;  %v6130_v5 = vor.u32 %v6948_v58, %v6127_v59  ;;  %v3658_v8 = vadd.f32 %v10051_v26, %v3645_v4  ;;  %v7033_v26 = vld [vmem:[%s10427_s3 + $0xb0] sm:$0xff]  ;;  %v7030_v25 = vld [vmem:[%s10427_s3 + $0x98] sm:$0xff] }
 0x1fd   :  { %v3978_v56 = vpack.c.bf16 %v3974_v53, %v3974_v53  ;;  %v7044_v53 = vld [vmem:[%s10428_s4] ss:$0 sm:$0xff]  ;;  %s7101_s4 = smov [#allocation2]  }
 0x1fe   :  { %v3671_v9 = vadd.f32 %v10197_v63, %v3658_v8  ;;  %v7073_v63 = vld [vmem:[#allocation1 + $0x36] sm:$0xff]  ;;  %s4312_s27 = sshll.u32 %s7101_s4, 4  ;;  %s4313_s27 = int_to_ptr.vmem [resolvable:$true] %s4312_s27 }
 0x1ff   :  { %3925 = vmatpush.bf16.msrb.mxu0 %v5922_v14  ;;  %3938 = vmatpush.bf16.msrb.mxu1 %v6050_v15  ;;  %v7074_v14 = vld [vmem:[#allocation1 + $0x3f] sm:$0xff] }
 0x200   :  { %3951 = vmatpush.bf16.msrb.mxu2 %v6178_v16  ;;  %3964 = vmatpush.bf16.msrb.mxu3 %v6306_v20  ;;  %v3684_v15 = vadd.f32 %v10205_v1, %v3671_v9  ;;  %v7016_v16 = vld [vmem:[%s10427_s3 + $0x28] sm:$0xff]  ;;  %v7015_v1 = vld [vmem:[%s10427_s3 + $0x20] sm:$0xff] }
 0x202   :  { %v3697_v19 = vadd.f32 %v10240_v21, %v3684_v15  ;;  %v7038_v15 = vld [vmem:[%s10427_s3 + $0xd8] sm:$0xff] }
 0x203   :  { %3926 = vmatpush.bf16.msrb.mxu0 %v5906_v30  ;;  %3939 = vmatpush.bf16.msrb.mxu1 %v6034_v32 }
 0x204   :  { %3952 = vmatpush.bf16.msrb.mxu2 %v6162_v33  ;;  %3965 = vmatpush.bf16.msrb.mxu3 %v6290_v49  ;;  %v3710_v54 = vadd.f32 %v10251_v22, %v3697_v19  ;;  %v7013_v33 = vld [vmem:[%s10427_s3 + $0x10] sm:$0xff]  ;;  %v7036_v19 = vld [vmem:[%s10427_s3 + $0xc8] sm:$0xff] }
 0x207   :  { %3927 = vmatpush.bf16.msrb.mxu0 %v5890_v43  ;;  %3940 = vmatpush.bf16.msrb.mxu1 %v6018_v44  ;;  %v7011_v43 = vld [vmem:[%s10427_s3] sm:$0xff]  ;;  %v3973_v44 = vmax.f32 %v8859_v52, 0.0  ;;  %v540_v52 = vperm.slane %v9787_v29, 3  ;;  %v7042_v29 = vld [vmem:[%s10427_s3 + $0xf8] sm:$0xff] }
 0x208   :  { %3953 = vmatpush.bf16.msrb.mxu2 %v6146_v46  ;;  %3966 = vmatpush.bf16.msrb.mxu3 %v6274_v13  ;;  %v7019_v46 = vld [vmem:[%s10427_s3 + $0x40] sm:$0xff] }
 0x209   :  { %v3977_v13 = vpack.c.bf16 %v3973_v44, %v3973_v44 }
 0x20b   :  { %3928 = vmatpush.bf16.msrb.mxu0 %v5874_v0  ;;  %3941 = vmatpush.bf16.msrb.mxu1 %v6002_v2  ;;  %v3722_v20 = vpop.f32.mrf.mxu0  ;;  %v3735_v48 = vpop.f32.mrf.mxu1 }
 0x20c   :  { %3954 = vmatpush.bf16.msrb.mxu2 %v6130_v5  ;;  %3967 = vmatpush.bf16.msrb.mxu3 %v6258_v6  ;;  %v3723_v21 = vadd.f32 %v3722_v20, %v3710_v54  ;;  %v7035_v54 = vld [vmem:[%s10427_s3 + $0xc0] sm:$0xff] }
 0x20e   :  { %3929 = vmatmul.bf16.vlgmr.msrb.gmra.mxu0 %v7071_v11  ;;  %3942 = vmatmul.bf16.vlgmr.msrb.gmra.mxu1 %v7072_v12  ;;  %v3736_v22 = vadd.f32 %v3735_v48, %v3723_v21  ;;  %v7040_v12 = vld [vmem:[%s10427_s3 + $0xe8] sm:$0xff] }
 0x20f   :  { %4241 = vmatpush.bf16.msra.mxu0 %v7018_v27  ;;  %4254 = vmatpush.bf16.msra.mxu1 %v7026_v7 }
 0x210   :  { %4267 = vmatpush.bf16.msra.mxu2 %v7034_v23  ;;  %3968 = vmatmul.bf16.vlgmr.msrb.gmra.mxu3 %v7074_v14  ;;  %v7039_v14 = vld [vmem:[%s10427_s3 + $0xe0] sm:$0xff] }
 0x211   :  { %3955 = vmatmul.bf16.vlgmr.msrb.gmra.mxu2 %v7073_v63  ;;  %4280 = vmatpush.bf16.msra.mxu3 %v7042_v29 }
 0x213   :  { %4242 = vmatpush.bf16.msra.mxu0 %v7017_v34  ;;  %4255 = vmatpush.bf16.msra.mxu1 %v7025_v10  ;;  %v3724_v32 = vpop.f32.mrf.mxu0  ;;  %v3737_v35 = vpop.f32.mrf.mxu1 }
 0x214   :  { %4268 = vmatpush.bf16.msra.mxu2 %v7033_v26  ;;  %v3748_v30 = vpop.f32.mrf.mxu2  ;;  %v3761_v31 = vpop.f32.mrf.mxu3  ;;  %v7041_v26 = vld [vmem:[%s10427_s3 + $0xf0] sm:$0xff] }
 0x215   :  { %v3749_v49 = vadd.f32 %v3748_v30, %v3736_v22  ;;  %4281 = vmatpush.bf16.msra.mxu3 %v7041_v26 }
 0x217   :  { %4243 = vmatpush.bf16.msra.mxu0 %v7016_v16  ;;  %4256 = vmatpush.bf16.msra.mxu1 %v7024_v17  ;;  %v3762_v40 = vadd.f32 %v3761_v31, %v3749_v49 }
 0x218   :  { %4269 = vmatpush.bf16.msra.mxu2 %v7032_v18  ;;  %v7037_v18 = vld [vmem:[%s10427_s3 + $0xd0] sm:$0xff] }
 0x219   :  { %v3975_v55 = vmax.f32 %v3762_v40, 0.0  ;;  %4282 = vmatpush.bf16.msra.mxu3 %v7040_v12 }
 0x21b   :  { %4244 = vmatpush.bf16.msra.mxu0 %v7015_v1  ;;  %4257 = vmatpush.bf16.msra.mxu1 %v7023_v51  ;;  %v3979_v58 = vpack.c.bf16 %v3975_v55, %v3975_v55 }
 0x21c   :  { %4270 = vmatpush.bf16.msra.mxu2 %v7031_v45  ;;  %v3750_v41 = vpop.f32.mrf.mxu2  ;;  %v3763_v42 = vpop.f32.mrf.mxu3 }
 0x21d   :  { %4283 = vmatpush.bf16.msra.mxu3 %v7039_v14 }
 0x21f   :  { %4245 = vmatpush.bf16.msra.mxu0 %v7014_v47  ;;  %4258 = vmatpush.bf16.msra.mxu1 %v7022_v24 }
 0x220   :  { %4271 = vmatpush.bf16.msra.mxu2 %v7030_v25 }
 0x221   :  { %4284 = vmatpush.bf16.msra.mxu3 %v7038_v15 }
 0x223   :  { %4246 = vmatpush.bf16.msra.mxu0 %v7013_v33  ;;  %4259 = vmatpush.bf16.msra.mxu1 %v7021_v36 }
 0x224   :  { %4272 = vmatpush.bf16.msra.mxu2 %v7029_v37 }
 0x225   :  { %4285 = vmatpush.bf16.msra.mxu3 %v7037_v18 }
 0x227   :  { %4247 = vmatpush.bf16.msra.mxu0 %v7012_v28  ;;  %4260 = vmatpush.bf16.msra.mxu1 %v7020_v38 }
 0x228   :  { %4273 = vmatpush.bf16.msra.mxu2 %v7028_v39 }
 0x229   :  { %4286 = vmatpush.bf16.msra.mxu3 %v7036_v19 }
 0x22b   :  { %4248 = vmatpush.bf16.msra.mxu0 %v7011_v43  ;;  %4261 = vmatpush.bf16.msra.mxu1 %v7019_v46  ;;  %v3774_v59 = vpop.f32.mrf.mxu0  ;;  %v3787_v61 = vpop.f32.mrf.mxu1 }
 0x22c   :  { %4274 = vmatpush.bf16.msra.mxu2 %v7027_v50  ;;  %v3775_v60 = vadd.f32 %v3774_v59, %v540_v52 }
 0x22d   :  { %4287 = vmatpush.bf16.msra.mxu3 %v7035_v54 }
 0x22e   :  { %4249 = vmatmul.bf16.vlgmr.msra.gmra.mxu0 %v3977_v13  ;;  %4262 = vmatmul.bf16.vlgmr.msra.gmra.mxu1 %v3978_v56  ;;  %v3788_v62 = vadd.f32 %v3787_v61, %v3775_v60 }
 0x22f   :  { %4275 = vmatmul.bf16.vlgmr.msra.gmra.mxu2 %v3979_v58 }
 0x233   :  { %v3776_v2 = vpop.f32.mrf.mxu0  ;;  %v3789_v5 = vpop.f32.mrf.mxu1 }
 0x234   :  { %v3800_v3 = vpop.f32.mrf.mxu2  ;;  %v3813_v0 = vpop.f32.mrf.mxu3 }
 0x235   :  { %v3801_v4 = vadd.f32 %v3800_v3, %v3788_v62 }
 0x237   :  { %v3814_v57 = vadd.f32 %v3813_v0, %v3801_v4 }
 0x23c   :  { %v3802_v6 = vpop.f32.mrf.mxu2  ;;  %v3815_v27 = vpop.f32.mrf.mxu3 }
 0x24b   :  { %v3826_v7 = vpop.f32.mrf.mxu0  ;;  %v3839_v23 = vpop.f32.mrf.mxu1 }
 0x24c   :  { %v3827_v20 = vadd.f32 %v3826_v7, %v3814_v57 }
 0x24e   :  { %v3840_v21 = vadd.f32 %v3839_v23, %v3827_v20 }
 0x253   :  { %v3828_v34 = vpop.f32.mrf.mxu0  ;;  %v3841_v10 = vpop.f32.mrf.mxu1 }
 0x254   :  { %v3852_v8 = vpop.f32.mrf.mxu2  ;;  %v3865_v9 = vpop.f32.mrf.mxu3 }
 0x255   :  { %v3853_v47 = vadd.f32 %v3852_v8, %v3840_v21 }
 0x257   :  { %v3866_v30 = vadd.f32 %v3865_v9, %v3853_v47 }
 0x25c   :  { %v3854_v11 = vpop.f32.mrf.mxu2  ;;  %v3867_v63 = vpop.f32.mrf.mxu3 }
 0x26b   :  { %v3878_v16 = vpop.f32.mrf.mxu0  ;;  %v3891_v17 = vpop.f32.mrf.mxu1 }
 0x26c   :  { %v3879_v31 = vadd.f32 %v3878_v16, %v3866_v30 }
 0x26e   :  { %v3892_v32 = vadd.f32 %v3891_v17, %v3879_v31 }
 0x273   :  { %v3880_v51 = vpop.f32.mrf.mxu0  ;;  %v3893_v45 = vpop.f32.mrf.mxu1 }
 0x274   :  { %v3904_v1 = vpop.f32.mrf.mxu2  ;;  %v3917_v48 = vpop.f32.mrf.mxu3 }
 0x275   :  { %v3905_v22 = vadd.f32 %v3904_v1, %v3892_v32 }
 0x277   :  { %v3918_v33 = vadd.f32 %v3917_v48, %v3905_v22 }
 0x27c   :  { %v3906_v24 = vpop.f32.mrf.mxu2  ;;  %v3919_v25 = vpop.f32.mrf.mxu3 }
 0x28b   :  { %v3930_v35 = vpop.f32.mrf.mxu0  ;;  %v3943_v36 = vpop.f32.mrf.mxu1 }
 0x28c   :  { %v3931_v37 = vadd.f32 %v3930_v35, %v3918_v33 }
 0x28e   :  { %v3944_v49 = vadd.f32 %v3943_v36, %v3931_v37 }
 0x293   :  { %v3969_v38 = vpop.f32.mrf.mxu3  ;;  %v3932_v40 = vpop.f32.mrf.mxu0 }
 0x294   :  { %v3956_v28 = vpop.f32.mrf.mxu2  ;;  %v3945_v41 = vpop.f32.mrf.mxu1 }
 0x295   :  { %v3957_v39 = vadd.f32 %v3956_v28, %v3944_v49 }
 0x297   :  { %v3970_v42 = vadd.f32 %v3969_v38, %v3957_v39 }
 0x299   :  { %v3976_v43 = vmax.f32 %v3970_v42, 0.0 }
 0x29b   :  { %v3980_v44 = vpack.c.bf16 %v3976_v43, %v3976_v43  ;;  %v3971_v50 = vpop.f32.mrf.mxu3 }
 0x29c   :  { %v3958_v46 = vpop.f32.mrf.mxu2 }
 0x29d   :  { %4288 = vmatmul.bf16.vlgmr.msra.gmra.mxu3 %v3980_v44 }
 0x2ab   :  { %v4250_v55 = vpop.f32.mrf.mxu0  ;;  %v4263_v56 = vpop.f32.mrf.mxu1 }
 0x2ac   :  { %v4251_v13 = vadd.f32 %v7044_v53, %v4250_v55 }
 0x2ae   :  { %v4264_v58 = vadd.f32 %v4263_v56, %v4251_v13 }
 0x2b2   :  { %v4276_v52 = vpop.f32.mrf.mxu2 }
 0x2b3   :  { %v4277_v59 = vadd.f32 %v4276_v52, %v4264_v58  ;;  %v4252_v60 = vpop.f32.mrf.mxu0  ;;  %v4265_v61 = vpop.f32.mrf.mxu1 }
 0x2ba   :  { %v4278_v62 = vpop.f32.mrf.mxu2 }
 0x320   :  { %v4289_v3 = vpop.f32.mrf.mxu3 }
 0x321   :  { %v4290_v4 = vadd.f32 %v4289_v3, %v4277_v59 }
 0x323   :  { %v4294_v0 = vsel %vm4293_vm0, %v4290_v4, -inf }
 0x324   :  { %4295 = vmax.xlane.f32.xlu0 %v4294_v0 }
 0x328   :  { %v4291_v57 = vpop.f32.mrf.mxu3 }
 0x397   :  { %v4296_v2 = vpop.xlane.xlu0 %4295 }
 0x398   :  { %v4297_v5 = vsub.f32 %v4290_v4, %v4296_v2 }
 0x39a   :  { %v4298_v6 = vmul.f32 1.442695, %v4297_v5 }
 0x39c   :  { %7045 = vpow2.f32 %v4298_v6 }
 0x3a2   :  { %v7046_v27 = vpop.eup %7045 }
 0x3a3   :  { %v4300_v7 = vsel %vm4293_vm0, %v7046_v27, 0.0 }
 0x3a4   :  { %4301 = vadd.xlane.f32.xlu0 %v4300_v7 }
 0x417   :  { %v4302_v23 = vpop.xlane.xlu0 %4301 }
 0x418   :  { %7047 = vlog2.f32 %v4302_v23 }
 0x41e   :  { %v7048_v8 = vpop.eup %7047 }
 0x41f   :  { %v4304_v9 = vmul.f32 0.6931472, %v7048_v8 }
 0x421   :  { %v4305_v29 = vsub.f32 %v4297_v5, %v4304_v9 }
 0x423   :  { %4306 = vst.msk [vmem:[#allocation2] sm:$0x3] %vm4293_vm0, %v4305_v29 }
 0x424   :  { %4317 = dma.vmem_to_hbm [thread:$0]  %s4313_s27, 32, %s4315_s29, [#allocation3]  }
 0x425   :  { %7099 = dma.done.wait [#allocation3], 32  }
 0x426   :  { %7100 = vsyncadd [#allocation3], 4294967264 }
 0x427   :  { %4322 = vsyncpa [#allocation3], 1 }

</bundles_post_ra>
